<compile_context>
chip_gen: v5e
topology: v5e:2x2
jax: 0.10.0
libtpu: 0.0.40
codegen_flags: <defaults>
</compile_context>

<pallas_src>
import functools

import jax
import jax.numpy as jnp
from jax.experimental import pallas as pl
from jax.experimental.pallas import tpu as pltpu

BN_EPS = 1e-5
OUT_PAD = 128          # lane-dense padded width of the 10-class output
HIDDEN = 512
IN_FEATURES = 28 * 28  # 784


def _default_elementwise_dtype():
    """bf16 BN-apply on bf16-native VPUs (v6e/v7x); f32 elsewhere (v5e...)."""
    try:
        kind = jax.devices()[0].device_kind.lower()
    except Exception:  # pragma: no cover - defensive
        return jnp.float32
    if "v6" in kind or "v7" in kind:
        return jnp.bfloat16
    return jnp.float32


def mlp_kernel(x_ref,
               w1_ref, b1_ref, g1_ref, be1_ref,
               w2_ref, b2_ref, g2_ref, be2_ref,
               w3_ref, b3_ref,
               o_ref, *, n_valid, ew_dtype):
    """One grid step == one full BN group (the whole batch)."""
    x = x_ref[...].astype(jnp.bfloat16)          # in-kernel cast, no wrapper pass
    tb = x.shape[0]

    # Row mask for zero-padded batch rows (only materialized if TB > n_valid).
    mask = None
    if n_valid < tb:
        row = jax.lax.broadcasted_iota(jnp.int32, (tb, 1), 0)
        mask = row < n_valid
    inv_n = jnp.float32(1.0 / n_valid)

    def act_bn(pre, b_ref, g_ref, be_ref):
        # Bias + ReLU + BN statistics in f32 (stats precision matters: the
        # one-pass variance E[h^2]-E[h]^2 cancels badly for low-variance
        # features if the squares were bf16).
        h = jnp.maximum(pre + b_ref[...], 0.0)                 # (TB, 512) f32
        hm = h if mask is None else jnp.where(mask, h, 0.0)
        s1 = jnp.sum(hm, axis=0, keepdims=True)                # (1, 512)
        s2 = jnp.sum(hm * hm, axis=0, keepdims=True)           # (1, 512)
        mu = s1 * inv_n
        var = jnp.maximum(s2 * inv_n - mu * mu, 0.0)           # clamp: no NaN
        scale = g_ref[...] * jax.lax.rsqrt(var + BN_EPS)       # EUP rsqrt
        shift = be_ref[...] - mu * scale
        # BN apply in ew_dtype: bf16 on v6e/v7x halves the widest VALU pass
        # and the result is already the bf16 operand of the next MXU dot.
        y = (h.astype(ew_dtype) * scale.astype(ew_dtype) + shift.astype(ew_dtype))
        return y.astype(jnp.bfloat16)

    # ---- Linear(784->512) + ReLU + BN  (bf16 MXU, f32 accumulate) ----
    h1 = jnp.dot(x, w1_ref[...], preferred_element_type=jnp.float32)
    y1 = act_bn(h1, b1_ref, g1_ref, be1_ref)

    # ---- Linear(512->512) + ReLU + BN ----
    h2 = jnp.dot(y1, w2_ref[...], preferred_element_type=jnp.float32)
    y2 = act_bn(h2, b2_ref, g2_ref, be2_ref)

    # ---- Linear(512->128-padded) ; lane-dense store ----
    logits = jnp.dot(y2, w3_ref[...], preferred_element_type=jnp.float32)
    o_ref[...] = (logits + b3_ref[...]).astype(o_ref.dtype)


def prepare_params(params):
    """One-time parameter prep (hoisted out of the per-call forward path):
    bf16 weight casts + zero-padding of the last Linear to 128 outputs."""
    (w1, b1, g1, be1, w2, b2, g2, be2, w3, b3) = params
    n3 = w3.shape[1]
    w3p = jnp.zeros((w3.shape[0], OUT_PAD), jnp.float32).at[:, :n3].set(w3)
    b3p = jnp.zeros((1, OUT_PAD), jnp.float32).at[:, :n3].set(
        jnp.reshape(b3, (1, -1)))

    def row(v):
        return jnp.reshape(v, (1, -1)).astype(jnp.float32)

    return (w1.astype(jnp.bfloat16), row(b1), row(g1), row(be1),
            w2.astype(jnp.bfloat16), row(b2), row(g2), row(be2),
            w3p.astype(jnp.bfloat16), b3p)


def demo_forward(x, prepped, *, elementwise_dtype=None, n_out=10):
    """x: (B, 1, 28, 28) float32 (NCHW, like the PyTorch module's input).
    `prepped` comes from prepare_params (call it once, reuse every forward)."""
    if elementwise_dtype is None:
        elementwise_dtype = _default_elementwise_dtype()

    B = x.shape[0]
    x2d = x.reshape(B, -1).astype(jnp.float32)             # nn.Flatten -> (B, 784)
    K = x2d.shape[1]
    Bp = ((B + 15) // 16) * 16                             # bf16 packs 16 rows/vreg
    if Bp != B:
        x2d = jnp.pad(x2d, ((0, Bp - B), (0, 0)))          # cheap, rows masked in BN

    args = (x2d,) + tuple(prepped)

    # Whole-batch VMEM residency estimate (TB == B design): weights (+double
    # buffers), x, output, and the f32/bf16 activation temporaries.
    param_bytes = sum(int(a.size) * a.dtype.itemsize for a in prepped)
    act_bytes = Bp * (K * 4 + K * 2 + 4 * HIDDEN * 4 + 2 * HIDDEN * 2 + OUT_PAD * 4)
    vmem_needed = 2 * (param_bytes + Bp * K * 4 + Bp * OUT_PAD * 4) + act_bytes + (2 << 20)
    if vmem_needed > (56 << 20):
        raise ValueError(
            f"Batch {B} needs ~{vmem_needed / 2**20:.1f} MiB VMEM; the whole-batch "
            "BN kernel exceeds the v7x VMEM ceiling -- tile over batch instead "
            "(see TODO at top of file).")
    vmem_limit = int(min(max(vmem_needed, 32 << 20), 60 << 20))

    flops = 2 * Bp * (K * HIDDEN + HIDDEN * HIDDEN + HIDDEN * OUT_PAD)
    bytes_accessed = Bp * K * 4 + param_bytes + Bp * OUT_PAD * 4
    cost = pl.CostEstimate(flops=flops,
                           transcendentals=2 * HIDDEN,      # rsqrt per BN feature
                           bytes_accessed=bytes_accessed)

    # Grid axis = independent BN groups (1 here: BN statistics couple the whole
    # batch).  All operands use full-array blocks with a constant block index,
    # i.e. resident in VMEM; with grid=(1,) pipelining/buffer-depth is moot.
    def full_spec(a):
        return pl.BlockSpec(tuple(a.shape), lambda i: (0, 0))

    out = pl.pallas_call(
        functools.partial(mlp_kernel, n_valid=B, ew_dtype=elementwise_dtype),
        out_shape=jax.ShapeDtypeStruct((Bp, OUT_PAD), jnp.float32),
        grid=(1,),
        in_specs=[full_spec(a) for a in args],
        out_specs=pl.BlockSpec((Bp, OUT_PAD), lambda i: (0, 0)),
        compiler_params=pltpu.CompilerParams(
            dimension_semantics=("parallel",),
            vmem_limit_bytes=vmem_limit),
        cost_estimate=cost,
    )(*args)

    return out[:B, :n_out]


def init_params(key):
    """Deterministic synthetic parameters with the module's shapes.
    Linear weights stored as (in, out); BN scale/shift as (1, F)."""
    ks = jax.random.split(key, 3)

    def lin(k, fin, fout):
        kw, kb = jax.random.split(k)
        bound = 1.0 / jnp.sqrt(fin)
        w = jax.random.uniform(kw, (fin, fout), jnp.float32, -bound, bound)
        b = jax.random.uniform(kb, (1, fout), jnp.float32, -bound, bound)
        return w, b

    w1, b1 = lin(ks[0], IN_FEATURES, HIDDEN)
    w2, b2 = lin(ks[1], HIDDEN, HIDDEN)
    w3, b3 = lin(ks[2], HIDDEN, 10)
    g1 = jnp.ones((1, HIDDEN), jnp.float32)
    be1 = jnp.zeros((1, HIDDEN), jnp.float32)
    g2 = jnp.ones((1, HIDDEN), jnp.float32)
    be2 = jnp.zeros((1, HIDDEN), jnp.float32)
    return (w1, b1, g1, be1, w2, b2, g2, be2, w3, b3)


def reference_forward(x, params):
    """Pure-JAX f32 reference with PyTorch training-mode BN semantics."""
    (w1, b1, g1, be1, w2, b2, g2, be2, w3, b3) = params
    h = x.reshape(x.shape[0], -1)

    def bn(h, g, be):
        mu = jnp.mean(h, axis=0, keepdims=True)
        var = jnp.mean((h - mu) ** 2, axis=0, keepdims=True)
        return (h - mu) / jnp.sqrt(var + BN_EPS) * g + be

    h = jnp.maximum(h @ w1 + b1, 0.0)
    h = bn(h, g1, be1)
    h = jnp.maximum(h @ w2 + b2, 0.0)
    h = bn(h, g2, be2)
    return h @ w3 + b3


if __name__ == "__main__":
    key = jax.random.PRNGKey(0)
    kx, kp = jax.random.split(key)

    B = 8  # small batch; >=2 so training-mode BatchNorm is well defined
    x = jax.random.normal(kx, (B, 1, 28, 28), jnp.float32)  # NCHW like PyTorch
    params = init_params(kp)
    prepped = prepare_params(params)          # one-time hoisted param prep
    ref = reference_forward(x, params)

    # (1) f32-elementwise mode: tight structural/numerical check (bf16 MXU
    #     inputs with f32 accumulation -> ~3e-2 covers the drift here).
    out_f32 = jax.block_until_ready(
        demo_forward(x, prepped, elementwise_dtype=jnp.float32))
    assert out_f32.shape == (B, 10)
    err_f32 = float(jnp.max(jnp.abs(out_f32 - ref)))
    assert err_f32 < 3e-2, f"f32-elementwise max abs err {err_f32}"

    # (2) chip-default mode: bf16 BN-apply on v6e/v7x adds extra rounding on
    #     top of the bf16 MXU error, so use a looser (documented) tolerance.
    ew = _default_elementwise_dtype()
    fwd = jax.jit(functools.partial(demo_forward, elementwise_dtype=ew))
    out = jax.block_until_ready(fwd(x, prepped))
    assert out.shape == (B, 10)
    tol = 3e-2 if ew == jnp.float32 else 1e-1
    err = float(jnp.max(jnp.abs(out - ref)))
    assert err < tol, f"default-mode ({ew.__name__}) max abs err {err}"

    print("KERNEL_OK")
</pallas_src>

<mosaic_0001>
module attributes {stable_mosaic.version = 11 : i64} {
  func.func @mlp_kernel(%arg0: i32, %arg1: memref<16x784xf32, #tpu.memory_space<vmem>>, %arg2: memref<784x512xbf16, #tpu.memory_space<vmem>>, %arg3: memref<1x512xf32, #tpu.memory_space<vmem>>, %arg4: memref<1x512xf32, #tpu.memory_space<vmem>>, %arg5: memref<1x512xf32, #tpu.memory_space<vmem>>, %arg6: memref<512x512xbf16, #tpu.memory_space<vmem>>, %arg7: memref<1x512xf32, #tpu.memory_space<vmem>>, %arg8: memref<1x512xf32, #tpu.memory_space<vmem>>, %arg9: memref<1x512xf32, #tpu.memory_space<vmem>>, %arg10: memref<512x128xbf16, #tpu.memory_space<vmem>>, %arg11: memref<1x128xf32, #tpu.memory_space<vmem>>, %arg12: memref<16x128xf32, #tpu.memory_space<vmem>>) attributes {dimension_semantics = [#tpu.dimension_semantics<parallel>], iteration_bounds = array<i64: 1>, scalar_prefetch = 0 : i64, scratch_operands = 0 : i64, tpu.core_type = #tpu.core_type<tc>, window_params = [{pipeline_mode = #tpu.pipeline_mode<synchronous>, transform_indices = @transform_0, window_bounds = array<i64: 16, 784>}, {pipeline_mode = #tpu.pipeline_mode<synchronous>, transform_indices = @transform_1, window_bounds = array<i64: 784, 512>}, {pipeline_mode = #tpu.pipeline_mode<synchronous>, transform_indices = @transform_2, window_bounds = array<i64: 1, 512>}, {pipeline_mode = #tpu.pipeline_mode<synchronous>, transform_indices = @transform_3, window_bounds = array<i64: 1, 512>}, {pipeline_mode = #tpu.pipeline_mode<synchronous>, transform_indices = @transform_4, window_bounds = array<i64: 1, 512>}, {pipeline_mode = #tpu.pipeline_mode<synchronous>, transform_indices = @transform_5, window_bounds = array<i64: 512, 512>}, {pipeline_mode = #tpu.pipeline_mode<synchronous>, transform_indices = @transform_6, window_bounds = array<i64: 1, 512>}, {pipeline_mode = #tpu.pipeline_mode<synchronous>, transform_indices = @transform_7, window_bounds = array<i64: 1, 512>}, {pipeline_mode = #tpu.pipeline_mode<synchronous>, transform_indices = @transform_8, window_bounds = array<i64: 1, 512>}, {pipeline_mode = #tpu.pipeline_mode<synchronous>, transform_indices = @transform_9, window_bounds = array<i64: 512, 128>}, {pipeline_mode = #tpu.pipeline_mode<synchronous>, transform_indices = @transform_10, window_bounds = array<i64: 1, 128>}, {pipeline_mode = #tpu.pipeline_mode<synchronous>, transform_indices = @transform_11, window_bounds = array<i64: 16, 128>}]} {
    %c0 = arith.constant 0 : index
    %c0_0 = arith.constant 0 : index
    %0 = vector.load %arg1[%c0, %c0_0] : memref<16x784xf32, #tpu.memory_space<vmem>>, vector<16x784xf32>
    %1 = arith.truncf %0 : vector<16x784xf32> to vector<16x784xbf16>
    %2 = tpu.iota {dimensions = array<i32: 0>} : vector<16x1xi32>
    %c8_i32 = arith.constant 8 : i32
    %3 = vector.broadcast %c8_i32 : i32 to vector<16x1xi32>
    %4 = arith.cmpi slt, %2, %3 : vector<16x1xi32>
    %c0_1 = arith.constant 0 : index
    %c0_2 = arith.constant 0 : index
    %5 = vector.load %arg2[%c0_1, %c0_2] : memref<784x512xbf16, #tpu.memory_space<vmem>>, vector<784x512xbf16>
    %cst = arith.constant dense<0.000000e+00> : vector<16x512xf32>
    %6 = tpu.matmul %1, %5, %cst {dimension_numbers = #tpu.dot_dimension_numbers<[1], [0], [0], [1], [0, 0, 1, 1], [], []>} : vector<16x784xbf16>, vector<784x512xbf16>, vector<16x512xf32> -> vector<16x512xf32>
    %c0_3 = arith.constant 0 : index
    %c0_4 = arith.constant 0 : index
    %7 = vector.load %arg3[%c0_3, %c0_4] : memref<1x512xf32, #tpu.memory_space<vmem>>, vector<1x512xf32>
    %8 = vector.broadcast %7 : vector<1x512xf32> to vector<16x512xf32>
    %9 = arith.addf %6, %8 : vector<16x512xf32>
    %cst_5 = arith.constant 0.000000e+00 : f32
    %10 = vector.broadcast %cst_5 : f32 to vector<16x512xf32>
    %11 = arith.maximumf %9, %10 : vector<16x512xf32>
    %cst_6 = arith.constant 0.000000e+00 : f32
    %12 = vector.shape_cast %4 : vector<16x1xi1> to vector<16x1xi1>
    %13 = vector.broadcast %12 : vector<16x1xi1> to vector<16x512xi1>
    %14 = vector.broadcast %cst_6 : f32 to vector<16x512xf32>
    %15 = arith.select %13, %11, %14 : vector<16x512xi1>, vector<16x512xf32>
    %cst_7 = arith.constant dense<0.000000e+00> : vector<512xf32>
    %16 = vector.multi_reduction <add>, %15, %cst_7 [0] : vector<16x512xf32> to vector<512xf32>
    %17 = vector.shape_cast %16 : vector<512xf32> to vector<1x512xf32>
    %18 = arith.mulf %15, %15 : vector<16x512xf32>
    %cst_8 = arith.constant dense<0.000000e+00> : vector<512xf32>
    %19 = vector.multi_reduction <add>, %18, %cst_8 [0] : vector<16x512xf32> to vector<512xf32>
    %20 = vector.shape_cast %19 : vector<512xf32> to vector<1x512xf32>
    %cst_9 = arith.constant 1.250000e-01 : f32
    %21 = vector.broadcast %cst_9 : f32 to vector<1x512xf32>
    %22 = arith.mulf %17, %21 : vector<1x512xf32>
    %cst_10 = arith.constant 1.250000e-01 : f32
    %23 = vector.broadcast %cst_10 : f32 to vector<1x512xf32>
    %24 = arith.mulf %20, %23 : vector<1x512xf32>
    %25 = arith.mulf %22, %22 : vector<1x512xf32>
    %26 = arith.subf %24, %25 : vector<1x512xf32>
    %cst_11 = arith.constant 0.000000e+00 : f32
    %27 = vector.broadcast %cst_11 : f32 to vector<1x512xf32>
    %28 = arith.maximumf %26, %27 : vector<1x512xf32>
    %c0_12 = arith.constant 0 : index
    %c0_13 = arith.constant 0 : index
    %29 = vector.load %arg4[%c0_12, %c0_13] : memref<1x512xf32, #tpu.memory_space<vmem>>, vector<1x512xf32>
    %cst_14 = arith.constant 9.99999974E-6 : f32
    %30 = vector.broadcast %cst_14 : f32 to vector<1x512xf32>
    %31 = arith.addf %28, %30 : vector<1x512xf32>
    %32 = math.rsqrt %31 : vector<1x512xf32>
    %33 = arith.mulf %29, %32 : vector<1x512xf32>
    %c0_15 = arith.constant 0 : index
    %c0_16 = arith.constant 0 : index
    %34 = vector.load %arg5[%c0_15, %c0_16] : memref<1x512xf32, #tpu.memory_space<vmem>>, vector<1x512xf32>
    %35 = arith.mulf %22, %33 : vector<1x512xf32>
    %36 = arith.subf %34, %35 : vector<1x512xf32>
    %37 = vector.broadcast %33 : vector<1x512xf32> to vector<16x512xf32>
    %38 = arith.mulf %11, %37 : vector<16x512xf32>
    %39 = vector.broadcast %36 : vector<1x512xf32> to vector<16x512xf32>
    %40 = arith.addf %38, %39 : vector<16x512xf32>
    %41 = arith.truncf %40 : vector<16x512xf32> to vector<16x512xbf16>
    %c0_17 = arith.constant 0 : index
    %c0_18 = arith.constant 0 : index
    %42 = vector.load %arg6[%c0_17, %c0_18] : memref<512x512xbf16, #tpu.memory_space<vmem>>, vector<512x512xbf16>
    %cst_19 = arith.constant dense<0.000000e+00> : vector<16x512xf32>
    %43 = tpu.matmul %41, %42, %cst_19 {dimension_numbers = #tpu.dot_dimension_numbers<[1], [0], [0], [1], [0, 0, 1, 1], [], []>} : vector<16x512xbf16>, vector<512x512xbf16>, vector<16x512xf32> -> vector<16x512xf32>
    %c0_20 = arith.constant 0 : index
    %c0_21 = arith.constant 0 : index
    %44 = vector.load %arg7[%c0_20, %c0_21] : memref<1x512xf32, #tpu.memory_space<vmem>>, vector<1x512xf32>
    %45 = vector.broadcast %44 : vector<1x512xf32> to vector<16x512xf32>
    %46 = arith.addf %43, %45 : vector<16x512xf32>
    %cst_22 = arith.constant 0.000000e+00 : f32
    %47 = vector.broadcast %cst_22 : f32 to vector<16x512xf32>
    %48 = arith.maximumf %46, %47 : vector<16x512xf32>
    %cst_23 = arith.constant 0.000000e+00 : f32
    %49 = vector.shape_cast %4 : vector<16x1xi1> to vector<16x1xi1>
    %50 = vector.broadcast %49 : vector<16x1xi1> to vector<16x512xi1>
    %51 = vector.broadcast %cst_23 : f32 to vector<16x512xf32>
    %52 = arith.select %50, %48, %51 : vector<16x512xi1>, vector<16x512xf32>
    %cst_24 = arith.constant dense<0.000000e+00> : vector<512xf32>
    %53 = vector.multi_reduction <add>, %52, %cst_24 [0] : vector<16x512xf32> to vector<512xf32>
    %54 = vector.shape_cast %53 : vector<512xf32> to vector<1x512xf32>
    %55 = arith.mulf %52, %52 : vector<16x512xf32>
    %cst_25 = arith.constant dense<0.000000e+00> : vector<512xf32>
    %56 = vector.multi_reduction <add>, %55, %cst_25 [0] : vector<16x512xf32> to vector<512xf32>
    %57 = vector.shape_cast %56 : vector<512xf32> to vector<1x512xf32>
    %cst_26 = arith.constant 1.250000e-01 : f32
    %58 = vector.broadcast %cst_26 : f32 to vector<1x512xf32>
    %59 = arith.mulf %54, %58 : vector<1x512xf32>
    %cst_27 = arith.constant 1.250000e-01 : f32
    %60 = vector.broadcast %cst_27 : f32 to vector<1x512xf32>
    %61 = arith.mulf %57, %60 : vector<1x512xf32>
    %62 = arith.mulf %59, %59 : vector<1x512xf32>
    %63 = arith.subf %61, %62 : vector<1x512xf32>
    %cst_28 = arith.constant 0.000000e+00 : f32
    %64 = vector.broadcast %cst_28 : f32 to vector<1x512xf32>
    %65 = arith.maximumf %63, %64 : vector<1x512xf32>
    %c0_29 = arith.constant 0 : index
    %c0_30 = arith.constant 0 : index
    %66 = vector.load %arg8[%c0_29, %c0_30] : memref<1x512xf32, #tpu.memory_space<vmem>>, vector<1x512xf32>
    %cst_31 = arith.constant 9.99999974E-6 : f32
    %67 = vector.broadcast %cst_31 : f32 to vector<1x512xf32>
    %68 = arith.addf %65, %67 : vector<1x512xf32>
    %69 = math.rsqrt %68 : vector<1x512xf32>
    %70 = arith.mulf %66, %69 : vector<1x512xf32>
    %c0_32 = arith.constant 0 : index
    %c0_33 = arith.constant 0 : index
    %71 = vector.load %arg9[%c0_32, %c0_33] : memref<1x512xf32, #tpu.memory_space<vmem>>, vector<1x512xf32>
    %72 = arith.mulf %59, %70 : vector<1x512xf32>
    %73 = arith.subf %71, %72 : vector<1x512xf32>
    %74 = vector.broadcast %70 : vector<1x512xf32> to vector<16x512xf32>
    %75 = arith.mulf %48, %74 : vector<16x512xf32>
    %76 = vector.broadcast %73 : vector<1x512xf32> to vector<16x512xf32>
    %77 = arith.addf %75, %76 : vector<16x512xf32>
    %78 = arith.truncf %77 : vector<16x512xf32> to vector<16x512xbf16>
    %c0_34 = arith.constant 0 : index
    %c0_35 = arith.constant 0 : index
    %79 = vector.load %arg10[%c0_34, %c0_35] : memref<512x128xbf16, #tpu.memory_space<vmem>>, vector<512x128xbf16>
    %cst_36 = arith.constant dense<0.000000e+00> : vector<16x128xf32>
    %80 = tpu.matmul %78, %79, %cst_36 {dimension_numbers = #tpu.dot_dimension_numbers<[1], [0], [0], [1], [0, 0, 1, 1], [], []>} : vector<16x512xbf16>, vector<512x128xbf16>, vector<16x128xf32> -> vector<16x128xf32>
    %c0_37 = arith.constant 0 : index
    %c0_38 = arith.constant 0 : index
    %81 = vector.load %arg11[%c0_37, %c0_38] : memref<1x128xf32, #tpu.memory_space<vmem>>, vector<1x128xf32>
    %82 = vector.broadcast %81 : vector<1x128xf32> to vector<16x128xf32>
    %83 = arith.addf %80, %82 : vector<16x128xf32>
    %c0_39 = arith.constant 0 : index
    %c0_40 = arith.constant 0 : index
    %84 = vector.load %arg12[%c0_39, %c0_40] : memref<16x128xf32, #tpu.memory_space<vmem>>, vector<16x128xf32>
    tpu.vector_store %arg12[%c0_39, %c0_40], %83 {strides = array<i32>} : memref<16x128xf32, #tpu.memory_space<vmem>>, vector<16x128xf32>,
    return
  }
  func.func @transform_0(%arg0: i32) -> (i32, i32) {
    %c0_i32 = arith.constant 0 : i32
    %c0_i32_0 = arith.constant 0 : i32
    %c0_i32_1 = arith.constant 0 : i32
    return %c0_i32, %c0_i32_0 : i32, i32
  }
  func.func @transform_1(%arg0: i32) -> (i32, i32) {
    %c0_i32 = arith.constant 0 : i32
    %c0_i32_0 = arith.constant 0 : i32
    %c0_i32_1 = arith.constant 0 : i32
    return %c0_i32, %c0_i32_0 : i32, i32
  }
  func.func @transform_2(%arg0: i32) -> (i32, i32) {
    %c0_i32 = arith.constant 0 : i32
    %c0_i32_0 = arith.constant 0 : i32
    %c0_i32_1 = arith.constant 0 : i32
    return %c0_i32, %c0_i32_0 : i32, i32
  }
  func.func @transform_3(%arg0: i32) -> (i32, i32) {
    %c0_i32 = arith.constant 0 : i32
    %c0_i32_0 = arith.constant 0 : i32
    %c0_i32_1 = arith.constant 0 : i32
    return %c0_i32, %c0_i32_0 : i32, i32
  }
  func.func @transform_4(%arg0: i32) -> (i32, i32) {
    %c0_i32 = arith.constant 0 : i32
    %c0_i32_0 = arith.constant 0 : i32
    %c0_i32_1 = arith.constant 0 : i32
    return %c0_i32, %c0_i32_0 : i32, i32
  }
  func.func @transform_5(%arg0: i32) -> (i32, i32) {
    %c0_i32 = arith.constant 0 : i32
    %c0_i32_0 = arith.constant 0 : i32
    %c0_i32_1 = arith.constant 0 : i32
    return %c0_i32, %c0_i32_0 : i32, i32
  }
  func.func @transform_6(%arg0: i32) -> (i32, i32) {
    %c0_i32 = arith.constant 0 : i32
    %c0_i32_0 = arith.constant 0 : i32
    %c0_i32_1 = arith.constant 0 : i32
    return %c0_i32, %c0_i32_0 : i32, i32
  }
  func.func @transform_7(%arg0: i32) -> (i32, i32) {
    %c0_i32 = arith.constant 0 : i32
    %c0_i32_0 = arith.constant 0 : i32
    %c0_i32_1 = arith.constant 0 : i32
    return %c0_i32, %c0_i32_0 : i32, i32
  }
  func.func @transform_8(%arg0: i32) -> (i32, i32) {
    %c0_i32 = arith.constant 0 : i32
    %c0_i32_0 = arith.constant 0 : i32
    %c0_i32_1 = arith.constant 0 : i32
    return %c0_i32, %c0_i32_0 : i32, i32
  }
  func.func @transform_9(%arg0: i32) -> (i32, i32) {
    %c0_i32 = arith.constant 0 : i32
    %c0_i32_0 = arith.constant 0 : i32
    %c0_i32_1 = arith.constant 0 : i32
    return %c0_i32, %c0_i32_0 : i32, i32
  }
  func.func @transform_10(%arg0: i32) -> (i32, i32) {
    %c0_i32 = arith.constant 0 : i32
    %c0_i32_0 = arith.constant 0 : i32
    %c0_i32_1 = arith.constant 0 : i32
    return %c0_i32, %c0_i32_0 : i32, i32
  }
  func.func @transform_11(%arg0: i32) -> (i32, i32) {
    %c0_i32 = arith.constant 0 : i32
    %c0_i32_0 = arith.constant 0 : i32
    %c0_i32_1 = arith.constant 0 : i32
    return %c0_i32, %c0_i32_0 : i32, i32
  }
}

</mosaic_0001>

<bundles_post_ra>
// kernel: tpu_custom_call.1
= control target key start
LH: loop header
LB: loop body
LE: loop exit
PB: predicated region body
PF: predicated region fallthrough
CT: control target
= control target key end

     0   :  { %16 = vsyncpa [#allocation3], 0  ;;  %s6018_s0 = inlined_call_operand.hbm [shape: f32[16,784], index: 0, kind: input, shape index: {}]   ;;  %s6019_s1 = inlined_call_operand.hbm [shape: bf16[784,512], index: 1, kind: input, shape index: {}]   ;;  %s6020_s2 = inlined_call_operand.hbm [shape: f32[1,512], index: 2, kind: input, shape index: {}]   ;;  %s6021_s3 = inlined_call_operand.hbm [shape: f32[1,512], index: 3, kind: input, shape index: {}]   ;;  %s6022_s4 = inlined_call_operand.hbm [shape: f32[1,512], index: 4, kind: input, shape index: {}]   ;;  %s6023_s5 = inlined_call_operand.hbm [shape: bf16[512,512], index: 5, kind: input, shape index: {}]   ;;  %s6024_s6 = inlined_call_operand.vmem [shape: f32[1,512], index: 6, kind: input, shape index: {}]   ;;  %s6025_s7 = inlined_call_operand.hbm [shape: f32[1,512], index: 7, kind: input, shape index: {}]   ;;  %s6026_s8 = inlined_call_operand.hbm [shape: f32[1,512], index: 8, kind: input, shape index: {}]   ;;  %s6027_s9 = inlined_call_operand.hbm [shape: bf16[512,128], index: 9, kind: input, shape index: {}]   ;;  %s6028_s10 = inlined_call_operand.vmem [shape: f32[1,128], index: 10, kind: input, shape index: {}]   ;;  %s6029_s11 = inlined_call_operand.hbm [shape: f32[16,128], index: 11, kind: output, shape index: {}]  }
   0x1   :  { %17 = vsyncpa [#allocation6], 0 }
   0x2   :  { %18 = vsyncpa [#allocation9], 0 }
   0x3   :  { %19 = vsyncpa [#allocation12], 0 }
   0x4   :  { %20 = vsyncpa [#allocation15], 0  ;;  %s39_s19 = sshll.u32 %s6019_s1, 4  ;;  %s40_s19 = int_to_ptr.hbm [resolvable:$true] %s39_s19 }
   0x5   :  { %21 = vsyncpa [#allocation4], 0  ;;  %s5623_s20 = smov [#allocation5]   ;;  %s64_s24 = sshll.u32 %s6021_s3, 4  ;;  %s65_s24 = int_to_ptr.hbm [resolvable:$true] %s64_s24 }
   0x6   :  { %s41_s21 = sshll.u32 %s5623_s20, 4  ;;  %s5624_s25 = smov 256   ;;  %s42_s21 = int_to_ptr.vmem [resolvable:$true] %s41_s21 }
   0x7   :  { %s5625_s26 = smov 16   ;;  %s5626_s27 = smov [#allocation8]  }
   0x8   :  { %47 = dma.hbm_to_vmem [thread:$0]  %s40_s19, 25088, %s42_s21, [#allocation6], %s5624_s25, %s5624_s25, %s5625_s26  }
   0x9   :  { %s66_s28 = sshll.u32 %s5626_s27, 4  ;;  %s85_s12 = sshll.u32 %s6023_s5, 4  ;;  %s67_s28 = int_to_ptr.vmem [resolvable:$true] %s66_s28  ;;  %s86_s12 = int_to_ptr.hbm [resolvable:$true] %s85_s12 }
   0xa   :  { %69 = dma.hbm_to_vmem [thread:$0]  %s65_s24, 64, %s67_s28, [#allocation9]  }
   0xb   :  { %s112_s14 = sshll.u32 %s6026_s8, 4  ;;  %s5627_s15 = smov [#allocation11]   ;;  %s113_s14 = int_to_ptr.hbm [resolvable:$true] %s112_s14 }
   0xc   :  { %s87_s16 = sshll.u32 %s5627_s15, 4  ;;  %s5628_s3 = smov [#allocation14]   ;;  %s88_s16 = int_to_ptr.vmem [resolvable:$true] %s87_s16 }
   0xd   :  { %93 = dma.hbm_to_vmem [thread:$0]  %s86_s12, 16384, %s88_s16, [#allocation12], %s5624_s25, %s5624_s25, %s5625_s26  }
   0xe   :  { %s114_s17 = sshll.u32 %s5628_s3, 4  ;;  %s26_s20 = sshll.u32 %s6018_s0, 4  ;;  %s115_s17 = int_to_ptr.vmem [resolvable:$true] %s114_s17  ;;  %s27_s20 = int_to_ptr.hbm [resolvable:$true] %s26_s20 }
   0xf   :  { %117 = dma.hbm_to_vmem [thread:$0]  %s113_s14, 64, %s115_s17, [#allocation15]  }
  0x10   :  { %s5629_s5 = smov [#allocation2]   ;;  %s53_s8 = sshll.u32 %s6020_s2, 4  ;;  %s54_s8 = int_to_ptr.hbm [resolvable:$true] %s53_s8 }
  0x11   :  { %s28_s21 = sshll.u32 %s5629_s5, 4  ;;  %s5630_s24 = smov 896   ;;  %s29_s21 = int_to_ptr.vmem [resolvable:$true] %s28_s21 }
  0x12   :  { %s5631_s27 = smov 56   ;;  %s5632_s25 = smov [#allocation7]  }
  0x13   :  { %34 = dma.hbm_to_vmem [thread:$0]  %s27_s20, 1792, %s29_s21, [#allocation3], %s5630_s24, %s5630_s24, %s5631_s27  }
  0x14   :  { %s55_s26 = sshll.u32 %s5632_s25, 4  ;;  %s75_s0 = sshll.u32 %s6022_s4, 4  ;;  %s56_s26 = int_to_ptr.vmem [resolvable:$true] %s55_s26  ;;  %s76_s0 = int_to_ptr.hbm [resolvable:$true] %s75_s0 }
  0x15   :  { %58 = dma.hbm_to_vmem [thread:$0]  %s54_s8, 64, %s56_s26, [#allocation6]  }
  0x16   :  { %s101_s1 = sshll.u32 %s6025_s7, 4  ;;  %s5633_s13 = smov [#allocation10]   ;;  %s102_s1 = int_to_ptr.hbm [resolvable:$true] %s101_s1 }
  0x17   :  { %s77_s14 = sshll.u32 %s5633_s13, 4  ;;  %s5634_s2 = smov [#allocation13]   ;;  %s78_s14 = int_to_ptr.vmem [resolvable:$true] %s77_s14 }
  0x18   :  { %80 = dma.hbm_to_vmem [thread:$0]  %s76_s0, 64, %s78_s14, [#allocation9]  }
  0x19   :  { %s103_s15 = sshll.u32 %s5634_s2, 4  ;;  %s122_s17 = sshll.u32 %s6027_s9, 4  ;;  %s104_s15 = int_to_ptr.vmem [resolvable:$true] %s103_s15  ;;  %s123_s17 = int_to_ptr.hbm [resolvable:$true] %s122_s17 }
  0x1a   :  { %106 = dma.hbm_to_vmem [thread:$0]  %s102_s1, 64, %s104_s15, [#allocation12]  }
  0x1b   :  { %s5635_s4 = smov [#allocation16]   ;;  %s5636_s19 = smov 64  }
  0x1c   :  { %s124_s18 = sshll.u32 %s5635_s4, 4  ;;  %s5637_s20 = smov 4   ;;  %s125_s18 = int_to_ptr.vmem [resolvable:$true] %s124_s18 }
  0x1d   :  { %130 = dma.hbm_to_vmem [thread:$0]  %s123_s17, 4096, %s125_s18, [#allocation15], %s5636_s19, %s5636_s19, %s5637_s20  }
  0x1e   :  { %5611 = dma.done.wait [#allocation3], 1792  }
  0x1f   :  { %5612 = vsyncadd [#allocation3], 4294965504 }
  0x20   :  { %5613 = dma.done.wait [#allocation6], 25152  }
  0x21   :  { %5614 = vsyncadd [#allocation6], 4294942144 }
  0x22   :  { %5615 = dma.done.wait [#allocation9], 128  }
  0x23   :  { %5616 = vsyncadd [#allocation9], 4294967168 }
  0x24   :  { %5617 = dma.done.wait [#allocation12], 16448  }
  0x25   :  { %5618 = vsyncadd [#allocation12], 4294950848 }
  0x26   :  { %5619 = dma.done.wait [#allocation15], 4160  }
  0x27   :  { %5620 = vsyncadd [#allocation15], 4294963136  ;;  %v3666_v0 = vld [vmem:[#allocation5 + $0xe0] sm:$0xf]  ;;  %v5010_v1 = vld [vmem:[#allocation5 + $0xec] sm:$0xf0] }
  0x28   :  { %v3794_v2 = vld [vmem:[#allocation5 + $0x1e0] sm:$0xf]  ;;  %v3667_v3 = vor.u32 %v5010_v1, %v3666_v0  ;;  %v5042_v4 = vld [vmem:[#allocation5 + $0x1ec] sm:$0xf0]  ;;  %vm1382_vm0 = vcmask 130048   ;;  %vm1934_vm6 = vcmask 1040384  }
  0x29   :  { %v3922_v5 = vld [vmem:[#allocation5 + $0x2e0] sm:$0xf]  ;;  %v5074_v6 = vld [vmem:[#allocation5 + $0x2ec] sm:$0xf0]  ;;  %v3795_v7 = vor.u32 %v5042_v4, %v3794_v2  ;;  %vm1936_vm14 = vcmask 1042434   ;;  %vm1938_vm15 = vcmask 1041408  }
  0x2a   :  { %v3923_v8 = vor.u32 %v5074_v6, %v3922_v5  ;;  %v4050_v9 = vld [vmem:[#allocation5 + $0x3e0] sm:$0xf]  ;;  %v5106_v10 = vld [vmem:[#allocation5 + $0x3ec] sm:$0xf0]  ;;  %1386 = vmatpush.bf16.msra.mxu0 %v3667_v3  ;;  %s5638_s21 = smov [#allocation17]   ;;  %s3535_s24 = sshll.u32 %s6029_s11, 4  ;;  %s3536_s24 = int_to_ptr.hbm [resolvable:$true] %s3535_s24 }
  0x2b   :  { %v3650_v11 = vld [vmem:[#allocation5 + $0xc0] sm:$0xf]  ;;  %v4051_v12 = vor.u32 %v5106_v10, %v4050_v9  ;;  %v5006_v13 = vld [vmem:[#allocation5 + $0xcc] sm:$0xf0]  ;;  %1400 = vmatpush.bf16.msra.mxu1 %v3795_v7  ;;  %s3533_s22 = sshll.u32 %s5638_s21, 4  ;;  %s5640_s27 = smov 8   ;;  %s3534_s22 = int_to_ptr.vmem [resolvable:$true] %s3533_s22 }
  0x2c   :  { %v3778_v14 = vld [vmem:[#allocation5 + $0x1c0] sm:$0xf]  ;;  %v5038_v15 = vld [vmem:[#allocation5 + $0x1cc] sm:$0xf0]  ;;  %1414 = vmatpush.bf16.msra.mxu2 %v3923_v8  ;;  %v3651_v16 = vor.u32 %v5006_v13, %v3650_v11 }
  0x2d   :  { %v3779_v17 = vor.u32 %v5038_v15, %v3778_v14  ;;  %v3906_v18 = vld [vmem:[#allocation5 + $0x2c0] sm:$0xf]  ;;  %v5070_v19 = vld [vmem:[#allocation5 + $0x2cc] sm:$0xf0]  ;;  %1428 = vmatpush.bf16.msra.mxu3 %v4051_v12 }
  0x2e   :  { %v4034_v20 = vld [vmem:[#allocation5 + $0x3c0] sm:$0xf]  ;;  %v3907_v21 = vor.u32 %v5070_v19, %v3906_v18  ;;  %v5102_v22 = vld [vmem:[#allocation5 + $0x3cc] sm:$0xf0]  ;;  %1387 = vmatpush.bf16.msra.mxu0 %v3651_v16 }
  0x2f   :  { %v3634_v23 = vld [vmem:[#allocation5 + $0xa0] sm:$0xf]  ;;  %v5002_v24 = vld [vmem:[#allocation5 + $0xac] sm:$0xf0]  ;;  %v4035_v25 = vor.u32 %v5102_v22, %v4034_v20  ;;  %1401 = vmatpush.bf16.msra.mxu1 %v3779_v17 }
  0x30   :  { %v3762_v26 = vld [vmem:[#allocation5 + $0x1a0] sm:$0xf]  ;;  %v5034_v27 = vld [vmem:[#allocation5 + $0x1ac] sm:$0xf0]  ;;  %v3635_v29 = vor.u32 %v5002_v24, %v3634_v23  ;;  %1415 = vmatpush.bf16.msra.mxu2 %v3907_v21 }
  0x31   :  { %v3890_v28 = vld [vmem:[#allocation5 + $0x2a0] sm:$0xf]  ;;  %v5066_v30 = vld [vmem:[#allocation5 + $0x2ac] sm:$0xf0]  ;;  %v3763_v33 = vor.u32 %v5034_v27, %v3762_v26  ;;  %1429 = vmatpush.bf16.msra.mxu3 %v4035_v25 }
  0x32   :  { %v4018_v31 = vld [vmem:[#allocation5 + $0x3a0] sm:$0xf]  ;;  %v5098_v32 = vld [vmem:[#allocation5 + $0x3ac] sm:$0xf0]  ;;  %v3891_v34 = vor.u32 %v5066_v30, %v3890_v28  ;;  %1388 = vmatpush.bf16.msra.mxu0 %v3635_v29 }
  0x33   :  { %v3618_v35 = vld [vmem:[#allocation5 + $0x80] sm:$0xf]  ;;  %v4998_v36 = vld [vmem:[#allocation5 + $0x8c] sm:$0xf0]  ;;  %v4019_v38 = vor.u32 %v5098_v32, %v4018_v31  ;;  %1402 = vmatpush.bf16.msra.mxu1 %v3763_v33  ;;  %v5008_v32 = vld [vmem:[#allocation5 + $0xe4] sm:$0xf] }
  0x34   :  { %v3746_v37 = vld [vmem:[#allocation5 + $0x180] sm:$0xf]  ;;  %v5030_v39 = vld [vmem:[#allocation5 + $0x18c] sm:$0xf0]  ;;  %v3619_v44 = vor.u32 %v4998_v36, %v3618_v35  ;;  %1416 = vmatpush.bf16.msra.mxu2 %v3891_v34  ;;  %v3668_v33 = vld [vmem:[#allocation5 + $0xf0] sm:$0xf0] }
  0x35   :  { %v3874_v40 = vld [vmem:[#allocation5 + $0x280] sm:$0xf]  ;;  %v5062_v41 = vld [vmem:[#allocation5 + $0x28c] sm:$0xf0]  ;;  %v3747_v45 = vor.u32 %v5030_v39, %v3746_v37  ;;  %1430 = vmatpush.bf16.msra.mxu3 %v4019_v38  ;;  %v179_v36 = vld [vmem:[#allocation2 + $0x48] sm:$0xff] }
  0x36   :  { %v4002_v42 = vld [vmem:[#allocation5 + $0x380] sm:$0xf]  ;;  %v5094_v43 = vld [vmem:[#allocation5 + $0x38c] sm:$0xf0]  ;;  %v3875_v46 = vor.u32 %v5062_v41, %v3874_v40  ;;  %1389 = vmatpush.bf16.msra.mxu0 %v3619_v44  ;;  %v5040_v41 = vld [vmem:[#allocation5 + $0x1e4] sm:$0xf] }
  0x37   :  { %v3602_v47 = vld [vmem:[#allocation5 + $0x60] sm:$0xf]  ;;  %v4994_v48 = vld [vmem:[#allocation5 + $0x6c] sm:$0xf0]  ;;  %v4003_v50 = vor.u32 %v5094_v43, %v4002_v42  ;;  %1403 = vmatpush.bf16.msra.mxu1 %v3747_v45  ;;  %v177_v43 = vld [vmem:[#allocation2 + $0x38] sm:$0xff] }
  0x38   :  { %v3730_v49 = vld [vmem:[#allocation5 + $0x160] sm:$0xf]  ;;  %v5026_v51 = vld [vmem:[#allocation5 + $0x16c] sm:$0xf0]  ;;  %v3603_v56 = vor.u32 %v4994_v48, %v3602_v47  ;;  %1417 = vmatpush.bf16.msra.mxu2 %v3875_v46  ;;  %v3796_v46 = vld [vmem:[#allocation5 + $0x1f0] sm:$0xf0] }
  0x39   :  { %v3858_v52 = vld [vmem:[#allocation5 + $0x260] sm:$0xf]  ;;  %v5058_v53 = vld [vmem:[#allocation5 + $0x26c] sm:$0xf0]  ;;  %v3731_v57 = vor.u32 %v5026_v51, %v3730_v49  ;;  %1431 = vmatpush.bf16.msra.mxu3 %v4003_v50  ;;  %v173_v47 = vld [vmem:[#allocation2 + $0x18] sm:$0xff]  ;;  %v3671_v50 = vor.u32 %v5008_v32, %v3668_v33 }
  0x3a   :  { %v3986_v54 = vld [vmem:[#allocation5 + $0x360] sm:$0xf]  ;;  %v5090_v55 = vld [vmem:[#allocation5 + $0x36c] sm:$0xf0]  ;;  %v3859_v58 = vor.u32 %v5058_v53, %v3858_v52  ;;  %1390 = vmatpush.bf16.msra.mxu0 %v3603_v56 }
  0x3b   :  { %v3586_v59 = vld [vmem:[#allocation5 + $0x40] sm:$0xf]  ;;  %v4990_v60 = vld [vmem:[#allocation5 + $0x4c] sm:$0xf0]  ;;  %v3987_v62 = vor.u32 %v5090_v55, %v3986_v54  ;;  %1404 = vmatpush.bf16.msra.mxu1 %v3731_v57  ;;  %v5004_v57 = vld [vmem:[#allocation5 + $0xc4] sm:$0xf] }
  0x3c   :  { %v3714_v61 = vld [vmem:[#allocation5 + $0x140] sm:$0xf]  ;;  %v5022_v63 = vld [vmem:[#allocation5 + $0x14c] sm:$0xf0]  ;;  %v3587_v4 = vor.u32 %v4990_v60, %v3586_v59  ;;  %1418 = vmatpush.bf16.msra.mxu2 %v3859_v58  ;;  %v3652_v58 = vld [vmem:[#allocation5 + $0xd0] sm:$0xf0] }
  0x3d   :  { %v3842_v0 = vld [vmem:[#allocation5 + $0x240] sm:$0xf]  ;;  %v5054_v1 = vld [vmem:[#allocation5 + $0x24c] sm:$0xf0]  ;;  %v3715_v6 = vor.u32 %v5022_v63, %v3714_v61  ;;  %1432 = vmatpush.bf16.msra.mxu3 %v3987_v62  ;;  %v171_v61 = vld [vmem:[#allocation2 + $0x8] sm:$0xff]  ;;  %v3799_v63 = vor.u32 %v5040_v41, %v3796_v46 }
  0x3e   :  { %v3970_v2 = vld [vmem:[#allocation5 + $0x340] sm:$0xf]  ;;  %v5086_v3 = vld [vmem:[#allocation5 + $0x34c] sm:$0xf0]  ;;  %v3843_v7 = vor.u32 %v5054_v1, %v3842_v0  ;;  %1391 = vmatpush.bf16.msra.mxu0 %v3587_v4  ;;  %v5036_v1 = vld [vmem:[#allocation5 + $0x1c4] sm:$0xf]  ;;  %v3655_v4 = vor.u32 %v5004_v57, %v3652_v58 }
  0x3f   :  { %v3570_v5 = vld [vmem:[#allocation5 + $0x20] sm:$0xf]  ;;  %v4986_v8 = vld [vmem:[#allocation5 + $0x2c] sm:$0xf0]  ;;  %v3971_v11 = vor.u32 %v5086_v3, %v3970_v2  ;;  %1405 = vmatpush.bf16.msra.mxu1 %v3715_v6  ;;  %v3780_v2 = vld [vmem:[#allocation5 + $0x1d0] sm:$0xf0] }
  0x40   :  { %v3698_v9 = vld [vmem:[#allocation5 + $0x120] sm:$0xf]  ;;  %v5018_v10 = vld [vmem:[#allocation5 + $0x12c] sm:$0xf0]  ;;  %v3571_v18 = vor.u32 %v4986_v8, %v3570_v5  ;;  %1419 = vmatpush.bf16.msra.mxu2 %v3843_v7  ;;  %v3732_v41 = vld [vmem:[#allocation5 + $0x170] sm:$0xf0] }
  0x41   :  { %v3826_v12 = vld [vmem:[#allocation5 + $0x220] sm:$0xf]  ;;  %v5050_v13 = vld [vmem:[#allocation5 + $0x22c] sm:$0xf0]  ;;  %v3699_v23 = vor.u32 %v5018_v10, %v3698_v9  ;;  %1433 = vmatpush.bf16.msra.mxu3 %v3971_v11  ;;  %v5000_v10 = vld [vmem:[#allocation5 + $0xa4] sm:$0xf] }
  0x42   :  { %v3954_v14 = vld [vmem:[#allocation5 + $0x320] sm:$0xf]  ;;  %v5082_v15 = vld [vmem:[#allocation5 + $0x32c] sm:$0xf0]  ;;  %v3827_v24 = vor.u32 %v5050_v13, %v3826_v12  ;;  %1392 = vmatpush.bf16.msra.mxu0 %v3571_v18  ;;  %v3636_v11 = vld [vmem:[#allocation5 + $0xb0] sm:$0xf0]  ;;  %v3783_v12 = vor.u32 %v5036_v1, %v3780_v2 }
  0x43   :  { %v3554_v16 = vld [vmem:[#allocation5] sm:$0xf]  ;;  %v4982_v17 = vld [vmem:[#allocation5 + $0xc] sm:$0xf0]  ;;  %v3955_v28 = vor.u32 %v5082_v15, %v3954_v14  ;;  %1406 = vmatpush.bf16.msra.mxu1 %v3699_v23  ;;  %v5032_v14 = vld [vmem:[#allocation5 + $0x1a4] sm:$0xf] }
  0x44   :  { %v3682_v19 = vld [vmem:[#allocation5 + $0x100] sm:$0xf]  ;;  %v5014_v20 = vld [vmem:[#allocation5 + $0x10c] sm:$0xf0]  ;;  %v3555_v35 = vor.u32 %v4982_v17, %v3554_v16  ;;  %1420 = vmatpush.bf16.msra.mxu2 %v3827_v24  ;;  %v3764_v15 = vld [vmem:[#allocation5 + $0x1b0] sm:$0xf0]  ;;  %v3639_v17 = vor.u32 %v5000_v10, %v3636_v11 }
  0x45   :  { %v3810_v21 = vld [vmem:[#allocation5 + $0x200] sm:$0xf]  ;;  %v5046_v22 = vld [vmem:[#allocation5 + $0x20c] sm:$0xf0]  ;;  %v3683_v39 = vor.u32 %v5014_v20, %v3682_v19  ;;  %1434 = vmatpush.bf16.msra.mxu3 %v3955_v28  ;;  %v3620_v23 = vld [vmem:[#allocation5 + $0x90] sm:$0xf0]  ;;  %v3767_v24 = vor.u32 %v5032_v14, %v3764_v15 }
  0x46   :  { %v3938_v25 = vld [vmem:[#allocation5 + $0x300] sm:$0xf]  ;;  %v5078_v26 = vld [vmem:[#allocation5 + $0x30c] sm:$0xf0]  ;;  %v3811_v40 = vor.u32 %v5046_v22, %v3810_v21  ;;  %1393 = vmatpush.bf16.msra.mxu0 %v3555_v35  ;;  %v4996_v22 = vld [vmem:[#allocation5 + $0x84] sm:$0xf] }
  0x47   :  { %v4178_v27 = vld [vmem:[#allocation5 + $0x4e0] sm:$0xf]  ;;  %v5138_v29 = vld [vmem:[#allocation5 + $0x4ec] sm:$0xf0]  ;;  %v3939_v44 = vor.u32 %v5078_v26, %v3938_v25  ;;  %1407 = vmatpush.bf16.msra.mxu1 %v3683_v39  ;;  %v5028_v26 = vld [vmem:[#allocation5 + $0x184] sm:$0xf] }
  0x48   :  { %v4306_v30 = vld [vmem:[#allocation5 + $0x5e0] sm:$0xf]  ;;  %v5170_v31 = vld [vmem:[#allocation5 + $0x5ec] sm:$0xf0]  ;;  %v4179_v45 = vor.u32 %v5138_v29, %v4178_v27  ;;  %1421 = vmatpush.bf16.msra.mxu2 %v3811_v40  ;;  %v3748_v27 = vld [vmem:[#allocation5 + $0x190] sm:$0xf0]  ;;  %v3623_v29 = vor.u32 %v4996_v22, %v3620_v23 }
  0x49   :  { %v172_v34 = vld [vmem:[#allocation2 + $0x10] sm:$0xff]  ;;  %v5174_v38 = vld [vmem:[#allocation5 + $0x60c] sm:$0xf0]  ;;  %v4307_v49 = vor.u32 %v5170_v31, %v4306_v30  ;;  %1435 = vmatpush.bf16.msra.mxu3 %v3939_v44  ;;  %v3604_v35 = vld [vmem:[#allocation5 + $0x70] sm:$0xf0] }
  0x4a   :  { %v4322_v37 = vld [vmem:[#allocation5 + $0x600] sm:$0xf]  ;;  %v170_v42 = vld [vmem:[#allocation2] sm:$0xff]  ;;  %v5728_v54 = vpack.c.bf16 %v179_v36, %v172_v34  ;;  %1442 = vmatpush.bf16.msrb.mxu0 %v4179_v45  ;;  %v4992_v34 = vld [vmem:[#allocation5 + $0x64] sm:$0xf] }
  0x4b   :  { %v180_v48 = vld [vmem:[#allocation2 + $0x50] sm:$0xff]  ;;  %v5134_v52 = vld [vmem:[#allocation5 + $0x4cc] sm:$0xf0]  ;;  %v5730_v55 = vpack.c.bf16 %v177_v43, %v170_v42  ;;  %v4323_v59 = vor.u32 %v5174_v38, %v4322_v37  ;;  %1456 = vmatpush.bf16.msrb.mxu1 %v4307_v49  ;;  %v183_v37 = vld [vmem:[#allocation2 + $0x68] sm:$0xff]  ;;  %v3751_v38 = vor.u32 %v5028_v26, %v3748_v27  ;;  %v3607_v43 = vor.u32 %v4992_v34, %v3604_v35 }
  0x4c   :  { %v4162_v51 = vld [vmem:[#allocation5 + $0x4c0] sm:$0xf]  ;;  %v5166_v56 = vld [vmem:[#allocation5 + $0x5cc] sm:$0xf0]  ;;  %v5732_v60 = vpack.c.bf16 %v180_v48, %v173_v47  ;;  %1422 = vmatmul.bf16.vlgmr.msra.gmra.mxu2 %v5728_v54  ;;  %v5024_v40 = vld [vmem:[#allocation5 + $0x164] sm:$0xf] }
  0x4d   :  { %v4290_v53 = vld [vmem:[#allocation5 + $0x5c0] sm:$0xf]  ;;  %v178_v62 = vld [vmem:[#allocation2 + $0x40] sm:$0xff]  ;;  %v4163_v0 = vor.u32 %v5134_v52, %v4162_v51  ;;  %1484 = vmatpush.bf16.msrb.mxu3 %v3671_v50  ;;  %1394 = vmatmul.bf16.vlgmr.msra.gmra.mxu0 %v5730_v55  ;;  %v4988_v48 = vld [vmem:[#allocation5 + $0x44] sm:$0xf]  ;;  %v3735_v51 = vor.u32 %v5024_v40, %v3732_v41 }
  0x4e   :  { %v4291_v3 = vor.u32 %v5166_v56, %v4290_v53  ;;  %v4146_v5 = vld [vmem:[#allocation5 + $0x4a0] sm:$0xf]  ;;  %v5130_v6 = vld [vmem:[#allocation5 + $0x4ac] sm:$0xf0]  ;;  %v5736_v8 = vpack.c.bf16 %v178_v62, %v171_v61  ;;  %1477 = vmatpush.bf16.msrb.mxu2 %v4323_v59  ;;  %1436 = vmatmul.bf16.vlgmr.msra.gmra.mxu3 %v5732_v60  ;;  %v3588_v49 = vld [vmem:[#allocation5 + $0x50] sm:$0xf0] }
  0x4f   :  { %v4274_v7 = vld [vmem:[#allocation5 + $0x5a0] sm:$0xf]  ;;  %v5162_v9 = vld [vmem:[#allocation5 + $0x5ac] sm:$0xf0]  ;;  %1443 = vmatpush.bf16.msrb.mxu0 %v4163_v0  ;;  %v4147_v13 = vor.u32 %v5130_v6, %v4146_v5  ;;  %v5020_v53 = vld [vmem:[#allocation5 + $0x144] sm:$0xf]  ;;  %v3591_v58 = vor.u32 %v4988_v48, %v3588_v49 }
  0x50   :  { %1457 = vmatpush.bf16.msrb.mxu1 %v4291_v3  ;;  %v4275_v16 = vor.u32 %v5162_v9, %v4274_v7  ;;  %v4130_v18 = vld [vmem:[#allocation5 + $0x480] sm:$0xf]  ;;  %v5126_v19 = vld [vmem:[#allocation5 + $0x48c] sm:$0xf0]  ;;  %v3716_v56 = vld [vmem:[#allocation5 + $0x150] sm:$0xf0] }
  0x51   :  { %1485 = vmatpush.bf16.msrb.mxu3 %v3655_v4  ;;  %v4258_v20 = vld [vmem:[#allocation5 + $0x580] sm:$0xf]  ;;  %1408 = vmatmul.bf16.vlgmr.msra.gmra.mxu1 %v5736_v8  ;;  %v5158_v21 = vld [vmem:[#allocation5 + $0x58c] sm:$0xf0]  ;;  %v4131_v25 = vor.u32 %v5126_v19, %v4130_v18  ;;  %v4984_v0 = vld [vmem:[#allocation5 + $0x24] sm:$0xf]  ;;  %v3719_v4 = vor.u32 %v5020_v53, %v3716_v56 }
  0x52   :  { %1498 = vmatpush.bf16.msra.mxu2 %v3799_v63  ;;  %v4259_v28 = vor.u32 %v5158_v21, %v4258_v20  ;;  %v4114_v30 = vld [vmem:[#allocation5 + $0x460] sm:$0xf]  ;;  %v5122_v31 = vld [vmem:[#allocation5 + $0x46c] sm:$0xf0]  ;;  %v3572_v1 = vld [vmem:[#allocation5 + $0x30] sm:$0xf0] }
  0x53   :  { %1444 = vmatpush.bf16.msrb.mxu0 %v4147_v13  ;;  %v4242_v32 = vld [vmem:[#allocation5 + $0x560] sm:$0xf]  ;;  %v5154_v33 = vld [vmem:[#allocation5 + $0x56c] sm:$0xf0]  ;;  %v4115_v39 = vor.u32 %v5122_v31, %v4114_v30  ;;  %v5016_v2 = vld [vmem:[#allocation5 + $0x124] sm:$0xf]  ;;  %v3575_v11 = vor.u32 %v4984_v0, %v3572_v1 }
  0x54   :  { %1458 = vmatpush.bf16.msrb.mxu1 %v4275_v16  ;;  %v176_v36 = vld [vmem:[#allocation2 + $0x30] sm:$0xff]  ;;  %v4243_v42 = vor.u32 %v5154_v33, %v4242_v32  ;;  %v5118_v45 = vld [vmem:[#allocation5 + $0x44c] sm:$0xf0]  ;;  %v3700_v3 = vld [vmem:[#allocation5 + $0x130] sm:$0xf0] }
  0x55   :  { %1486 = vmatpush.bf16.msrb.mxu3 %v3639_v17  ;;  %v4098_v44 = vld [vmem:[#allocation5 + $0x440] sm:$0xf]  ;;  %v5150_v47 = vld [vmem:[#allocation5 + $0x54c] sm:$0xf0]  ;;  %v5740_v50 = vpack.c.bf16 %v183_v37, %v176_v36  ;;  %v4980_v13 = vld [vmem:[#allocation5 + $0x4] sm:$0xf]  ;;  %v3703_v21 = vor.u32 %v5016_v2, %v3700_v3 }
  0x56   :  { %1499 = vmatpush.bf16.msra.mxu2 %v3783_v12  ;;  %v4226_v46 = vld [vmem:[#allocation5 + $0x540] sm:$0xf]  ;;  %v4099_v52 = vor.u32 %v5118_v45, %v4098_v44  ;;  %v5114_v61 = vld [vmem:[#allocation5 + $0x42c] sm:$0xf0]  ;;  %v3556_v14 = vld [vmem:[#allocation5 + $0x10] sm:$0xf0] }
  0x57   :  { %1445 = vmatpush.bf16.msrb.mxu0 %v4131_v25  ;;  %v4227_v57 = vor.u32 %v5150_v47, %v4226_v46  ;;  %v4082_v59 = vld [vmem:[#allocation5 + $0x420] sm:$0xf]  ;;  %v5146_v63 = vld [vmem:[#allocation5 + $0x52c] sm:$0xf0]  ;;  %v5072_v15 = vld [vmem:[#allocation5 + $0x2e4] sm:$0xf]  ;;  %v3559_v27 = vor.u32 %v4980_v13, %v3556_v14 }
  0x58   :  { %1459 = vmatpush.bf16.msrb.mxu1 %v4259_v28  ;;  %v4210_v62 = vld [vmem:[#allocation5 + $0x520] sm:$0xf]  ;;  %v4083_v5 = vor.u32 %v5114_v61, %v4082_v59  ;;  %v5110_v7 = vld [vmem:[#allocation5 + $0x40c] sm:$0xf0]  ;;  %v3924_v16 = vld [vmem:[#allocation5 + $0x2f0] sm:$0xf0] }
  0x59   :  { %1487 = vmatpush.bf16.msrb.mxu3 %v3623_v29  ;;  %v4066_v6 = vld [vmem:[#allocation5 + $0x400] sm:$0xf]  ;;  %v4211_v10 = vor.u32 %v5146_v63, %v4210_v62  ;;  %v5142_v12 = vld [vmem:[#allocation5 + $0x50c] sm:$0xf0]  ;;  %v5104_v17 = vld [vmem:[#allocation5 + $0x3e4] sm:$0xf]  ;;  %v3927_v31 = vor.u32 %v5072_v15, %v3924_v16 }
  0x5a   :  { %1500 = vmatpush.bf16.msra.mxu2 %v3767_v24  ;;  %v4194_v9 = vld [vmem:[#allocation5 + $0x500] sm:$0xf]  ;;  %v4052_v18 = vld [vmem:[#allocation5 + $0x3f0] sm:$0xf0]  ;;  %v5136_v19 = vld [vmem:[#allocation5 + $0x4e4] sm:$0xf]  ;;  %v4067_v22 = vor.u32 %v5110_v7, %v4066_v6 }
  0x5b   :  { %1446 = vmatpush.bf16.msrb.mxu0 %v4115_v39  ;;  %v4180_v20 = vld [vmem:[#allocation5 + $0x4f0] sm:$0xf0]  ;;  %v181_v24 = vld [vmem:[#allocation2 + $0x58] sm:$0xff]  ;;  %v5012_v25 = vld [vmem:[#allocation5 + $0x104] sm:$0xf]  ;;  %v4195_v26 = vor.u32 %v5142_v12, %v4194_v9  ;;  %v4055_v32 = vor.u32 %v5104_v17, %v4052_v18 }
  0x5c   :  { %1460 = vmatpush.bf16.msrb.mxu1 %v4243_v42  ;;  %4336 = vmatmul.msk.bf16.vlgmr.msrb.gmra.mxu2 %vm1382_vm0, %v5740_v50  ;;  %v174_v23 = vld [vmem:[#allocation2 + $0x20] sm:$0xff]  ;;  %v175_v29 = vld [vmem:[#allocation2 + $0x28] sm:$0xff]  ;;  %v5168_v33 = vld [vmem:[#allocation5 + $0x5e4] sm:$0xf]  ;;  %v4183_v36 = vor.u32 %v5136_v19, %v4180_v20 }
  0x5d   :  { %1488 = vmatpush.bf16.msrb.mxu3 %v3607_v43  ;;  %v3684_v28 = vld [vmem:[#allocation5 + $0x110] sm:$0xf0]  ;;  %v5068_v35 = vld [vmem:[#allocation5 + $0x2c4] sm:$0xf]  ;;  %v5744_v37 = vpack.c.bf16 %v181_v24, %v174_v23 }
  0x5e   :  { %1501 = vmatpush.bf16.msra.mxu2 %v3751_v38  ;;  %v182_v30 = vld [vmem:[#allocation2 + $0x60] sm:$0xff]  ;;  %v5100_v39 = vld [vmem:[#allocation5 + $0x3c4] sm:$0xf]  ;;  %v3687_v41 = vor.u32 %v5012_v25, %v3684_v28 }
  0x5f   :  { %1447 = vmatpush.bf16.msrb.mxu0 %v4099_v52  ;;  %v4308_v34 = vld [vmem:[#allocation5 + $0x5f0] sm:$0xf0]  ;;  %v5746_v42 = vpack.c.bf16 %v182_v30, %v175_v29  ;;  %v5132_v43 = vld [vmem:[#allocation5 + $0x4c4] sm:$0xf] }
  0x60   :  { %1461 = vmatpush.bf16.msrb.mxu1 %v4227_v57  ;;  %v3908_v38 = vld [vmem:[#allocation5 + $0x2d0] sm:$0xf0]  ;;  %v4311_v45 = vor.u32 %v5168_v33, %v4308_v34  ;;  %v5164_v48 = vld [vmem:[#allocation5 + $0x5c4] sm:$0xf] }
  0x61   :  { %1489 = vmatpush.bf16.msrb.mxu3 %v3591_v58  ;;  %v4036_v40 = vld [vmem:[#allocation5 + $0x3d0] sm:$0xf0]  ;;  %v3911_v46 = vor.u32 %v5068_v35, %v3908_v38  ;;  %v5096_v56 = vld [vmem:[#allocation5 + $0x3a4] sm:$0xf] }
  0x62   :  { %1502 = vmatpush.bf16.msra.mxu2 %v3735_v51  ;;  %v4164_v44 = vld [vmem:[#allocation5 + $0x4d0] sm:$0xf0]  ;;  %v4039_v47 = vor.u32 %v5100_v39, %v4036_v40  ;;  %v5064_v51 = vld [vmem:[#allocation5 + $0x2a4] sm:$0xf] }
  0x63   :  { %1448 = vmatpush.bf16.msrb.mxu0 %v4083_v5  ;;  %v4292_v49 = vld [vmem:[#allocation5 + $0x5d0] sm:$0xf0]  ;;  %v4167_v52 = vor.u32 %v5132_v43, %v4164_v44  ;;  %v5128_v58 = vld [vmem:[#allocation5 + $0x4a4] sm:$0xf] }
  0x64   :  { %1462 = vmatpush.bf16.msrb.mxu1 %v4211_v10  ;;  %v3892_v53 = vld [vmem:[#allocation5 + $0x2b0] sm:$0xf0]  ;;  %v4295_v61 = vor.u32 %v5164_v48, %v4292_v49  ;;  %v5160_v0 = vld [vmem:[#allocation5 + $0x5a4] sm:$0xf] }
  0x65   :  { %1490 = vmatpush.bf16.msrb.mxu3 %v3575_v11  ;;  %v4020_v57 = vld [vmem:[#allocation5 + $0x3b0] sm:$0xf0]  ;;  %v3895_v62 = vor.u32 %v5064_v51, %v3892_v53  ;;  %v5060_v2 = vld [vmem:[#allocation5 + $0x284] sm:$0xf] }
  0x66   :  { %1503 = vmatpush.bf16.msra.mxu2 %v3719_v4  ;;  %v4148_v59 = vld [vmem:[#allocation5 + $0x4b0] sm:$0xf0]  ;;  %v4023_v63 = vor.u32 %v5096_v56, %v4020_v57  ;;  %v5092_v5 = vld [vmem:[#allocation5 + $0x384] sm:$0xf] }
  0x67   :  { %1449 = vmatpush.bf16.msrb.mxu0 %v4067_v22  ;;  %v4276_v1 = vld [vmem:[#allocation5 + $0x5b0] sm:$0xf0]  ;;  %v4151_v3 = vor.u32 %v5128_v58, %v4148_v59  ;;  %v5124_v7 = vld [vmem:[#allocation5 + $0x484] sm:$0xf] }
  0x68   :  { %1463 = vmatpush.bf16.msrb.mxu1 %v4195_v26  ;;  %v3876_v4 = vld [vmem:[#allocation5 + $0x290] sm:$0xf0]  ;;  %v4279_v10 = vor.u32 %v5160_v0, %v4276_v1  ;;  %v5156_v13 = vld [vmem:[#allocation5 + $0x584] sm:$0xf]  ;;  %v3674_v0 = vld [vmem:[#allocation5 + $0xe8] sm:$0xf] }
  0x69   :  { %1491 = vmatpush.bf16.msrb.mxu3 %v3559_v27  ;;  %v4004_v6 = vld [vmem:[#allocation5 + $0x390] sm:$0xf0]  ;;  %v3879_v11 = vor.u32 %v5060_v2, %v3876_v4  ;;  %v5056_v15 = vld [vmem:[#allocation5 + $0x264] sm:$0xf]  ;;  %v5011_v1 = vld [vmem:[#allocation5 + $0xf4] sm:$0xf0] }
  0x6a   :  { %1504 = vmatpush.bf16.msra.mxu2 %v3703_v21  ;;  %1450 = vmatmul.bf16.vlgmr.msrb.gmra.mxu0 %v5744_v37  ;;  %v4132_v9 = vld [vmem:[#allocation5 + $0x490] sm:$0xf0]  ;;  %v4007_v12 = vor.u32 %v5092_v5, %v4004_v6  ;;  %v5088_v18 = vld [vmem:[#allocation5 + $0x364] sm:$0xf]  ;;  %v3930_v5 = vld [vmem:[#allocation5 + $0x2e8] sm:$0xf] }
  0x6b   :  { %1512 = vmatpush.bf16.msra.mxu0 %v3927_v31  ;;  %1464 = vmatmul.bf16.vlgmr.msrb.gmra.mxu1 %v5746_v42  ;;  %v4260_v14 = vld [vmem:[#allocation5 + $0x590] sm:$0xf0]  ;;  %v4135_v16 = vor.u32 %v5124_v7, %v4132_v9  ;;  %v5120_v20 = vld [vmem:[#allocation5 + $0x464] sm:$0xf]  ;;  %v5075_v6 = vld [vmem:[#allocation5 + $0x2f4] sm:$0xf0] }
  0x6c   :  { %1526 = vmatpush.bf16.msra.mxu1 %v4055_v32  ;;  %1492 = vmatmul.bf16.vlgmr.msrb.gmra.mxu3 %v5730_v55  ;;  %v3860_v17 = vld [vmem:[#allocation5 + $0x270] sm:$0xf0]  ;;  %v4263_v22 = vor.u32 %v5156_v13, %v4260_v14  ;;  %v5152_v25 = vld [vmem:[#allocation5 + $0x564] sm:$0xf]  ;;  %v3675_v13 = vor.u32 %v5011_v1, %v3674_v0  ;;  %v4058_v14 = vld [vmem:[#allocation5 + $0x3e8] sm:$0xf] }
  0x6d   :  { %1540 = vmatpush.bf16.msra.mxu3 %v4183_v36  ;;  %v3988_v19 = vld [vmem:[#allocation5 + $0x370] sm:$0xf0]  ;;  %v3863_v23 = vor.u32 %v5056_v15, %v3860_v17  ;;  %v5052_v27 = vld [vmem:[#allocation5 + $0x244] sm:$0xf]  ;;  %v5107_v15 = vld [vmem:[#allocation5 + $0x3f4] sm:$0xf0] }
  0x6e   :  { %1505 = vmatpush.bf16.msra.mxu2 %v3687_v41  ;;  %v4116_v21 = vld [vmem:[#allocation5 + $0x470] sm:$0xf0]  ;;  %v3991_v24 = vor.u32 %v5088_v18, %v3988_v19  ;;  %v5084_v30 = vld [vmem:[#allocation5 + $0x344] sm:$0xf]  ;;  %v3802_v17 = vld [vmem:[#allocation5 + $0x1e8] sm:$0xf]  ;;  %v3931_v19 = vor.u32 %v5075_v6, %v3930_v5 }
  0x6f   :  { %1513 = vmatpush.bf16.msra.mxu0 %v3911_v46  ;;  %v4244_v26 = vld [vmem:[#allocation5 + $0x570] sm:$0xf0]  ;;  %v4119_v28 = vor.u32 %v5120_v20, %v4116_v21  ;;  %v5116_v32 = vld [vmem:[#allocation5 + $0x444] sm:$0xf]  ;;  %v5043_v18 = vld [vmem:[#allocation5 + $0x1f4] sm:$0xf0] }
  0x70   :  { %1527 = vmatpush.bf16.msra.mxu1 %v4039_v47  ;;  %v3844_v29 = vld [vmem:[#allocation5 + $0x250] sm:$0xf0]  ;;  %v4247_v34 = vor.u32 %v5152_v25, %v4244_v26  ;;  %v5148_v38 = vld [vmem:[#allocation5 + $0x544] sm:$0xf]  ;;  %v3658_v21 = vld [vmem:[#allocation5 + $0xc8] sm:$0xf]  ;;  %v3803_v26 = vor.u32 %v5043_v18, %v3802_v17 }
  0x71   :  { %1541 = vmatpush.bf16.msra.mxu3 %v4167_v52  ;;  %1506 = vmatmul.bf16.vlgmr.msra.gmra.mxu2 %v5736_v8  ;;  %v3972_v31 = vld [vmem:[#allocation5 + $0x350] sm:$0xf0]  ;;  %v3847_v35 = vor.u32 %v5052_v27, %v3844_v29  ;;  %v5048_v40 = vld [vmem:[#allocation5 + $0x224] sm:$0xf]  ;;  %v5071_v25 = vld [vmem:[#allocation5 + $0x2d4] sm:$0xf0] }
  0x72   :  { %1554 = vmatpush.bf16.msrb.mxu2 %v4311_v45  ;;  %v4100_v33 = vld [vmem:[#allocation5 + $0x450] sm:$0xf0]  ;;  %v3975_v36 = vor.u32 %v5084_v30, %v3972_v31  ;;  %v5080_v44 = vld [vmem:[#allocation5 + $0x324] sm:$0xf]  ;;  %v4042_v27 = vld [vmem:[#allocation5 + $0x3c8] sm:$0xf] }
  0x73   :  { %1514 = vmatpush.bf16.msra.mxu0 %v3895_v62  ;;  %v4228_v39 = vld [vmem:[#allocation5 + $0x550] sm:$0xf0]  ;;  %v4103_v41 = vor.u32 %v5116_v32, %v4100_v33  ;;  %v5112_v46 = vld [vmem:[#allocation5 + $0x424] sm:$0xf]  ;;  %v3786_v30 = vld [vmem:[#allocation5 + $0x1c8] sm:$0xf] }
  0x74   :  { %1528 = vmatpush.bf16.msra.mxu1 %v4023_v63  ;;  %v3828_v43 = vld [vmem:[#allocation5 + $0x230] sm:$0xf0]  ;;  %v4231_v48 = vor.u32 %v5148_v38, %v4228_v39  ;;  %v5144_v49 = vld [vmem:[#allocation5 + $0x524] sm:$0xf]  ;;  %v5039_v31 = vld [vmem:[#allocation5 + $0x1d4] sm:$0xf0] }
  0x75   :  { %1542 = vmatpush.bf16.msra.mxu3 %v4151_v3  ;;  %v3956_v45 = vld [vmem:[#allocation5 + $0x330] sm:$0xf0]  ;;  %v3831_v52 = vor.u32 %v5048_v40, %v3828_v43  ;;  %v5044_v56 = vld [vmem:[#allocation5 + $0x204] sm:$0xf]  ;;  %v3642_v33 = vld [vmem:[#allocation5 + $0xa8] sm:$0xf]  ;;  %v3787_v39 = vor.u32 %v5039_v31, %v3786_v30 }
  0x76   :  { %1555 = vmatpush.bf16.msrb.mxu2 %v4295_v61  ;;  %v4084_v47 = vld [vmem:[#allocation5 + $0x430] sm:$0xf0]  ;;  %v3959_v53 = vor.u32 %v5080_v44, %v3956_v45  ;;  %v5076_v58 = vld [vmem:[#allocation5 + $0x304] sm:$0xf]  ;;  %v5067_v38 = vld [vmem:[#allocation5 + $0x2b4] sm:$0xf0] }
  0x77   :  { %1515 = vmatpush.bf16.msra.mxu0 %v3879_v11  ;;  %v4212_v51 = vld [vmem:[#allocation5 + $0x530] sm:$0xf0]  ;;  %v4087_v59 = vor.u32 %v5112_v46, %v4084_v47  ;;  %v5108_v62 = vld [vmem:[#allocation5 + $0x404] sm:$0xf]  ;;  %v4026_v40 = vld [vmem:[#allocation5 + $0x3a8] sm:$0xf] }
  0x78   :  { %1529 = vmatpush.bf16.msra.mxu1 %v4007_v12  ;;  %v3812_v57 = vld [vmem:[#allocation5 + $0x210] sm:$0xf0]  ;;  %v5172_v2 = vld [vmem:[#allocation5 + $0x604] sm:$0xf]  ;;  %v4215_v3 = vor.u32 %v5144_v49, %v4212_v51  ;;  %v3770_v44 = vld [vmem:[#allocation5 + $0x1a8] sm:$0xf] }
  0x79   :  { %1543 = vmatpush.bf16.msra.mxu3 %v4135_v16  ;;  %v3940_v61 = vld [vmem:[#allocation5 + $0x310] sm:$0xf0]  ;;  %v3815_v7 = vor.u32 %v5044_v56, %v3812_v57  ;;  %v5035_v45 = vld [vmem:[#allocation5 + $0x1b4] sm:$0xf0]  ;;  %v3626_v47 = vld [vmem:[#allocation5 + $0x88] sm:$0xf] }
  0x7a   :  { %1556 = vmatpush.bf16.msrb.mxu2 %v4279_v10  ;;  %v4068_v63 = vld [vmem:[#allocation5 + $0x410] sm:$0xf0]  ;;  %v3943_v9 = vor.u32 %v5076_v58, %v3940_v61  ;;  %v5140_v10 = vld [vmem:[#allocation5 + $0x504] sm:$0xf]  ;;  %v3882_v51 = vld [vmem:[#allocation5 + $0x288] sm:$0xf] }
  0x7b   :  { %1516 = vmatpush.bf16.msra.mxu0 %v3863_v23  ;;  %v4324_v4 = vld [vmem:[#allocation5 + $0x610] sm:$0xf0]  ;;  %v4071_v12 = vor.u32 %v5108_v62, %v4068_v63  ;;  %v4059_v23 = vor.u32 %v5107_v15, %v4058_v14  ;;  %v4010_v56 = vld [vmem:[#allocation5 + $0x388] sm:$0xf]  ;;  %v5095_v57 = vld [vmem:[#allocation5 + $0x394] sm:$0xf0] }
  0x7c   :  { %1530 = vmatpush.bf16.msra.mxu1 %v3991_v24  ;;  %v4196_v11 = vld [vmem:[#allocation5 + $0x510] sm:$0xf0]  ;;  %v4327_v16 = vor.u32 %v5172_v2, %v4324_v4  ;;  %v3914_v24 = vld [vmem:[#allocation5 + $0x2c8] sm:$0xf]  ;;  %v5031_v61 = vld [vmem:[#allocation5 + $0x194] sm:$0xf0]  ;;  %v4011_v1 = vor.u32 %v5095_v57, %v4010_v56 }
  0x7d   :  { %1544 = vmatpush.bf16.msra.mxu3 %v4119_v28  ;;  %v4199_v20 = vor.u32 %v5140_v10, %v4196_v11  ;;  %v5103_v28 = vld [vmem:[#allocation5 + $0x3d4] sm:$0xf0]  ;;  %v3915_v32 = vor.u32 %v5071_v25, %v3914_v24  ;;  %v3610_v63 = vld [vmem:[#allocation5 + $0x68] sm:$0xf]  ;;  %v5009_v56 = vld [vmem:[#allocation5 + $0xec] sm:$0xf] }
  0x7e   :  { %1557 = vmatpush.bf16.msrb.mxu2 %v4263_v22  ;;  %v5007_v22 = vld [vmem:[#allocation5 + $0xd4] sm:$0xf0]  ;;  %v3866_v2 = vld [vmem:[#allocation5 + $0x268] sm:$0xf]  ;;  %v3676_v57 = vld [vmem:[#allocation5 + $0xf8] sm:$0xf0] }
  0x7f   :  { %1517 = vmatpush.bf16.msra.mxu0 %v3847_v35  ;;  %v3659_v29 = vor.u32 %v5007_v22, %v3658_v21  ;;  %v4043_v35 = vor.u32 %v5103_v28, %v4042_v27  ;;  %v4995_v0 = vld [vmem:[#allocation5 + $0x74] sm:$0xf0]  ;;  %v3994_v5 = vld [vmem:[#allocation5 + $0x368] sm:$0xf] }
  0x80   :  { %1531 = vmatpush.bf16.msra.mxu1 %v3975_v36  ;;  %v3898_v36 = vld [vmem:[#allocation5 + $0x2a8] sm:$0xf]  ;;  %v5091_v6 = vld [vmem:[#allocation5 + $0x374] sm:$0xf0] }
  0x81   :  { %1545 = vmatpush.bf16.msra.mxu3 %v4103_v41  ;;  %v5099_v41 = vld [vmem:[#allocation5 + $0x3b4] sm:$0xf0]  ;;  %v3899_v46 = vor.u32 %v5067_v38, %v3898_v36  ;;  %v3995_v14 = vor.u32 %v5091_v6, %v3994_v5  ;;  %v3850_v15 = vld [vmem:[#allocation5 + $0x248] sm:$0xf]  ;;  %v3679_v6 = vor.u32 %v5009_v56, %v3676_v57 }
  0x82   :  { %1558 = vmatpush.bf16.msrb.mxu2 %v4247_v34  ;;  %v5003_v34 = vld [vmem:[#allocation5 + $0xb4] sm:$0xf0]  ;;  %v4027_v49 = vor.u32 %v5099_v41, %v4026_v40  ;;  %v3978_v18 = vld [vmem:[#allocation5 + $0x348] sm:$0xf] }
  0x83   :  { %1518 = vmatpush.bf16.msra.mxu0 %v3831_v52  ;;  %v3643_v43 = vor.u32 %v5003_v34, %v3642_v33  ;;  %v5063_v52 = vld [vmem:[#allocation5 + $0x294] sm:$0xf0]  ;;  %v3722_v21 = vld [vmem:[#allocation5 + $0x148] sm:$0xf] }
  0x84   :  { %1532 = vmatpush.bf16.msra.mxu1 %v3959_v53  ;;  %v3771_v53 = vor.u32 %v5035_v45, %v3770_v44  ;;  %v3883_v62 = vor.u32 %v5063_v52, %v3882_v51  ;;  %v5027_v10 = vld [vmem:[#allocation5 + $0x174] sm:$0xf0]  ;;  %v3578_v24 = vld [vmem:[#allocation5 + $0x28] sm:$0xf] }
  0x85   :  { %1546 = vmatpush.bf16.msra.mxu3 %v4087_v59  ;;  %v3754_v59 = vld [vmem:[#allocation5 + $0x188] sm:$0xf]  ;;  %v5023_v22 = vld [vmem:[#allocation5 + $0x154] sm:$0xf0] }
  0x86   :  { %1559 = vmatpush.bf16.msrb.mxu2 %v4231_v48  ;;  %v4999_v48 = vld [vmem:[#allocation5 + $0x94] sm:$0xf0]  ;;  %v3755_v4 = vor.u32 %v5031_v61, %v3754_v59  ;;  %v3834_v27 = vld [vmem:[#allocation5 + $0x228] sm:$0xf] }
  0x87   :  { %1519 = vmatpush.bf16.msra.mxu0 %v3815_v7  ;;  %v3627_v58 = vor.u32 %v4999_v48, %v3626_v47  ;;  %v3611_v7 = vor.u32 %v4995_v0, %v3610_v63  ;;  %v4987_v25 = vld [vmem:[#allocation5 + $0x34] sm:$0xf0]  ;;  %v3962_v30 = vld [vmem:[#allocation5 + $0x328] sm:$0xf] }
  0x88   :  { %1533 = vmatpush.bf16.msra.mxu1 %v3943_v9  ;;  %v3738_v9 = vld [vmem:[#allocation5 + $0x168] sm:$0xf]  ;;  %v5051_v28 = vld [vmem:[#allocation5 + $0x234] sm:$0xf0] }
  0x89   :  { %1547 = vmatpush.bf16.msra.mxu3 %v4071_v12  ;;  %v3594_v12 = vld [vmem:[#allocation5 + $0x48] sm:$0xf]  ;;  %v3739_v17 = vor.u32 %v5027_v10, %v3738_v9  ;;  %v5083_v31 = vld [vmem:[#allocation5 + $0x334] sm:$0xf0]  ;;  %v3835_v36 = vor.u32 %v5051_v28, %v3834_v27  ;;  %v5005_v9 = vld [vmem:[#allocation5 + $0xcc] sm:$0xf] }
  0x8a   :  { %1560 = vmatpush.bf16.msrb.mxu2 %v4215_v3  ;;  %1520 = vmatmul.bf16.vlgmr.msra.gmra.mxu0 %v5728_v54  ;;  %v5059_v3 = vld [vmem:[#allocation5 + $0x274] sm:$0xf0]  ;;  %v3706_v33 = vld [vmem:[#allocation5 + $0x128] sm:$0xf]  ;;  %v3963_v41 = vor.u32 %v5083_v31, %v3962_v30  ;;  %v3660_v10 = vld [vmem:[#allocation5 + $0xd8] sm:$0xf0] }
  0x8b   :  { %1610 = vmatpush.bf16.msrb.mxu0 %v3931_v19  ;;  %1534 = vmatmul.bf16.vlgmr.msra.gmra.mxu1 %v5732_v60  ;;  %v3867_v11 = vor.u32 %v5059_v3, %v3866_v2  ;;  %v5087_v19 = vld [vmem:[#allocation5 + $0x354] sm:$0xf0]  ;;  %v3818_v44 = vld [vmem:[#allocation5 + $0x208] sm:$0xf]  ;;  %v5041_v3 = vld [vmem:[#allocation5 + $0x1ec] sm:$0xf] }
  0x8c   :  { %1582 = vmatpush.bf16.msrb.mxu1 %v3675_v13  ;;  %1548 = vmatmul.bf16.vlgmr.msra.gmra.mxu3 %v5744_v37  ;;  %v4991_v13 = vld [vmem:[#allocation5 + $0x54] sm:$0xf0]  ;;  %v4314_v61 = vld [vmem:[#allocation5 + $0x5e8] sm:$0xf]  ;;  %v3772_v30 = vld [vmem:[#allocation5 + $0x1b8] sm:$0xf0] }
  0x8d   :  { %1575 = vmatpush.bf16.msrb.mxu3 %v4327_v16  ;;  %v5055_v16 = vld [vmem:[#allocation5 + $0x254] sm:$0xf0]  ;;  %v4170_v63 = vld [vmem:[#allocation5 + $0x4c8] sm:$0xf] }
  0x8e   :  { %1561 = vmatpush.bf16.msrb.mxu2 %v4199_v20  ;;  %v3595_v20 = vor.u32 %v4991_v13, %v3594_v12  ;;  %v5019_v34 = vld [vmem:[#allocation5 + $0x134] sm:$0xf0]  ;;  %v4298_v13 = vld [vmem:[#allocation5 + $0x5c8] sm:$0xf] }
  0x8f   :  { %1611 = vmatpush.bf16.msrb.mxu0 %v3915_v32  ;;  %v3579_v32 = vor.u32 %v4987_v25, %v3578_v24  ;;  %v4983_v38 = vld [vmem:[#allocation5 + $0x14] sm:$0xf0]  ;;  %v3707_v47 = vor.u32 %v5019_v34, %v3706_v33  ;;  %v4282_v25 = vld [vmem:[#allocation5 + $0x5a8] sm:$0xf]  ;;  %v4997_v33 = vld [vmem:[#allocation5 + $0x8c] sm:$0xf] }
  0x90   :  { %1583 = vmatpush.bf16.msrb.mxu1 %v3659_v29  ;;  %v3723_v29 = vor.u32 %v5023_v22, %v3722_v21  ;;  %v5139_v40 = vld [vmem:[#allocation5 + $0x4f4] sm:$0xf0]  ;;  %v5001_v21 = vld [vmem:[#allocation5 + $0xac] sm:$0xf]  ;;  %v3644_v22 = vld [vmem:[#allocation5 + $0xb8] sm:$0xf0] }
  0x91   :  { %1596 = vmatpush.bf16.msra.mxu3 %v3803_v26  ;;  %1562 = vmatmul.bf16.vlgmr.msrb.gmra.mxu2 %v5746_v42  ;;  %v3979_v26 = vor.u32 %v5087_v19, %v3978_v18  ;;  %v5047_v45 = vld [vmem:[#allocation5 + $0x214] sm:$0xf0]  ;;  %v3788_v18 = vld [vmem:[#allocation5 + $0x1d8] sm:$0xf0]  ;;  %v3663_v19 = vor.u32 %v5005_v9, %v3660_v10  ;;  %v4138_v27 = vld [vmem:[#allocation5 + $0x488] sm:$0xf]  ;;  %v3647_v31 = vor.u32 %v5001_v21, %v3644_v22 }
  0x92   :  { %1624 = vmatpush.bf16.msra.mxu2 %v4059_v23  ;;  %v3851_v23 = vor.u32 %v5055_v16, %v3850_v15  ;;  %v5079_v48 = vld [vmem:[#allocation5 + $0x314] sm:$0xf0]  ;;  %v3819_v59 = vor.u32 %v5047_v45, %v3818_v44  ;;  %v4154_v15 = vld [vmem:[#allocation5 + $0x4a8] sm:$0xf]  ;;  %v3628_v34 = vld [vmem:[#allocation5 + $0x98] sm:$0xf0] }
  0x93   :  { %1612 = vmatpush.bf16.msrb.mxu0 %v3899_v46  ;;  %v3946_v46 = vld [vmem:[#allocation5 + $0x308] sm:$0xf]  ;;  %v5175_v51 = vld [vmem:[#allocation5 + $0x614] sm:$0xf0]  ;;  %v3756_v44 = vld [vmem:[#allocation5 + $0x198] sm:$0xf0]  ;;  %v3631_v45 = vor.u32 %v4997_v33, %v3628_v34 }
  0x94   :  { %1584 = vmatpush.bf16.msrb.mxu1 %v3643_v43  ;;  %v3690_v43 = vld [vmem:[#allocation5 + $0x108] sm:$0xf]  ;;  %v3947_v0 = vor.u32 %v5079_v48, %v3946_v46  ;;  %v5131_v16 = vld [vmem:[#allocation5 + $0x4b4] sm:$0xf0]  ;;  %v3612_v48 = vld [vmem:[#allocation5 + $0x78] sm:$0xf0] }
  0x95   :  { %1597 = vmatpush.bf16.msra.mxu3 %v3787_v39  ;;  %v4186_v39 = vld [vmem:[#allocation5 + $0x4e8] sm:$0xf]  ;;  %v5127_v28 = vld [vmem:[#allocation5 + $0x494] sm:$0xf0]  ;;  %v3724_v9 = vld [vmem:[#allocation5 + $0x158] sm:$0xf0] }
  0x96   :  { %1625 = vmatpush.bf16.msra.mxu2 %v4043_v35  ;;  %v3562_v35 = vld [vmem:[#allocation5 + $0x8] sm:$0xf]  ;;  %v5119_v57 = vld [vmem:[#allocation5 + $0x454] sm:$0xf0]  ;;  %v3708_v21 = vld [vmem:[#allocation5 + $0x138] sm:$0xf0] }
  0x97   :  { %1613 = vmatpush.bf16.msrb.mxu0 %v3883_v62  ;;  %v3563_v52 = vor.u32 %v4983_v38, %v3562_v35  ;;  %v5171_v62 = vld [vmem:[#allocation5 + $0x5f4] sm:$0xf0]  ;;  %v4139_v35 = vor.u32 %v5127_v28, %v4138_v27  ;;  %v4266_v38 = vld [vmem:[#allocation5 + $0x588] sm:$0xf]  ;;  %v4981_v27 = vld [vmem:[#allocation5 + $0xc] sm:$0xf] }
  0x98   :  { %1585 = vmatpush.bf16.msrb.mxu1 %v3627_v58  ;;  %v4187_v58 = vor.u32 %v5139_v40, %v4186_v39  ;;  %v5159_v39 = vld [vmem:[#allocation5 + $0x594] sm:$0xf0]  ;;  %v4122_v40 = vld [vmem:[#allocation5 + $0x468] sm:$0xf]  ;;  %v3564_v28 = vld [vmem:[#allocation5 + $0x18] sm:$0xf0] }
  0x99   :  { %1598 = vmatpush.bf16.msra.mxu3 %v3771_v53  ;;  %v5015_v53 = vld [vmem:[#allocation5 + $0x114] sm:$0xf0]  ;;  %v4267_v46 = vor.u32 %v5159_v39, %v4266_v38  ;;  %v4106_v56 = vld [vmem:[#allocation5 + $0x448] sm:$0xf]  ;;  %v4060_v33 = vld [vmem:[#allocation5 + $0x3f8] sm:$0xf0]  ;;  %v3567_v39 = vor.u32 %v4981_v27, %v3564_v28 }
  0x9a   :  { %1626 = vmatpush.bf16.msra.mxu2 %v4027_v49  ;;  %v4330_v49 = vld [vmem:[#allocation5 + $0x608] sm:$0xf]  ;;  %v3691_v5 = vor.u32 %v5015_v53, %v3690_v43  ;;  %v5029_v43 = vld [vmem:[#allocation5 + $0x18c] sm:$0xf]  ;;  %v5155_v53 = vld [vmem:[#allocation5 + $0x574] sm:$0xf0] }
  0x9b   :  { %1614 = vmatpush.bf16.msrb.mxu0 %v3867_v11  ;;  %v4331_v2 = vor.u32 %v5175_v51, %v4330_v49  ;;  %v3759_v51 = vor.u32 %v5029_v43, %v3756_v44  ;;  %v5069_v38 = vld [vmem:[#allocation5 + $0x2cc] sm:$0xf]  ;;  %v3692_v43 = vld [vmem:[#allocation5 + $0x118] sm:$0xf0] }
  0x9c   :  { %1586 = vmatpush.bf16.msrb.mxu1 %v3611_v7  ;;  %4337 = vmatmul.msk.bf16.vlgmr.msrb.gmra.mxu3 %vm1382_vm0, %v5740_v50  ;;  %v4315_v7 = vor.u32 %v5171_v62, %v4314_v61  ;;  %v4268_v27 = vld [vmem:[#allocation5 + $0x598] sm:$0xf0] }
  0x9d   :  { %1599 = vmatpush.bf16.msra.mxu3 %v3755_v4  ;;  %v3804_v4 = vld [vmem:[#allocation5 + $0x1f8] sm:$0xf0] }
  0x9e   :  { %1627 = vmatpush.bf16.msra.mxu2 %v4011_v1  ;;  %v5135_v1 = vld [vmem:[#allocation5 + $0x4d4] sm:$0xf0]  ;;  %v3807_v12 = vor.u32 %v5041_v3, %v3804_v4  ;;  %v4234_v3 = vld [vmem:[#allocation5 + $0x548] sm:$0xf] }
  0x9f   :  { %1615 = vmatpush.bf16.msrb.mxu0 %v3851_v23  ;;  %v4171_v11 = vor.u32 %v5135_v1, %v4170_v63  ;;  %v4155_v23 = vor.u32 %v5131_v16, %v4154_v15  ;;  %v4989_v63 = vld [vmem:[#allocation5 + $0x4c] sm:$0xf]  ;;  %v4107_v1 = vor.u32 %v5119_v57, %v4106_v56  ;;  %v5151_v4 = vld [vmem:[#allocation5 + $0x554] sm:$0xf0]  ;;  %v4218_v16 = vld [vmem:[#allocation5 + $0x528] sm:$0xf] }
  0xa0   :  { %1587 = vmatpush.bf16.msrb.mxu1 %v3595_v20  ;;  %v5133_v56 = vld [vmem:[#allocation5 + $0x4cc] sm:$0xf]  ;;  %v4172_v57 = vld [vmem:[#allocation5 + $0x4d8] sm:$0xf0] }
  0xa1   :  { %1600 = vmatpush.bf16.msra.mxu3 %v3739_v17  ;;  %v5037_v17 = vld [vmem:[#allocation5 + $0x1cc] sm:$0xf] }
  0xa2   :  { %1628 = vmatpush.bf16.msra.mxu2 %v3995_v14  ;;  %v5167_v14 = vld [vmem:[#allocation5 + $0x5d4] sm:$0xf0]  ;;  %v3791_v24 = vor.u32 %v5037_v17, %v3788_v18  ;;  %v4074_v18 = vld [vmem:[#allocation5 + $0x408] sm:$0xf] }
  0xa3   :  { %1616 = vmatpush.bf16.msrb.mxu0 %v3835_v36  ;;  %v4299_v20 = vor.u32 %v5167_v14, %v4298_v13  ;;  %v3580_v13 = vld [vmem:[#allocation5 + $0x38] sm:$0xf0]  ;;  %v5147_v17 = vld [vmem:[#allocation5 + $0x534] sm:$0xf0] }
  0xa4   :  { %1588 = vmatpush.bf16.msrb.mxu1 %v3579_v32 }
  0xa5   :  { %1601 = vmatpush.bf16.msra.mxu3 %v3723_v29  ;;  %v5033_v29 = vld [vmem:[#allocation5 + $0x1ac] sm:$0xf] }
  0xa6   :  { %1629 = vmatpush.bf16.msra.mxu2 %v3979_v26  ;;  %v5163_v26 = vld [vmem:[#allocation5 + $0x5b4] sm:$0xf0]  ;;  %v3775_v36 = vor.u32 %v5033_v29, %v3772_v30 }
  0xa7   :  { %1617 = vmatpush.bf16.msrb.mxu0 %v3819_v59  ;;  %v4283_v32 = vor.u32 %v5163_v26, %v4282_v25  ;;  %v3740_v59 = vld [vmem:[#allocation5 + $0x178] sm:$0xf0]  ;;  %v4219_v25 = vor.u32 %v5147_v17, %v4218_v16  ;;  %v4202_v26 = vld [vmem:[#allocation5 + $0x508] sm:$0xf]  ;;  %v5093_v17 = vld [vmem:[#allocation5 + $0x38c] sm:$0xf] }
  0xa8   :  { %1589 = vmatpush.bf16.msrb.mxu1 %v3563_v52  ;;  %v4250_v52 = vld [vmem:[#allocation5 + $0x568] sm:$0xf] }
  0xa9   :  { %1602 = vmatpush.bf16.msra.mxu3 %v3707_v47  ;;  %v4993_v47 = vld [vmem:[#allocation5 + $0x6c] sm:$0xf]  ;;  %v4251_v62 = vor.u32 %v5155_v53, %v4250_v52  ;;  %v4044_v53 = vld [vmem:[#allocation5 + $0x3d8] sm:$0xf0] }
  0xaa   :  { %1630 = vmatpush.bf16.msra.mxu2 %v3963_v41  ;;  %1618 = vmatmul.bf16.vlgmr.msrb.gmra.mxu0 %v5728_v54  ;;  %v5123_v41 = vld [vmem:[#allocation5 + $0x474] sm:$0xf0]  ;;  %v3615_v61 = vor.u32 %v4993_v47, %v3612_v48 }
  0xab   :  { %1673 = vmatpush.bf16.msra.mxu0 %v4331_v2  ;;  %1590 = vmatmul.bf16.vlgmr.msrb.gmra.mxu1 %v5730_v55  ;;  %v4123_v49 = vor.u32 %v5123_v41, %v4122_v40  ;;  %v3916_v40 = vld [vmem:[#allocation5 + $0x2d8] sm:$0xf0]  ;;  %v5013_v41 = vld [vmem:[#allocation5 + $0x10c] sm:$0xf] }
  0xac   :  { %1638 = vmatpush.bf16.msra.mxu1 %v4187_v58  ;;  %v5025_v58 = vld [vmem:[#allocation5 + $0x16c] sm:$0xf]  ;;  %v3695_v52 = vor.u32 %v5013_v41, %v3692_v43  ;;  %v4252_v41 = vld [vmem:[#allocation5 + $0x578] sm:$0xf0] }
  0xad   :  { %1603 = vmatpush.bf16.msra.mxu3 %v3691_v5  ;;  %v3743_v2 = vor.u32 %v5025_v58, %v3740_v59  ;;  %v4090_v5 = vld [vmem:[#allocation5 + $0x428] sm:$0xf]  ;;  %v5065_v59 = vld [vmem:[#allocation5 + $0x2ac] sm:$0xf] }
  0xae   :  { %1631 = vmatpush.bf16.msra.mxu2 %v3947_v0  ;;  %v3596_v0 = vld [vmem:[#allocation5 + $0x58] sm:$0xf0] }
  0xaf   :  { %1694 = vmatpush.bf16.msrb.mxu0 %v3807_v12  ;;  %v3599_v10 = vor.u32 %v4989_v63, %v3596_v0  ;;  %v4985_v12 = vld [vmem:[#allocation5 + $0x2c] sm:$0xf]  ;;  %v4300_v63 = vld [vmem:[#allocation5 + $0x5d8] sm:$0xf0] }
  0xb0   :  { %1639 = vmatpush.bf16.msra.mxu1 %v4171_v11  ;;  %1604 = vmatmul.bf16.vlgmr.msra.gmra.mxu3 %v5736_v8  ;;  %v4235_v11 = vor.u32 %v5151_v4, %v4234_v3  ;;  %v3583_v22 = vor.u32 %v4985_v12, %v3580_v13  ;;  %v5765_v3 = vld [vmem:[#allocation7] sm:$0xf]  ;;  %v5161_v13 = vld [vmem:[#allocation5 + $0x5ac] sm:$0xf] }
  0xb1   :  { %1652 = vmatpush.bf16.msrb.mxu3 %v4315_v7  ;;  %1632 = vmatmul.bf16.vlgmr.msra.gmra.mxu2 %v5732_v60  ;;  %v5021_v7 = vld [vmem:[#allocation5 + $0x14c] sm:$0xf]  ;;  %v394_v12 = vperm.slane %v5765_v3, 0 }
  0xb2   :  { %1680 = vmatpush.bf16.msrb.mxu2 %v3679_v6  ;;  %v5115_v6 = vld [vmem:[#allocation5 + $0x434] sm:$0xf0]  ;;  %v3727_v15 = vor.u32 %v5021_v7, %v3724_v9  ;;  %v4156_v7 = vld [vmem:[#allocation5 + $0x4b8] sm:$0xf0] }
  0xb3   :  { %1695 = vmatpush.bf16.msrb.mxu0 %v3791_v24  ;;  %v4091_v14 = vor.u32 %v5115_v6, %v4090_v5  ;;  %v3932_v24 = vld [vmem:[#allocation5 + $0x2f8] sm:$0xf0]  ;;  %v5129_v6 = vld [vmem:[#allocation5 + $0x4ac] sm:$0xf] }
  0xb4   :  { %1640 = vmatpush.bf16.msra.mxu1 %v4155_v23  ;;  %v5073_v23 = vld [vmem:[#allocation5 + $0x2ec] sm:$0xf]  ;;  %v4028_v5 = vld [vmem:[#allocation5 + $0x3b8] sm:$0xf0]  ;;  %v4159_v16 = vor.u32 %v5129_v6, %v4156_v7 }
  0xb5   :  { %1653 = vmatpush.bf16.msrb.mxu3 %v4299_v20  ;;  %v5017_v20 = vld [vmem:[#allocation5 + $0x12c] sm:$0xf]  ;;  %v3935_v34 = vor.u32 %v5073_v23, %v3932_v24  ;;  %v3964_v6 = vld [vmem:[#allocation5 + $0x338] sm:$0xf0] }
  0xb6   :  { %1681 = vmatpush.bf16.msrb.mxu2 %v3663_v19  ;;  %v5111_v19 = vld [vmem:[#allocation5 + $0x414] sm:$0xf0]  ;;  %v3711_v30 = vor.u32 %v5017_v20, %v3708_v21  ;;  %v5125_v20 = vld [vmem:[#allocation5 + $0x48c] sm:$0xf]  ;;  %v4140_v21 = vld [vmem:[#allocation5 + $0x498] sm:$0xf0] }
  0xb7   :  { %1696 = vmatpush.bf16.msrb.mxu0 %v3775_v36  ;;  %v4075_v29 = vor.u32 %v5111_v19, %v4074_v18  ;;  %v4188_v36 = vld [vmem:[#allocation5 + $0x4f8] sm:$0xf0]  ;;  %v5057_v24 = vld [vmem:[#allocation5 + $0x26c] sm:$0xf] }
  0xb8   :  { %1641 = vmatpush.bf16.msra.mxu1 %v4139_v35  ;;  %v5137_v35 = vld [vmem:[#allocation5 + $0x4ec] sm:$0xf]  ;;  %v4012_v19 = vld [vmem:[#allocation5 + $0x398] sm:$0xf0] }
  0xb9   :  { %1654 = vmatpush.bf16.msrb.mxu3 %v4283_v32  ;;  %v5105_v32 = vld [vmem:[#allocation5 + $0x3ec] sm:$0xf]  ;;  %v4191_v48 = vor.u32 %v5137_v35, %v4188_v36  ;;  %v4015_v28 = vor.u32 %v5093_v17, %v4012_v19 }
  0xba   :  { %1682 = vmatpush.bf16.msrb.mxu2 %v3647_v31  ;;  %4338 = vmatmul.msk.bf16.vlgmr.msra.gmra.mxu0 %vm1382_vm0, %v5740_v50  ;;  %v5143_v31 = vld [vmem:[#allocation5 + $0x514] sm:$0xf0]  ;;  %v4063_v47 = vor.u32 %v5105_v32, %v4060_v33  ;;  %v3996_v32 = vld [vmem:[#allocation5 + $0x378] sm:$0xf0]  ;;  %v5121_v33 = vld [vmem:[#allocation5 + $0x46c] sm:$0xf] }
  0xbb   :  { %1697 = vmatpush.bf16.msrb.mxu0 %v3759_v51  ;;  %v4203_v44 = vor.u32 %v5143_v31, %v4202_v26  ;;  %v3919_v51 = vor.u32 %v5069_v38, %v3916_v40  ;;  %v5157_v26 = vld [vmem:[#allocation5 + $0x58c] sm:$0xf]  ;;  %v3852_v38 = vld [vmem:[#allocation5 + $0x258] sm:$0xf0] }
  0xbc   :  { %1642 = vmatpush.bf16.msra.mxu1 %v4123_v49  ;;  %v5101_v49 = vld [vmem:[#allocation5 + $0x3cc] sm:$0xf]  ;;  %v4271_v35 = vor.u32 %v5157_v26, %v4268_v27 }
  0xbd   :  { %1655 = vmatpush.bf16.msrb.mxu3 %v4267_v46  ;;  %v4316_v46 = vld [vmem:[#allocation5 + $0x5f8] sm:$0xf0]  ;;  %v4047_v0 = vor.u32 %v5101_v49, %v4044_v53  ;;  %v5053_v36 = vld [vmem:[#allocation5 + $0x24c] sm:$0xf] }
  0xbe   :  { %1683 = vmatpush.bf16.msrb.mxu2 %v3631_v45  ;;  %v5169_v45 = vld [vmem:[#allocation5 + $0x5ec] sm:$0xf]  ;;  %v3855_v49 = vor.u32 %v5053_v36, %v3852_v38  ;;  %v4108_v53 = vld [vmem:[#allocation5 + $0x458] sm:$0xf0] }
  0xbf   :  { %1698 = vmatpush.bf16.msrb.mxu0 %v3743_v2  ;;  %v4319_v58 = vor.u32 %v5169_v45, %v4316_v46  ;;  %v5097_v2 = vld [vmem:[#allocation5 + $0x3ac] sm:$0xf] }
  0xc0   :  { %1643 = vmatpush.bf16.msra.mxu1 %v4107_v1  ;;  %v4175_v1 = vor.u32 %v5133_v56, %v4172_v57  ;;  %v5153_v40 = vld [vmem:[#allocation5 + $0x56c] sm:$0xf] }
  0xc1   :  { %1656 = vmatpush.bf16.msrb.mxu3 %v4251_v62  ;;  %v5165_v62 = vld [vmem:[#allocation5 + $0x5cc] sm:$0xf]  ;;  %v4255_v57 = vor.u32 %v5153_v40, %v4252_v41 }
  0xc2   :  { %1684 = vmatpush.bf16.msrb.mxu2 %v3615_v61  ;;  %v3900_v61 = vld [vmem:[#allocation5 + $0x2b8] sm:$0xf0]  ;;  %v4303_v9 = vor.u32 %v5165_v62, %v4300_v63  ;;  %v5085_v46 = vld [vmem:[#allocation5 + $0x34c] sm:$0xf] }
  0xc3   :  { %1699 = vmatpush.bf16.msrb.mxu0 %v3727_v15  ;;  %v3903_v4 = vor.u32 %v5065_v59, %v3900_v61  ;;  %v4031_v15 = vor.u32 %v5097_v2, %v4028_v5  ;;  %v3836_v59 = vld [vmem:[#allocation5 + $0x238] sm:$0xf0]  ;;  %v5149_v63 = vld [vmem:[#allocation5 + $0x54c] sm:$0xf] }
  0xc4   :  { %1644 = vmatpush.bf16.msra.mxu1 %v4091_v14  ;;  %v4284_v14 = vld [vmem:[#allocation5 + $0x5b8] sm:$0xf0]  ;;  %v5113_v7 = vld [vmem:[#allocation5 + $0x42c] sm:$0xf] }
  0xc5   :  { %1657 = vmatpush.bf16.msrb.mxu3 %v4235_v11  ;;  %v3884_v11 = vld [vmem:[#allocation5 + $0x298] sm:$0xf0]  ;;  %v4287_v23 = vor.u32 %v5161_v13, %v4284_v14  ;;  %v5045_v13 = vld [vmem:[#allocation5 + $0x20c] sm:$0xf] }
  0xc6   :  { %1685 = vmatpush.bf16.msrb.mxu2 %v3599_v10  ;;  %v5061_v10 = vld [vmem:[#allocation5 + $0x28c] sm:$0xf]  ;;  %v3820_v14 = vld [vmem:[#allocation5 + $0x218] sm:$0xf0] }
  0xc7   :  { %1700 = vmatpush.bf16.msrb.mxu0 %v3711_v30  ;;  %v3887_v18 = vor.u32 %v5061_v10, %v3884_v11  ;;  %v5089_v30 = vld [vmem:[#allocation5 + $0x36c] sm:$0xf] }
  0xc8   :  { %1645 = vmatpush.bf16.msra.mxu1 %v4075_v29  ;;  %v4143_v29 = vor.u32 %v5125_v20, %v4140_v21  ;;  %v5173_v17 = vld [vmem:[#allocation5 + $0x60c] sm:$0xf] }
  0xc9   :  { %1658 = vmatpush.bf16.msrb.mxu3 %v4219_v25  ;;  %v3868_v25 = vld [vmem:[#allocation5 + $0x278] sm:$0xf0]  ;;  %v5109_v27 = vld [vmem:[#allocation5 + $0x40c] sm:$0xf] }
  0xca   :  { %1686 = vmatpush.bf16.msrb.mxu2 %v3583_v22  ;;  %v1395_v22 = vpop.f32.mrf.mxu0  ;;  %v3871_v31 = vor.u32 %v5057_v24, %v3868_v25  ;;  %v3823_v24 = vor.u32 %v5045_v13, %v3820_v14  ;;  %v5077_v25 = vld [vmem:[#allocation5 + $0x30c] sm:$0xf] }
  0xcb   :  { %1646 = vmatmul.bf16.vlgmr.msra.gmra.mxu1 %v5744_v37  ;;  %1701 = vmatpush.bf16.msrb.mxu0 %v3695_v52  ;;  %v5117_v52 = vld [vmem:[#allocation5 + $0x44c] sm:$0xf] }
  0xcc   :  { %1708 = vmatpush.bf16.msrb.mxu1 %v3935_v34  ;;  %v4124_v34 = vld [vmem:[#allocation5 + $0x478] sm:$0xf0]  ;;  %v4111_v2 = vor.u32 %v5117_v52, %v4108_v53 }
  0xcd   :  { %1659 = vmatpush.bf16.msrb.mxu3 %v4203_v44  ;;  %v3999_v44 = vor.u32 %v5089_v30, %v3996_v32  ;;  %v4127_v45 = vor.u32 %v5121_v33, %v4124_v34  ;;  %v4204_v32 = vld [vmem:[#allocation5 + $0x518] sm:$0xf0] }
  0xce   :  { %1687 = vmatpush.bf16.msrb.mxu2 %v3567_v39  ;;  %1702 = vmatmul.bf16.vlgmr.msrb.gmra.mxu0 %v5736_v8  ;;  %v1409_v8 = vpop.f32.mrf.mxu1 }
  0xcf   :  { %1750 = vmatpush.bf16.msra.mxu0 %v4319_v58  ;;  %v1423_v43 = vpop.f32.mrf.mxu2  ;;  %v5049_v58 = vld [vmem:[#allocation5 + $0x22c] sm:$0xf] }
  0xd0   :  { %1709 = vmatpush.bf16.msrb.mxu1 %v3919_v51  ;;  %1660 = vmatmul.bf16.vlgmr.msrb.gmra.mxu3 %v5746_v42  ;;  %v3980_v51 = vld [vmem:[#allocation5 + $0x358] sm:$0xf0]  ;;  %v3839_v5 = vor.u32 %v5049_v58, %v3836_v59 }
  0xd1   :  { %1722 = vmatpush.bf16.msra.mxu3 %v4063_v47  ;;  %1688 = vmatmul.bf16.vlgmr.msrb.gmra.mxu2 %v5730_v55  ;;  %v1396_v55 = vadd.f32 %v1395_v22, %v394_v12 }
  0xd2   :  { %1736 = vmatpush.bf16.msra.mxu2 %v4191_v48  ;;  %v1437_v48 = vpop.f32.mrf.mxu3  ;;  %v1397_v56 = vpop.f32.mrf.mxu0 }
  0xd3   :  { %1751 = vmatpush.bf16.msra.mxu0 %v4303_v9  ;;  %v1410_v39 = vadd.f32 %v1409_v8, %v1396_v55  ;;  %v1398_v62 = vadd.f32 %v1397_v56, %v394_v12  ;;  %v4092_v9 = vld [vmem:[#allocation5 + $0x438] sm:$0xf0] }
  0xd4   :  { %1710 = vmatpush.bf16.msrb.mxu1 %v3903_v4  ;;  %v5081_v4 = vld [vmem:[#allocation5 + $0x32c] sm:$0xf]  ;;  %v4220_v12 = vld [vmem:[#allocation5 + $0x538] sm:$0xf0]  ;;  %v4095_v21 = vor.u32 %v5113_v7, %v4092_v9 }
  0xd5   :  { %1723 = vmatpush.bf16.msra.mxu3 %v4047_v0  ;;  %v1424_v47 = vadd.f32 %v1423_v43, %v1410_v39  ;;  %v4236_v0 = vld [vmem:[#allocation5 + $0x558] sm:$0xf0]  ;;  %v3967_v20 = vor.u32 %v5081_v4, %v3964_v6 }
  0xd6   :  { %1737 = vmatpush.bf16.msra.mxu2 %v4175_v1  ;;  %v3983_v1 = vor.u32 %v5085_v46, %v3980_v51  ;;  %v1411_v10 = vpop.f32.mrf.mxu1  ;;  %v4239_v11 = vor.u32 %v5149_v63, %v4236_v0  ;;  %v3948_v55 = vld [vmem:[#allocation5 + $0x318] sm:$0xf0] }
  0xd7   :  { %1752 = vmatpush.bf16.msra.mxu0 %v4287_v23  ;;  %v1438_v61 = vadd.f32 %v1437_v48, %v1424_v47  ;;  %v1425_v19 = vpop.f32.mrf.mxu2  ;;  %v3951_v33 = vor.u32 %v5077_v25, %v3948_v55 }
  0xd8   :  { %1711 = vmatpush.bf16.msrb.mxu1 %v3887_v18  ;;  %v4332_v18 = vld [vmem:[#allocation5 + $0x618] sm:$0xf0] }
  0xd9   :  { %1724 = vmatpush.bf16.msra.mxu3 %v4031_v15  ;;  %v5145_v15 = vld [vmem:[#allocation5 + $0x52c] sm:$0xf] }
  0xda   :  { %1738 = vmatpush.bf16.msra.mxu2 %v4159_v16  ;;  %v1412_v16 = vadd.f32 %v1411_v10, %v1398_v62  ;;  %v1439_v23 = vpop.f32.mrf.mxu3  ;;  %v4223_v26 = vor.u32 %v5145_v15, %v4220_v12 }
  0xdb   :  { %1753 = vmatpush.bf16.msra.mxu0 %v4271_v35 }
  0xdc   :  { %1712 = vmatpush.bf16.msrb.mxu1 %v3871_v31  ;;  %v1426_v22 = vadd.f32 %v1425_v19, %v1412_v16  ;;  %v5141_v31 = vld [vmem:[#allocation5 + $0x50c] sm:$0xf] }
  0xdd   :  { %1725 = vmatpush.bf16.msra.mxu3 %v4015_v28  ;;  %v4076_v28 = vld [vmem:[#allocation5 + $0x418] sm:$0xf0]  ;;  %v4207_v8 = vor.u32 %v5141_v31, %v4204_v32 }
  0xde   :  { %1739 = vmatpush.bf16.msra.mxu2 %v4143_v29  ;;  %v4335_v29 = vor.u32 %v5173_v17, %v4332_v18  ;;  %v1440_v30 = vadd.f32 %v1439_v23, %v1426_v22  ;;  %v4079_v34 = vor.u32 %v5109_v27, %v4076_v28 }
  0xdf   :  { %1754 = vmatpush.bf16.msra.mxu0 %v4255_v57  ;;  %v1479_v35 = vpop.f32.mrf.mxu2 }
  0xe0   :  { %1713 = vmatpush.bf16.msrb.mxu1 %v3855_v49 }
  0xe1   :  { %1726 = vmatpush.bf16.msra.mxu3 %v3999_v44 }
  0xe2   :  { %1740 = vmatpush.bf16.msra.mxu2 %v4127_v45 }
  0xe3   :  { %1755 = vmatpush.bf16.msra.mxu0 %v4239_v11 }
  0xe4   :  { %1714 = vmatpush.bf16.msrb.mxu1 %v3839_v5 }
  0xe5   :  { %1727 = vmatpush.bf16.msra.mxu3 %v3983_v1 }
  0xe6   :  { %1741 = vmatpush.bf16.msra.mxu2 %v4111_v2 }
  0xe7   :  { %1756 = vmatpush.bf16.msra.mxu0 %v4223_v26  ;;  %v1451_v36 = vpop.f32.mrf.mxu0  ;;  %v1481_v40 = vpop.f32.mrf.mxu2 }
  0xe8   :  { %1715 = vmatpush.bf16.msrb.mxu1 %v3823_v24  ;;  %v1452_v38 = vadd.f32 %v1451_v36, %v1438_v61  ;;  %v1465_v39 = vpop.f32.mrf.mxu1 }
  0xe9   :  { %1728 = vmatpush.bf16.msra.mxu3 %v3967_v20 }
  0xea   :  { %1742 = vmatpush.bf16.msra.mxu2 %v4095_v21  ;;  %v1466_v41 = vadd.f32 %v1465_v39, %v1452_v38 }
  0xeb   :  { %1716 = vmatmul.bf16.vlgmr.msrb.gmra.mxu1 %v5728_v54  ;;  %1757 = vmatpush.bf16.msra.mxu0 %v4207_v8 }
  0xec   :  { %1771 = vmatpush.bf16.msra.mxu1 %v4335_v29  ;;  %v1480_v43 = vadd.f32 %v1479_v35, %v1466_v41 }
  0xed   :  { %1729 = vmatpush.bf16.msra.mxu3 %v3951_v33 }
  0xee   :  { %1743 = vmatpush.bf16.msra.mxu2 %v4079_v34  ;;  %1758 = vmatmul.bf16.vlgmr.msra.gmra.mxu0 %v5746_v42  ;;  %v5780_v53 = vmax.f32 %v1480_v43, 0.0 }
  0xef   :  { %v1453_v44 = vpop.f32.mrf.mxu0  ;;  %v1493_v45 = vpop.f32.mrf.mxu3 }
  0xf0   :  { %1730 = vmatmul.bf16.vlgmr.msra.gmra.mxu3 %v5732_v60  ;;  %v1454_v54 = vadd.f32 %v1453_v44, %v1440_v30  ;;  %v1467_v46 = vpop.f32.mrf.mxu1  ;;  %v1799_v56 = vrot.slane %v5780_v53, 4  ;;  %v1826_v57 = vmul.f32 %v5780_v53, %v5780_v53 }
  0xf1   :  { %1744 = vmatmul.bf16.vlgmr.msra.gmra.mxu2 %v5744_v37  ;;  %v395_v37 = vperm.slane %v5765_v3, 1 }
  0xf2   :  { %v1468_v48 = vadd.f32 %v1467_v46, %v1454_v54  ;;  %v1800_v58 = vadd.f32 %v1799_v56, %v5780_v53  ;;  %v1835_v59 = vrot.slane %v1826_v57, 4 }
  0xf4   :  { %v1507_v47 = vpop.f32.mrf.mxu2  ;;  %v5777_v60 = vadd.f32 %v1481_v40, %v1468_v48  ;;  %v1801_v1 = vrot.slane %v1800_v58, 2  ;;  %v1836_v2 = vadd.f32 %v1835_v59, %v1826_v57 }
  0xf6   :  { %v1802_v6 = vadd.f32 %v1801_v1, %v1800_v58  ;;  %v1837_v7 = vrot.slane %v1836_v2, 2 }
  0xf7   :  { %v1495_v42 = vpop.f32.mrf.mxu3 }
  0xf8   :  { %v1496_v49 = vadd.f32 %v1495_v42, %v395_v37  ;;  %v1803_v16 = vrot.slane %v1802_v6, 1  ;;  %v1838_v12 = vadd.f32 %v1837_v7, %v1836_v2 }
  0xfa   :  { %v1804_v18 = vadd.f32 %v1803_v16, %v1802_v6  ;;  %v1839_v19 = vrot.slane %v1838_v12, 1 }
  0xfb   :  { %4339 = vmatmul.msk.bf16.vlgmr.msra.gmra.mxu1 %vm1382_vm0, %v5740_v50  ;;  %v1494_v50 = vadd.f32 %v1493_v45, %v395_v37 }
  0xfc   :  { %v1509_v51 = vpop.f32.mrf.mxu2  ;;  %v1840_v23 = vadd.f32 %v1839_v19, %v1838_v12  ;;  %v5786_v24 = vmul.f32 0.125, %v1804_v18 }
  0xfd   :  { %v1510_v52 = vadd.f32 %v1509_v51, %v1496_v49  ;;  %v1508_v61 = vadd.f32 %v1507_v47, %v1494_v50  ;;  %v396_v50 = vperm.slane %v5765_v3, 2 }
  0xfe   :  { %v1866_v26 = vmul.f32 0.125, %v1840_v23  ;;  %v1870_v27 = vmul.f32 %v5786_v24, %v5786_v24 }
 0x100   :  { %v1874_v30 = vsub.f32 %v1866_v26, %v1870_v27 }
 0x102   :  { %v1878_v35 = vmax.f32 %v1874_v30, 0.0 }
 0x104   :  { %v1883_v44 = vadd.f32 1e-05, %v1878_v35 }
 0x106   :  { %5355 = vrsqrt.f32 %v1883_v44  ;;  %vm1893_vm5 = vweird.f32 %v1883_v44 }
 0x107   :  { %v1521_v62 = vpop.f32.mrf.mxu0 }
 0x108   :  { %v1522_v63 = vadd.f32 %v1521_v62, %v1508_v61  ;;  %v1535_v0 = vpop.f32.mrf.mxu1 }
 0x10a   :  { %v1536_v4 = vadd.f32 %v1535_v0, %v1522_v63 }
 0x10c   :  { %v5356_v61 = vpop.eup %5355 }
 0x10d   :  { %v1888_v2 = vmul.f32 %v5356_v61, %v1883_v44  ;;  %vm1894_vm2 = vweird.f32 %v5356_v61 }
 0x10e   :  { %vm1895_vm7 = vmor %vm1893_vm5, %vm1894_vm2 }
 0x10f   :  { %v1549_v5 = vpop.f32.mrf.mxu3  ;;  %v1523_v10 = vpop.f32.mrf.mxu0 }
 0x110   :  { %v1550_v9 = vadd.f32 %v1549_v5, %v1536_v4  ;;  %v1524_v11 = vadd.f32 %v1523_v10, %v1510_v52  ;;  %v1537_v14 = vpop.f32.mrf.mxu1 }
 0x112   :  { %v1538_v15 = vadd.f32 %v1537_v14, %v1524_v11 }
 0x114   :  { %v1563_v13 = vpop.f32.mrf.mxu2 }
 0x115   :  { %v1564_v25 = vadd.f32 %v1563_v13, %v1550_v9  ;;  %v1889_v9 = vmul.f32 %v5356_v61, %v1888_v2  ;;  %v397_v2 = vperm.slane %v5765_v3, 3 }
 0x117   :  { %v1551_v17 = vpop.f32.mrf.mxu3  ;;  %v1890_v13 = vmul.f32 0.5, %v1889_v9  ;;  %v4566_v9 = vld [vmem:[#allocation11 + $0x1c0] sm:$0xf] }
 0x118   :  { %v1552_v20 = vadd.f32 %v1551_v17, %v1538_v15 }
 0x11c   :  { %v1565_v21 = vpop.f32.mrf.mxu2 }
 0x11d   :  { %v1566_v22 = vadd.f32 %v1565_v21, %v1552_v20  ;;  %v1891_v20 = vsub.f32 1.5, %v1890_v13 }
 0x11f   :  { %v1577_v55 = vpop.f32.mrf.mxu3  ;;  %v1892_v23 = vmul.f32 %v5356_v61, %v1891_v20  ;;  %v4422_v20 = vld [vmem:[#allocation11 + $0xa0] sm:$0xf] }
 0x120   :  { %v1578_v28 = vadd.f32 %v1577_v55, %v1564_v25 }
 0x122   :  { %v5790_v29 = vmax.f32 %v1578_v28, 0.0 }
 0x124   :  { %v1806_v31 = vrot.slane %v5790_v29, 4  ;;  %v1827_v32 = vmul.f32 %v5790_v29, %v5790_v29 }
 0x126   :  { %v1807_v33 = vadd.f32 %v1806_v31, %v5790_v29  ;;  %v1842_v34 = vrot.slane %v1827_v32, 4 }
 0x127   :  { %v1579_v8 = vpop.f32.mrf.mxu3  ;;  %v1619_v48 = vpop.f32.mrf.mxu0 }
 0x128   :  { %v1808_v36 = vrot.slane %v1807_v33, 2  ;;  %v1843_v38 = vadd.f32 %v1842_v34, %v1827_v32  ;;  %v5796_v39 = vadd.f32 %v1579_v8, %v1566_v22  ;;  %v1591_v40 = vpop.f32.mrf.mxu1 }
 0x129   :  { %v1592_v10 = vadd.f32 %v1591_v40, %v396_v50 }
 0x12a   :  { %v1809_v41 = vadd.f32 %v1808_v36, %v1807_v33  ;;  %v1844_v43 = vrot.slane %v1843_v38, 2  ;;  %v1896_v33 = vsel %vm1895_vm7, %v5356_v61, %v1892_v23  ;;  %v4838_v61 = vld [vmem:[#allocation11 + $0x3e0] sm:$0xf] }
 0x12c   :  { %v1810_v45 = vrot.slane %v1809_v41, 1  ;;  %v1845_v54 = vadd.f32 %v1844_v43, %v1843_v38 }
 0x12e   :  { %v1811_v46 = vadd.f32 %v1810_v45, %v1809_v41  ;;  %v1846_v47 = vrot.slane %v1845_v54, 1 }
 0x12f   :  { %v1621_v4 = vpop.f32.mrf.mxu0 }
 0x130   :  { %v1847_v42 = vadd.f32 %v1846_v47, %v1845_v54  ;;  %v5798_v49 = vmul.f32 0.125, %v1811_v46  ;;  %v1593_v52 = vpop.f32.mrf.mxu1 }
 0x131   :  { %v1594_v59 = vadd.f32 %v1593_v52, %v396_v50  ;;  %v5238_v52 = vld [vmem:[#allocation11 + $0x1ec] sm:$0xf0] }
 0x132   :  { %v1867_v56 = vmul.f32 0.125, %v1847_v42  ;;  %v1871_v57 = vmul.f32 %v5798_v49, %v5798_v49 }
 0x133   :  { %v1605_v37 = vpop.f32.mrf.mxu3 }
 0x134   :  { %v1633_v51 = vpop.f32.mrf.mxu2  ;;  %v1875_v58 = vsub.f32 %v1867_v56, %v1871_v57  ;;  %v1606_v15 = vadd.f32 %v1605_v37, %v1592_v10  ;;  %v5206_v37 = vld [vmem:[#allocation11 + $0xec] sm:$0xf0]  ;;  %v4710_v56 = vld [vmem:[#allocation11 + $0x2e0] sm:$0xf] }
 0x135   :  { %v5234_v10 = vld [vmem:[#allocation11 + $0x1cc] sm:$0xf0] }
 0x136   :  { %v1879_v62 = vmax.f32 %v1875_v58, 0.0  ;;  %v1620_v18 = vadd.f32 %v1619_v48, %v1606_v15  ;;  %v4454_v48 = vld [vmem:[#allocation11 + $0xe0] sm:$0xf]  ;;  %v4567_v13 = vor.u32 %v5234_v10, %v4566_v9  ;;  %v5254_v10 = vld [vmem:[#allocation11 + $0x26c] sm:$0xf0] }
 0x137   :  { %v1675_v19 = vpop.f32.mrf.mxu0  ;;  %v4455_v42 = vor.u32 %v5206_v37, %v4454_v48  ;;  %v4822_v15 = vld [vmem:[#allocation11 + $0x3c0] sm:$0xf]  ;;  %v5226_v48 = vld [vmem:[#allocation11 + $0x18c] sm:$0xf0] }
 0x138   :  { %v1884_v0 = vadd.f32 1e-05, %v1879_v62  ;;  %v1634_v22 = vadd.f32 %v1633_v51, %v1620_v18  ;;  %v4582_v51 = vld [vmem:[#allocation11 + $0x1e0] sm:$0xf] }
 0x139   :  { %v4583_v58 = vor.u32 %v5238_v52, %v4582_v51  ;;  %2775 = vmatpush.bf16.msrb.mxu3 %v4455_v42  ;;  %v4662_v37 = vld [vmem:[#allocation11 + $0x280] sm:$0xf]  ;;  %v5258_v42 = vld [vmem:[#allocation11 + $0x28c] sm:$0xf0] }
 0x13a   :  { %5357 = vrsqrt.f32 %v1884_v0  ;;  %vm1903_vm3 = vweird.f32 %v1884_v0  ;;  %v4663_v52 = vor.u32 %v5258_v42, %v4662_v37  ;;  %v5246_v37 = vld [vmem:[#allocation11 + $0x22c] sm:$0xf0] }
 0x13b   :  { %v1607_v63 = vpop.f32.mrf.mxu3  ;;  %2789 = vmatpush.bf16.msrb.mxu1 %v4583_v58 }
 0x13c   :  { %v1608_v1 = vadd.f32 %v1607_v63, %v1594_v59  ;;  %v1635_v5 = vpop.f32.mrf.mxu2  ;;  %v5270_v59 = vld [vmem:[#allocation11 + $0x2ec] sm:$0xf0] }
 0x13d   :  { %v4711_v63 = vor.u32 %v5270_v59, %v4710_v56  ;;  %v4790_v56 = vld [vmem:[#allocation11 + $0x380] sm:$0xf] }
 0x13e   :  { %v1622_v6 = vadd.f32 %v1621_v4, %v1608_v1 }
 0x13f   :  { %v1677_v35 = vpop.f32.mrf.mxu0  ;;  %2803 = vmatpush.bf16.msrb.mxu2 %v4711_v63  ;;  %2790 = vmatpush.bf16.msrb.mxu1 %v4567_v13  ;;  %v5190_v63 = vld [vmem:[#allocation11 + $0x6c] sm:$0xf0] }
 0x140   :  { %v1636_v7 = vadd.f32 %v1635_v5, %v1622_v6  ;;  %v5358_v11 = vpop.eup %5357  ;;  %v4438_v5 = vld [vmem:[#allocation11 + $0xc0] sm:$0xf]  ;;  %v5202_v6 = vld [vmem:[#allocation11 + $0xcc] sm:$0xf0] }
 0x141   :  { %v1898_v14 = vmul.f32 %v5358_v11, %v1884_v0  ;;  %vm1904_vm1 = vweird.f32 %v5358_v11  ;;  %v5302_v0 = vld [vmem:[#allocation11 + $0x3ec] sm:$0xf0] }
 0x142   :  { %vm1905_vm4 = vmor %vm1903_vm3, %vm1904_vm1  ;;  %v4839_v4 = vor.u32 %v5302_v0, %v4838_v61  ;;  %v5286_v13 = vld [vmem:[#allocation11 + $0x36c] sm:$0xf0] }
 0x143   :  { %v1899_v16 = vmul.f32 %v5358_v11, %v1898_v14  ;;  %v5266_v14 = vld [vmem:[#allocation11 + $0x2cc] sm:$0xf0] }
 0x144   :  { %2817 = vmatpush.bf16.msrb.mxu0 %v4839_v4  ;;  %v4518_v4 = vld [vmem:[#allocation11 + $0x160] sm:$0xf] }
 0x145   :  { %v1900_v17 = vmul.f32 0.5, %v1899_v16 }
 0x147   :  { %v1901_v21 = vsub.f32 1.5, %v1900_v17  ;;  %v5298_v17 = vld [vmem:[#allocation11 + $0x3cc] sm:$0xf0] }
 0x148   :  { %v1647_v12 = vpop.f32.mrf.mxu1 }
 0x149   :  { %v1902_v25 = vmul.f32 %v5358_v11, %v1901_v21  ;;  %v1648_v55 = vadd.f32 %v1647_v12, %v1634_v22  ;;  %v5198_v21 = vld [vmem:[#allocation11 + $0xac] sm:$0xf0] }
 0x14b   :  { %v1906_v27 = vsel %vm1905_vm4, %v5358_v11, %v1902_v25  ;;  %v1703_v50 = vpop.f32.mrf.mxu0  ;;  %v4694_v11 = vld [vmem:[#allocation11 + $0x2c0] sm:$0xf]  ;;  %v4423_v25 = vor.u32 %v5198_v21, %v4422_v20 }
 0x14c   :  { %v1931_v31 = vrot.slane %v1906_v27, 7  ;;  %v4695_v12 = vor.u32 %v5266_v14, %v4694_v11  ;;  %v4678_v27 = vld [vmem:[#allocation11 + $0x2a0] sm:$0xf] }
 0x14d   :  { %v4774_v11 = vld [vmem:[#allocation11 + $0x360] sm:$0xf] }
 0x14e   :  { %v5804_v34 = vsel %vm1934_vm6, %v1896_v33, %v1931_v31  ;;  %2804 = vmatpush.bf16.msrb.mxu2 %v4695_v12  ;;  %v4806_v31 = vld [vmem:[#allocation11 + $0x3a0] sm:$0xf]  ;;  %v4775_v12 = vor.u32 %v5286_v13, %v4774_v11  ;;  %v5242_v11 = vld [vmem:[#allocation11 + $0x20c] sm:$0xf0] }
 0x14f   :  { %v4502_v20 = vld [vmem:[#allocation11 + $0x140] sm:$0xf] }
 0x150   :  { %v1649_v26 = vpop.f32.mrf.mxu1 }
 0x151   :  { %v1650_v28 = vadd.f32 %v1649_v26, %v1636_v7  ;;  %v4439_v7 = vor.u32 %v5202_v6, %v4438_v5  ;;  %v5230_v26 = vld [vmem:[#allocation11 + $0x1ac] sm:$0xf0]  ;;  %v4646_v6 = vld [vmem:[#allocation11 + $0x260] sm:$0xf] }
 0x152   :  { %v5222_v5 = vld [vmem:[#allocation11 + $0x16c] sm:$0xf0] }
 0x153   :  { %v1661_v30 = vpop.f32.mrf.mxu3  ;;  %2776 = vmatpush.bf16.msrb.mxu3 %v4439_v7  ;;  %v4519_v9 = vor.u32 %v5222_v5, %v4518_v4  ;;  %v4470_v4 = vld [vmem:[#allocation11 + $0x100] sm:$0xf]  ;;  %v5210_v5 = vld [vmem:[#allocation11 + $0x10c] sm:$0xf0] }
 0x154   :  { %v1662_v32 = vadd.f32 %v1661_v30, %v1648_v55  ;;  %v1689_v57 = vpop.f32.mrf.mxu2  ;;  %v4550_v55 = vld [vmem:[#allocation11 + $0x1a0] sm:$0xf]  ;;  %v5262_v30 = vld [vmem:[#allocation11 + $0x2ac] sm:$0xf0] }
 0x155   :  { %v1690_v22 = vadd.f32 %v1689_v57, %v397_v2  ;;  %v4679_v33 = vor.u32 %v5262_v30, %v4678_v27  ;;  %v5290_v57 = vld [vmem:[#allocation11 + $0x38c] sm:$0xf0] }
 0x156   :  { %v1676_v8 = vadd.f32 %v1675_v19, %v1662_v32  ;;  %v4823_v19 = vor.u32 %v5298_v17, %v4822_v15  ;;  %v4791_v59 = vor.u32 %v5290_v57, %v4790_v56  ;;  %v4742_v56 = vld [vmem:[#allocation11 + $0x320] sm:$0xf]  ;;  %v5278_v57 = vld [vmem:[#allocation11 + $0x32c] sm:$0xf0] }
 0x157   :  { %2777 = vmatpush.bf16.msrb.mxu3 %v4423_v25  ;;  %2805 = vmatpush.bf16.msrb.mxu2 %v4679_v33  ;;  %v5218_v25 = vld [vmem:[#allocation11 + $0x14c] sm:$0xf0] }
 0x158   :  { %v5806_v36 = vmax.f32 %v1676_v8, 0.0  ;;  %2818 = vmatpush.bf16.msrb.mxu0 %v4823_v19  ;;  %v5294_v8 = vld [vmem:[#allocation11 + $0x3ac] sm:$0xf0] }
 0x159   :  { %v5186_v19 = vld [vmem:[#allocation11 + $0x4c] sm:$0xf0] }
 0x15a   :  { %v1813_v38 = vrot.slane %v5806_v36, 4  ;;  %v1828_v40 = vmul.f32 %v5806_v36, %v5806_v36 }
 0x15b   :  { %v1663_v41 = vpop.f32.mrf.mxu3  ;;  %2806 = vmatpush.bf16.msrb.mxu2 %v4663_v52 }
 0x15c   :  { %v1814_v43 = vadd.f32 %v1813_v38, %v5806_v36  ;;  %v1849_v44 = vrot.slane %v1828_v40, 4  ;;  %v1664_v45 = vadd.f32 %v1663_v41, %v1650_v28  ;;  %v4551_v28 = vor.u32 %v5230_v26, %v4550_v55  ;;  %v5817_v38 = vpop.f32.mrf.mxu2  ;;  %v4630_v55 = vld [vmem:[#allocation11 + $0x240] sm:$0xf]  ;;  %v5250_v26 = vld [vmem:[#allocation11 + $0x24c] sm:$0xf0] }
 0x15d   :  { %v4807_v41 = vor.u32 %v5294_v8, %v4806_v31  ;;  %v4631_v30 = vor.u32 %v5250_v26, %v4630_v55  ;;  %v4758_v31 = vld [vmem:[#allocation11 + $0x340] sm:$0xf] }
 0x15e   :  { %v1815_v54 = vrot.slane %v1814_v43, 2  ;;  %v1850_v46 = vadd.f32 %v1849_v44, %v1828_v40  ;;  %v5812_v47 = vadd.f32 %v1677_v35, %v1664_v45  ;;  %v5819_v40 = vpop.f32.mrf.mxu0  ;;  %2791 = vmatpush.bf16.msrb.mxu1 %v4551_v28  ;;  %v5194_v44 = vld [vmem:[#allocation11 + $0x8c] sm:$0xf0]  ;;  %v4534_v45 = vld [vmem:[#allocation11 + $0x180] sm:$0xf]  ;;  %v4503_v28 = vor.u32 %v5218_v25, %v4502_v20 }
 0x15f   :  { %2819 = vmatpush.bf16.msrb.mxu0 %v4807_v41  ;;  %v4535_v51 = vor.u32 %v5226_v48, %v4534_v45  ;;  %v5182_v41 = vld [vmem:[#allocation11 + $0x2c] sm:$0xf0]  ;;  %v4614_v48 = vld [vmem:[#allocation11 + $0x220] sm:$0xf] }
 0x160   :  { %v1851_v62 = vrot.slane %v1850_v46, 2  ;;  %v1816_v1 = vadd.f32 %v1815_v54, %v1814_v43  ;;  %v4406_v43 = vld [vmem:[#allocation11 + $0x80] sm:$0xf]  ;;  %v1704_v54 = vadd.f32 %v1703_v50, %v1690_v22  ;;  %v4615_v52 = vor.u32 %v5246_v37, %v4614_v48 }
 0x162   :  { %v1852_v16 = vadd.f32 %v1851_v62, %v1850_v46  ;;  %v1817_v18 = vrot.slane %v1816_v1, 1  ;;  %v4407_v46 = vor.u32 %v5194_v44, %v4406_v43  ;;  %2792 = vmatpush.bf16.msrb.mxu1 %v4535_v51  ;;  %v4390_v62 = vld [vmem:[#allocation11 + $0x60] sm:$0xf] }
 0x163   :  { %2820 = vmatpush.bf16.msrb.mxu0 %v4791_v59  ;;  %v4486_v43 = vld [vmem:[#allocation11 + $0x120] sm:$0xf] }
 0x164   :  { %v1853_v32 = vrot.slane %v1852_v16, 1  ;;  %v1818_v35 = vadd.f32 %v1817_v18, %v1816_v1  ;;  %2778 = vmatpush.bf16.msrb.mxu3 %v4407_v46  ;;  %v4391_v1 = vor.u32 %v5190_v63, %v4390_v62  ;;  %v4374_v18 = vld [vmem:[#allocation11 + $0x40] sm:$0xf]  ;;  %v5214_v46 = vld [vmem:[#allocation11 + $0x12c] sm:$0xf0] }
 0x165   :  { %v4487_v51 = vor.u32 %v5214_v46, %v4486_v43  ;;  %v4342_v62 = vld [vmem:[#allocation11] sm:$0xf]  ;;  %v5178_v63 = vld [vmem:[#allocation11 + $0xc] sm:$0xf0]  ;;  %v5264_v46 = vld [vmem:[#allocation11 + $0x2c4] sm:$0xf] }
 0x166   :  { %v1854_v58 = vadd.f32 %v1853_v32, %v1852_v16  ;;  %v5821_v61 = vmul.f32 0.125, %v1818_v35  ;;  %v4647_v16 = vor.u32 %v5254_v10, %v4646_v6  ;;  %2793 = vmatpush.bf16.msrb.mxu1 %v4519_v9  ;;  %v5282_v32 = vld [vmem:[#allocation11 + $0x34c] sm:$0xf0]  ;;  %v4358_v35 = vld [vmem:[#allocation11 + $0x20] sm:$0xf]  ;;  %v4471_v9 = vor.u32 %v5210_v5, %v4470_v4 }
 0x167   :  { %2821 = vmatpush.bf16.msrb.mxu0 %v4775_v12  ;;  %v4759_v8 = vor.u32 %v5282_v32, %v4758_v31  ;;  %v4598_v10 = vld [vmem:[#allocation11 + $0x200] sm:$0xf]  ;;  %v5300_v31 = vld [vmem:[#allocation11 + $0x3e4] sm:$0xf]  ;;  %v4840_v32 = vld [vmem:[#allocation11 + $0x3f0] sm:$0xf0] }
 0x168   :  { %v1717_v23 = vpop.f32.mrf.mxu1  ;;  %v1868_v14 = vmul.f32 0.125, %v1854_v58  ;;  %2779 = vmatpush.bf16.msrb.mxu3 %v4391_v1  ;;  %v1872_v21 = vmul.f32 %v5821_v61, %v5821_v61  ;;  %2807 = vmatpush.bf16.msrb.mxu2 %v4647_v16  ;;  %v4743_v58 = vor.u32 %v5278_v57, %v4742_v56  ;;  %v4343_v1 = vor.u32 %v5178_v63, %v4342_v62  ;;  %v4824_v57 = vld [vmem:[#allocation11 + $0x3d0] sm:$0xf0]  ;;  %v5228_v4 = vld [vmem:[#allocation11 + $0x1a4] sm:$0xf] }
 0x169   :  { %v1718_v0 = vadd.f32 %v1717_v23, %v1704_v54  ;;  %v4375_v23 = vor.u32 %v5186_v19, %v4374_v18  ;;  %v4359_v54 = vor.u32 %v5182_v41, %v4358_v35  ;;  %v4599_v13 = vor.u32 %v5242_v11, %v4598_v10  ;;  %v5204_v18 = vld [vmem:[#allocation11 + $0xe4] sm:$0xf]  ;;  %v4456_v19 = vld [vmem:[#allocation11 + $0xf0] sm:$0xf0] }
 0x16a   :  { %2794 = vmatpush.bf16.msrb.mxu1 %v4503_v28  ;;  %v1876_v44 = vsub.f32 %v1868_v14, %v1872_v21  ;;  %v4726_v14 = vld [vmem:[#allocation11 + $0x300] sm:$0xf]  ;;  %v4459_v21 = vor.u32 %v5204_v18, %v4456_v19  ;;  %v4712_v28 = vld [vmem:[#allocation11 + $0x2f0] sm:$0xf0]  ;;  %v4843_v43 = vor.u32 %v5300_v31, %v4840_v32  ;;  %v5292_v11 = vld [vmem:[#allocation11 + $0x3a4] sm:$0xf] }
 0x16b   :  { %v1759_v27 = vpop.f32.mrf.mxu0  ;;  %2822 = vmatpush.bf16.msrb.mxu0 %v4759_v8  ;;  %v4440_v41 = vld [vmem:[#allocation11 + $0xd0] sm:$0xf0]  ;;  %v5224_v19 = vld [vmem:[#allocation11 + $0x184] sm:$0xf] }
 0x16c   :  { %2780 = vmatpush.bf16.msrb.mxu3 %v4375_v23  ;;  %2808 = vmatpush.bf16.msrb.mxu2 %v4631_v30  ;;  %v4584_v23 = vld [vmem:[#allocation11 + $0x1f0] sm:$0xf0] }
 0x16d   :  { %v4424_v62 = vld [vmem:[#allocation11 + $0xb0] sm:$0xf0] }
 0x16e   :  { %2795 = vmatpush.bf16.msrb.mxu1 %v4487_v51  ;;  %v4696_v51 = vld [vmem:[#allocation11 + $0x2d0] sm:$0xf0] }
 0x16f   :  { %2823 = vmatpush.bf16.msrb.mxu0 %v4743_v58  ;;  %v4699_v56 = vor.u32 %v5264_v46, %v4696_v51  ;;  %v5196_v58 = vld [vmem:[#allocation11 + $0xa4] sm:$0xf]  ;;  %v4552_v5 = vld [vmem:[#allocation11 + $0x1b0] sm:$0xf0] }
 0x170   :  { %v5823_v50 = vpop.f32.mrf.mxu1  ;;  %2781 = vmatpush.bf16.msrb.mxu3 %v4359_v54  ;;  %2809 = vmatpush.bf16.msrb.mxu2 %v4615_v52  ;;  %v4568_v54 = vld [vmem:[#allocation11 + $0x1d0] sm:$0xf0]  ;;  %v5296_v52 = vld [vmem:[#allocation11 + $0x3c4] sm:$0xf] }
 0x171   :  { %v4680_v10 = vld [vmem:[#allocation11 + $0x2b0] sm:$0xf0]  ;;  %v5252_v46 = vld [vmem:[#allocation11 + $0x264] sm:$0xf] }
 0x172   :  { %2796 = vmatpush.bf16.msrb.mxu1 %v4471_v9  ;;  %v5260_v9 = vld [vmem:[#allocation11 + $0x2a4] sm:$0xf]  ;;  %v4408_v18 = vld [vmem:[#allocation11 + $0x90] sm:$0xf0] }
 0x173   :  { %v1731_v7 = vpop.f32.mrf.mxu3  ;;  %v4792_v31 = vld [vmem:[#allocation11 + $0x390] sm:$0xf0]  ;;  %v5284_v51 = vld [vmem:[#allocation11 + $0x364] sm:$0xf] }
 0x174   :  { %v1732_v15 = vadd.f32 %v1731_v7, %v1718_v0  ;;  %v1745_v17 = vpop.f32.mrf.mxu2  ;;  %v1880_v0 = vmax.f32 %v1876_v44, 0.0  ;;  %2782 = vmatpush.bf16.msrb.mxu3 %v4343_v1  ;;  %2810 = vmatpush.bf16.msrb.mxu2 %v4599_v13  ;;  %v4827_v1 = vor.u32 %v5296_v52, %v4824_v57  ;;  %v4776_v52 = vld [vmem:[#allocation11 + $0x370] sm:$0xf0]  ;;  %v5184_v57 = vld [vmem:[#allocation11 + $0x44] sm:$0xf] }
 0x176   :  { %v1746_v22 = vadd.f32 %v1745_v17, %v1732_v15  ;;  %v5274_v15 = vld [vmem:[#allocation11 + $0x30c] sm:$0xf0]  ;;  %v5833_v20 = vadd.f32 1e-05, %v1880_v0 }
 0x177   :  { %v4727_v17 = vor.u32 %v5274_v15, %v4726_v14  ;;  %v4683_v15 = vor.u32 %v5260_v9, %v4680_v10  ;;  %v5280_v10 = vld [vmem:[#allocation11 + $0x344] sm:$0xf] }
 0x178   :  { %v1760_v33 = vadd.f32 %v1759_v27, %v1746_v22  ;;  %v1773_v45 = vpop.f32.mrf.mxu1  ;;  %v5236_v22 = vld [vmem:[#allocation11 + $0x1e4] sm:$0xf]  ;;  %2831 = vmatpush.bf16.msra.mxu3 %v4459_v21  ;;  %5359 = vrsqrt.f32 %v5833_v20  ;;  %vm1913_vm9 = vweird.f32 %v5833_v20 }
 0x179   :  { %2824 = vmatpush.bf16.msrb.mxu0 %v4727_v17  ;;  %v4587_v26 = vor.u32 %v5236_v22, %v4584_v23  ;;  %v5268_v27 = vld [vmem:[#allocation11 + $0x2e4] sm:$0xf] }
 0x17a   :  { %v1774_v42 = vadd.f32 %v1773_v45, %v1760_v33  ;;  %v4715_v30 = vor.u32 %v5268_v27, %v4712_v28  ;;  %v5200_v33 = vld [vmem:[#allocation11 + $0xc4] sm:$0xf]  ;;  %v4664_v28 = vld [vmem:[#allocation11 + $0x290] sm:$0xf0] }
 0x17b   :  { %2845 = vmatpush.bf16.msra.mxu1 %v4587_v26  ;;  %v4443_v44 = vor.u32 %v5200_v33, %v4440_v41  ;;  %v5232_v45 = vld [vmem:[#allocation11 + $0x1c4] sm:$0xf] }
 0x17c   :  { %v5827_v59 = vmax.f32 %v1774_v42, 0.0  ;;  %2859 = vmatpush.bf16.msra.mxu2 %v4715_v30  ;;  %v4571_v42 = vor.u32 %v5232_v45, %v4568_v54  ;;  %v5192_v17 = vld [vmem:[#allocation11 + $0x84] sm:$0xf]  ;;  %v4520_v54 = vld [vmem:[#allocation11 + $0x170] sm:$0xf0] }
 0x17d   :  { %2873 = vmatpush.bf16.msra.mxu0 %v4843_v43  ;;  %2832 = vmatpush.bf16.msra.mxu3 %v4443_v44  ;;  %v5256_v26 = vld [vmem:[#allocation11 + $0x284] sm:$0xf] }
 0x17e   :  { %v1820_v6 = vrot.slane %v5827_v59, 4  ;;  %v1829_v7 = vmul.f32 %v5827_v59, %v5827_v59  ;;  %v5838_v21 = vpop.eup %5359  ;;  %v5288_v30 = vld [vmem:[#allocation11 + $0x384] sm:$0xf]  ;;  %v4667_v33 = vor.u32 %v5256_v26, %v4664_v28 }
 0x17f   :  { %2846 = vmatpush.bf16.msra.mxu1 %v4571_v42  ;;  %v5220_v41 = vld [vmem:[#allocation11 + $0x164] sm:$0xf]  ;;  %v1908_v43 = vmul.f32 %v5838_v21, %v5833_v20  ;;  %v4795_v44 = vor.u32 %v5288_v30, %v4792_v31  ;;  %v4344_v31 = vld [vmem:[#allocation11 + $0x10] sm:$0xf0]  ;;  %vm1914_vm8 = vweird.f32 %v5838_v21 }
 0x180   :  { %v1821_v16 = vadd.f32 %v1820_v6, %v5827_v59  ;;  %v1856_v12 = vrot.slane %v1829_v7, 4  ;;  %2860 = vmatpush.bf16.msra.mxu2 %v4699_v56  ;;  %v4427_v6 = vor.u32 %v5196_v58, %v4424_v62  ;;  %v4523_v42 = vor.u32 %v5220_v41, %v4520_v54  ;;  %v4376_v58 = vld [vmem:[#allocation11 + $0x50] sm:$0xf0]  ;;  %v5216_v62 = vld [vmem:[#allocation11 + $0x144] sm:$0xf]  ;;  %vm1915_vm11 = vmor %vm1913_vm9, %vm1914_vm8 }
 0x181   :  { %2874 = vmatpush.bf16.msra.mxu0 %v4827_v1  ;;  %v5248_v1 = vld [vmem:[#allocation11 + $0x244] sm:$0xf] }
 0x182   :  { %v1822_v25 = vrot.slane %v1821_v16, 2  ;;  %v1857_v55 = vadd.f32 %v1856_v12, %v1829_v7  ;;  %v4555_v7 = vor.u32 %v5228_v4, %v4552_v5  ;;  %2833 = vmatpush.bf16.msra.mxu3 %v4427_v6  ;;  %v1909_v4 = vmul.f32 %v5838_v21, %v1908_v43  ;;  %v5276_v26 = vld [vmem:[#allocation11 + $0x324] sm:$0xf]  ;;  %v4600_v43 = vld [vmem:[#allocation11 + $0x210] sm:$0xf0] }
 0x183   :  { %v4779_v5 = vor.u32 %v5284_v51, %v4776_v52  ;;  %v4379_v6 = vor.u32 %v5184_v57, %v4376_v58  ;;  %v5176_v30 = vld [vmem:[#allocation11 + $0x4] sm:$0xf]  ;;  %v1733_v57 = vpop.f32.mrf.mxu3 }
 0x184   :  { %v1823_v8 = vadd.f32 %v1822_v25, %v1821_v16  ;;  %v1858_v35 = vrot.slane %v1857_v55, 2  ;;  %v4808_v16 = vld [vmem:[#allocation11 + $0x3b0] sm:$0xf0]  ;;  %2847 = vmatpush.bf16.msra.mxu1 %v4555_v7  ;;  %v4411_v25 = vor.u32 %v5192_v17, %v4408_v18  ;;  %2861 = vmatpush.bf16.msra.mxu2 %v4683_v15  ;;  %v5180_v15 = vld [vmem:[#allocation11 + $0x24] sm:$0xf] }
 0x185   :  { %v4811_v12 = vor.u32 %v5292_v11, %v4808_v16  ;;  %v4632_v7 = vld [vmem:[#allocation11 + $0x250] sm:$0xf0]  ;;  %v5244_v18 = vld [vmem:[#allocation11 + $0x224] sm:$0xf] }
 0x186   :  { %v1824_v48 = vrot.slane %v1823_v8, 1  ;;  %v1859_v37 = vadd.f32 %v1858_v35, %v1857_v55  ;;  %v4536_v55 = vld [vmem:[#allocation11 + $0x190] sm:$0xf0]  ;;  %2834 = vmatpush.bf16.msra.mxu3 %v4411_v25  ;;  %v5240_v41 = vld [vmem:[#allocation11 + $0x204] sm:$0xf] }
 0x187   :  { %v4539_v27 = vor.u32 %v5224_v19, %v4536_v55  ;;  %v4392_v35 = vld [vmem:[#allocation11 + $0x70] sm:$0xf0]  ;;  %2875 = vmatpush.bf16.msra.mxu0 %v4811_v12  ;;  %v5212_v12 = vld [vmem:[#allocation11 + $0x124] sm:$0xf]  ;;  %v4603_v52 = vor.u32 %v5240_v41, %v4600_v43  ;;  %v4462_v41 = vld [vmem:[#allocation11 + $0xe8] sm:$0xf] }
 0x188   :  { %v1825_v63 = vadd.f32 %v1824_v48, %v1823_v8  ;;  %v1860_v0 = vrot.slane %v1859_v37, 1  ;;  %v5188_v8 = vld [vmem:[#allocation11 + $0x64] sm:$0xf]  ;;  %v4648_v48 = vld [vmem:[#allocation11 + $0x270] sm:$0xf0]  ;;  %2862 = vmatpush.bf16.msra.mxu2 %v4667_v33 }
 0x189   :  { %v4395_v45 = vor.u32 %v5188_v8, %v4392_v35  ;;  %2848 = vmatpush.bf16.msra.mxu1 %v4539_v27  ;;  %v4651_v56 = vor.u32 %v5252_v46, %v4648_v48  ;;  %v4760_v11 = vld [vmem:[#allocation11 + $0x350] sm:$0xf0]  ;;  %v1692_v8 = vadd.f32 %v5817_v38, %v397_v2  ;;  %v4347_v46 = vor.u32 %v5176_v30, %v4344_v31 }
 0x18a   :  { %v1861_v13 = vadd.f32 %v1860_v0, %v1859_v37  ;;  %v5836_v14 = vmul.f32 0.125, %v1825_v63  ;;  %v4504_v0 = vld [vmem:[#allocation11 + $0x150] sm:$0xf0] }
 0x18b   :  { %2876 = vmatpush.bf16.msra.mxu0 %v4795_v44  ;;  %2835 = vmatpush.bf16.msra.mxu3 %v4395_v45  ;;  %v4507_v9 = vor.u32 %v5216_v62, %v4504_v0  ;;  %v4360_v16 = vld [vmem:[#allocation11 + $0x30] sm:$0xf0]  ;;  %v1706_v3 = vadd.f32 %v5819_v40, %v1692_v8 }
 0x18c   :  { %v1869_v22 = vmul.f32 0.125, %v1861_v13  ;;  %v1873_v23 = vmul.f32 %v5836_v14, %v5836_v14  ;;  %2863 = vmatpush.bf16.msra.mxu2 %v4651_v56  ;;  %v4635_v13 = vor.u32 %v5248_v1, %v4632_v7  ;;  %v4488_v17 = vld [vmem:[#allocation11 + $0x130] sm:$0xf0]  ;;  %v4363_v25 = vor.u32 %v5180_v15, %v4360_v16 }
 0x18d   :  { %2849 = vmatpush.bf16.msra.mxu1 %v4523_v42  ;;  %v4616_v19 = vld [vmem:[#allocation11 + $0x230] sm:$0xf0]  ;;  %v4491_v55 = vor.u32 %v5212_v12, %v4488_v17  ;;  %v1720_v58 = vadd.f32 %v5823_v50, %v1706_v3  ;;  %v1882_v50 = vld [vmem:[#allocation8] sm:$0xf] }
 0x18e   :  { %v1877_v32 = vsub.f32 %v1869_v22, %v1873_v23  ;;  %v1910_v22 = vmul.f32 0.5, %v1909_v4  ;;  %v4763_v23 = vor.u32 %v5280_v10, %v4760_v11  ;;  %v4744_v27 = vld [vmem:[#allocation11 + $0x330] sm:$0xf0]  ;;  %v4619_v28 = vor.u32 %v5244_v18, %v4616_v19 }
 0x18f   :  { %2877 = vmatpush.bf16.msra.mxu0 %v4779_v5  ;;  %2836 = vmatpush.bf16.msra.mxu3 %v4379_v6  ;;  %v4472_v35 = vld [vmem:[#allocation11 + $0x110] sm:$0xf0]  ;;  %v4747_v54 = vor.u32 %v5276_v26, %v4744_v27  ;;  %v1734_v40 = vadd.f32 %v1733_v57, %v1720_v58  ;;  %v1747_v5 = vpop.f32.mrf.mxu2  ;;  %v1782_v18 = vmax.f32 %v5777_v60, 0.0  ;;  %v1783_v19 = vmax.f32 %v5796_v39, 0.0  ;;  %v1942_v39 = vld [vmem:[#allocation10] sm:$0xf] }
 0x190   :  { %v1881_v37 = vmax.f32 %v1877_v32, 0.0  ;;  %2864 = vmatpush.bf16.msra.mxu2 %v4635_v13  ;;  %v5208_v32 = vld [vmem:[#allocation11 + $0x104] sm:$0xf]  ;;  %v1911_v44 = vsub.f32 1.5, %v1910_v22  ;;  %v4728_v42 = vld [vmem:[#allocation11 + $0x310] sm:$0xf0] }
 0x191   :  { %2850 = vmatpush.bf16.msra.mxu1 %v4507_v9  ;;  %v4475_v48 = vor.u32 %v5208_v32, %v4472_v35  ;;  %v1748_v20 = vadd.f32 %v1747_v5, %v1734_v40  ;;  %v5303_v57 = vld [vmem:[#allocation11 + $0x3f4] sm:$0xf0]  ;;  %v4446_v5 = vld [vmem:[#allocation11 + $0xc8] sm:$0xf] }
 0x192   :  { %v5844_v63 = vadd.f32 1e-05, %v1881_v37  ;;  %v5272_v37 = vld [vmem:[#allocation11 + $0x304] sm:$0xf]  ;;  %v1912_v38 = vmul.f32 %v5838_v21, %v1911_v44 }
 0x193   :  { %2878 = vmatpush.bf16.msra.mxu0 %v4763_v23  ;;  %2837 = vmatpush.bf16.msra.mxu3 %v4363_v25  ;;  %v4731_v56 = vor.u32 %v5272_v37, %v4728_v42  ;;  %v5239_v37 = vld [vmem:[#allocation11 + $0x1f4] sm:$0xf0]  ;;  %v4718_v42 = vld [vmem:[#allocation11 + $0x2e8] sm:$0xf] }
 0x194   :  { %5361 = vrsqrt.f32 %v5844_v63  ;;  %2865 = vmatpush.bf16.msra.mxu2 %v4619_v28  ;;  %vm1923_vm12 = vweird.f32 %v5844_v63  ;;  %v1916_v0 = vsel %vm1915_vm11, %v5838_v21, %v1912_v38  ;;  %v1775_v21 = vpop.f32.mrf.mxu1  ;;  %v5271_v38 = vld [vmem:[#allocation11 + $0x2f4] sm:$0xf0] }
 0x195   :  { %2851 = vmatpush.bf16.msra.mxu1 %v4491_v55  ;;  %v1932_v6 = vrot.slane %v1916_v0, 6  ;;  %v1784_v55 = vmax.f32 %v5812_v47, 0.0 }
 0x197   :  { %2879 = vmatpush.bf16.msra.mxu0 %v4747_v54  ;;  %2838 = vmatpush.bf16.msra.mxu3 %v4347_v46 }
 0x198   :  { %2866 = vmatpush.bf16.msra.mxu2 %v4603_v52 }
 0x199   :  { %2852 = vmatpush.bf16.msra.mxu1 %v4475_v48  ;;  %v4590_v48 = vld [vmem:[#allocation11 + $0x1e8] sm:$0xf] }
 0x19a   :  { %v5362_v33 = vpop.eup %5361 }
 0x19b   :  { %v1918_v45 = vmul.f32 %v5362_v33, %v5844_v63  ;;  %vm1924_vm10 = vweird.f32 %v5362_v33  ;;  %2880 = vmatpush.bf16.msra.mxu0 %v4731_v56  ;;  %v1761_v63 = vpop.f32.mrf.mxu0  ;;  %v4846_v56 = vld [vmem:[#allocation11 + $0x3e8] sm:$0xf] }
 0x19c   :  { %vm1925_vm13 = vmor %vm1923_vm12, %vm1924_vm10  ;;  %v1762_v13 = vadd.f32 %v1761_v63, %v1748_v20  ;;  %v5235_v63 = vld [vmem:[#allocation11 + $0x1d4] sm:$0xf0] }
 0x19d   :  { %v1919_v51 = vmul.f32 %v5362_v33, %v1918_v45 }
 0x19e   :  { %v1776_v26 = vadd.f32 %v1775_v21, %v1762_v13  ;;  %v5267_v13 = vld [vmem:[#allocation11 + $0x2d4] sm:$0xf0]  ;;  %v4830_v21 = vld [vmem:[#allocation11 + $0x3c8] sm:$0xf] }
 0x19f   :  { %v1920_v2 = vmul.f32 0.5, %v1919_v51 }
 0x1a0   :  { %v1785_v8 = vmax.f32 %v1776_v26, 0.0  ;;  %v4814_v26 = vld [vmem:[#allocation11 + $0x3a8] sm:$0xf] }
 0x1a1   :  { %v1921_v62 = vsub.f32 1.5, %v1920_v2 }
 0x1a3   :  { %v1922_v1 = vmul.f32 %v5362_v33, %v1921_v62 }
 0x1a5   :  { %v1926_v4 = vsel %vm1925_vm13, %v5362_v33, %v1922_v1 }
 0x1a6   :  { %v1933_v7 = vrot.slane %v1926_v4, 5 }
 0x1a8   :  { %v1937_v9 = vsel %vm1936_vm14, %v1932_v6, %v1933_v7  ;;  %v5203_v6 = vld [vmem:[#allocation11 + $0xd4] sm:$0xf0] }
 0x1a9   :  { %v1939_v10 = vsel %vm1938_vm15, %v5804_v34, %v1937_v9  ;;  %v4847_v9 = vor.u32 %v5303_v57, %v4846_v56  ;;  %v4510_v56 = vld [vmem:[#allocation11 + $0x148] sm:$0xf]  ;;  %v5219_v57 = vld [vmem:[#allocation11 + $0x154] sm:$0xf0] }
 0x1aa   :  { %v1941_v11 = vmul.f32 %v1939_v10, %v1882_v50  ;;  %v4719_v50 = vor.u32 %v5271_v38, %v4718_v42  ;;  %v4574_v10 = vld [vmem:[#allocation11 + $0x1c8] sm:$0xf] }
 0x1ac   :  { %v1944_v15 = vperm.slane %v1941_v11, 0  ;;  %v1945_v16 = vperm.slane %v1941_v11, 1  ;;  %v1946_v12 = vperm.slane %v1941_v11, 2  ;;  %v1947_v17 = vperm.slane %v1941_v11, 3  ;;  %v4702_v11 = vld [vmem:[#allocation11 + $0x2c8] sm:$0xf] }
 0x1ae   :  { %v1952_v22 = vmul.f32 %v1944_v15, %v5786_v24  ;;  %v1953_v23 = vmul.f32 %v1945_v16, %v5798_v49  ;;  %v1954_v25 = vmul.f32 %v1946_v12, %v5821_v61  ;;  %v1955_v34 = vmul.f32 %v1947_v17, %v5836_v14 }
 0x1af   :  { %v1968_v27 = vmul.f32 %v1944_v15, %v5780_v53  ;;  %v1972_v28 = vmul.f32 %v1944_v15, %v1782_v18  ;;  %v1969_v60 = vmul.f32 %v1945_v16, %v5790_v29  ;;  %v1973_v33 = vmul.f32 %v1945_v16, %v1783_v19  ;;  %v5207_v29 = vld [vmem:[#allocation11 + $0xf4] sm:$0xf0] }
 0x1b0   :  { %v1960_v30 = vrot.slane %v1953_v23, 7  ;;  %v1961_v31 = vrot.slane %v1954_v25, 6  ;;  %v1962_v32 = vrot.slane %v1955_v34, 5  ;;  %v1974_v24 = vmul.f32 %v1946_v12, %v1784_v55  ;;  %v5299_v15 = vld [vmem:[#allocation11 + $0x3d4] sm:$0xf0] }
 0x1b1   :  { %v1971_v35 = vmul.f32 %v1947_v17, %v5827_v59  ;;  %v1975_v53 = vmul.f32 %v1947_v17, %v1785_v8  ;;  %v1970_v46 = vmul.f32 %v1946_v12, %v5806_v36  ;;  %v4463_v4 = vor.u32 %v5207_v29, %v4462_v41  ;;  %v4430_v17 = vld [vmem:[#allocation11 + $0xa8] sm:$0xf]  ;;  %v5199_v18 = vld [vmem:[#allocation11 + $0xb4] sm:$0xf0] }
 0x1b2   :  { %v1963_v49 = vsel %vm1934_vm6, %v1952_v22, %v1960_v30  ;;  %v1964_v61 = vsel %vm1936_vm14, %v1961_v31, %v1962_v32  ;;  %v4591_v36 = vor.u32 %v5239_v37, %v4590_v48  ;;  %v4447_v16 = vor.u32 %v5203_v6, %v4446_v5  ;;  %v4558_v23 = vld [vmem:[#allocation11 + $0x1a8] sm:$0xf]  ;;  %v5231_v25 = vld [vmem:[#allocation11 + $0x1b4] sm:$0xf0] }
 0x1b3   :  { %v1965_v14 = vsel %vm1938_vm15, %v1963_v49, %v1964_v61  ;;  %v4575_v12 = vor.u32 %v5235_v63, %v4574_v10  ;;  %v4703_v19 = vor.u32 %v5267_v13, %v4702_v11  ;;  %v4831_v22 = vor.u32 %v5299_v15, %v4830_v21  ;;  %v4686_v34 = vld [vmem:[#allocation11 + $0x2a8] sm:$0xf]  ;;  %v5263_v55 = vld [vmem:[#allocation11 + $0x2b4] sm:$0xf0] }
 0x1b4   :  { %v1967_v47 = vsub.f32 %v1942_v39, %v1965_v14  ;;  %v4559_v30 = vor.u32 %v5231_v25, %v4558_v23  ;;  %v4414_v31 = vld [vmem:[#allocation11 + $0x88] sm:$0xf]  ;;  %v5195_v32 = vld [vmem:[#allocation11 + $0x94] sm:$0xf0] }
 0x1b5   :  { %v4670_v49 = vld [vmem:[#allocation11 + $0x288] sm:$0xf]  ;;  %v5259_v61 = vld [vmem:[#allocation11 + $0x294] sm:$0xf0] }
 0x1b6   :  { %v1980_v43 = vperm.slane %v1967_v47, 3  ;;  %v1977_v44 = vperm.slane %v1967_v47, 0  ;;  %v1978_v45 = vperm.slane %v1967_v47, 1  ;;  %v1979_v54 = vperm.slane %v1967_v47, 2  ;;  %v4798_v8 = vld [vmem:[#allocation11 + $0x388] sm:$0xf] }
 0x1b7   :  { %v5291_v14 = vld [vmem:[#allocation11 + $0x394] sm:$0xf0]  ;;  %v4415_v47 = vor.u32 %v5195_v32, %v4414_v31  ;;  %v4654_v29 = vld [vmem:[#allocation11 + $0x268] sm:$0xf]  ;;  %v5237_v31 = vld [vmem:[#allocation11 + $0x1ec] sm:$0xf] }
 0x1b8   :  { %v1988_v51 = vadd.f32 %v1980_v43, %v1971_v35  ;;  %v1992_v52 = vadd.f32 %v1980_v43, %v1975_v53  ;;  %v1985_v3 = vadd.f32 %v1977_v44, %v1968_v27  ;;  %v1989_v2 = vadd.f32 %v1977_v44, %v1972_v28  ;;  %v5295_v27 = vld [vmem:[#allocation11 + $0x3b4] sm:$0xf0]  ;;  %v4398_v53 = vld [vmem:[#allocation11 + $0x68] sm:$0xf]  ;;  %v4592_v32 = vld [vmem:[#allocation11 + $0x1f8] sm:$0xf0] }
 0x1b9   :  { %v1986_v59 = vadd.f32 %v1978_v45, %v1969_v60  ;;  %v1990_v58 = vadd.f32 %v1978_v45, %v1973_v33  ;;  %v1987_v62 = vadd.f32 %v1979_v54, %v1970_v46  ;;  %v1991_v40 = vadd.f32 %v1979_v54, %v1974_v24  ;;  %v4542_v33 = vld [vmem:[#allocation11 + $0x188] sm:$0xf]  ;;  %v5227_v24 = vld [vmem:[#allocation11 + $0x194] sm:$0xf0] }
 0x1ba   :  { %v5876_v0 = vpack.c.bf16 %v1992_v52, %v1988_v51  ;;  %v5878_v1 = vpack.c.bf16 %v1989_v2, %v1985_v3  ;;  %v4431_v28 = vor.u32 %v5199_v18, %v4430_v17  ;;  %v4687_v60 = vor.u32 %v5263_v55, %v4686_v34  ;;  %v5191_v41 = vld [vmem:[#allocation11 + $0x74] sm:$0xf0]  ;;  %v4526_v45 = vld [vmem:[#allocation11 + $0x168] sm:$0xf] }
 0x1bb   :  { %v5880_v7 = vpack.c.bf16 %v1990_v58, %v1986_v59  ;;  %v5882_v20 = vpack.c.bf16 %v1991_v40, %v1987_v62  ;;  %v4815_v39 = vor.u32 %v5295_v27, %v4814_v26  ;;  %v4543_v35 = vor.u32 %v5227_v24, %v4542_v33  ;;  %v5223_v54 = vld [vmem:[#allocation11 + $0x174] sm:$0xf0]  ;;  %v4782_v48 = vld [vmem:[#allocation11 + $0x368] sm:$0xf]  ;;  %v4720_v24 = vld [vmem:[#allocation11 + $0x2f8] sm:$0xf0] }
 0x1bc   :  { %2783 = vmatmul.bf16.vlgmr.msrb.gmra.mxu3 %v5878_v1  ;;  %2825 = vmatmul.bf16.vlgmr.msrb.gmra.mxu0 %v5876_v0  ;;  %v4671_v43 = vor.u32 %v5259_v61, %v4670_v49  ;;  %v4799_v44 = vor.u32 %v5291_v14, %v4798_v8  ;;  %v5255_v46 = vld [vmem:[#allocation11 + $0x274] sm:$0xf0]  ;;  %v4399_v42 = vor.u32 %v5191_v41, %v4398_v53  ;;  %v4382_v52 = vld [vmem:[#allocation11 + $0x48] sm:$0xf]  ;;  %v5301_v49 = vld [vmem:[#allocation11 + $0x3ec] sm:$0xf] }
 0x1bd   :  { %2797 = vmatmul.bf16.vlgmr.msrb.gmra.mxu1 %v5880_v7  ;;  %2811 = vmatmul.bf16.vlgmr.msrb.gmra.mxu2 %v5882_v20  ;;  %v5287_v37 = vld [vmem:[#allocation11 + $0x374] sm:$0xf0]  ;;  %v4527_v51 = vor.u32 %v5223_v54, %v4526_v45  ;;  %v4655_v2 = vor.u32 %v5255_v46, %v4654_v29  ;;  %v4638_v59 = vld [vmem:[#allocation11 + $0x248] sm:$0xf]  ;;  %v4848_v61 = vld [vmem:[#allocation11 + $0x3f8] sm:$0xf0] }
 0x1be   :  { %2887 = vmatpush.bf16.msrb.mxu3 %v4463_v4  ;;  %2901 = vmatpush.bf16.msrb.mxu1 %v4591_v36  ;;  %v5187_v3 = vld [vmem:[#allocation11 + $0x54] sm:$0xf0]  ;;  %v4783_v38 = vor.u32 %v5287_v37, %v4782_v48  ;;  %v4766_v62 = vld [vmem:[#allocation11 + $0x348] sm:$0xf]  ;;  %v4511_v36 = vor.u32 %v5219_v57, %v4510_v56  ;;  %v5201_v53 = vld [vmem:[#allocation11 + $0xcc] sm:$0xf] }
 0x1bf   :  { %2915 = vmatpush.bf16.msrb.mxu2 %v4719_v50  ;;  %2929 = vmatpush.bf16.msrb.mxu0 %v4847_v9  ;;  %v5251_v58 = vld [vmem:[#allocation11 + $0x254] sm:$0xf0]  ;;  %v4383_v4 = vor.u32 %v5187_v3, %v4382_v52  ;;  %v4366_v5 = vld [vmem:[#allocation11 + $0x28] sm:$0xf]  ;;  %v4448_v41 = vld [vmem:[#allocation11 + $0xd8] sm:$0xf0] }
 0x1c0   :  { %v5283_v40 = vld [vmem:[#allocation11 + $0x354] sm:$0xf0]  ;;  %v4639_v50 = vor.u32 %v5251_v58, %v4638_v59  ;;  %v4494_v10 = vld [vmem:[#allocation11 + $0x128] sm:$0xf]  ;;  %v5233_v45 = vld [vmem:[#allocation11 + $0x1cc] sm:$0xf] }
 0x1c1   :  { %v5183_v6 = vld [vmem:[#allocation11 + $0x34] sm:$0xf0]  ;;  %v4767_v9 = vor.u32 %v5283_v40, %v4766_v62  ;;  %v4622_v11 = vld [vmem:[#allocation11 + $0x228] sm:$0xf]  ;;  %v4576_v54 = vld [vmem:[#allocation11 + $0x1d8] sm:$0xf0] }
 0x1c2   :  { %2888 = vmatpush.bf16.msrb.mxu3 %v4447_v16  ;;  %2902 = vmatpush.bf16.msrb.mxu1 %v4575_v12  ;;  %v5215_v63 = vld [vmem:[#allocation11 + $0x134] sm:$0xf0]  ;;  %v4750_v21 = vld [vmem:[#allocation11 + $0x328] sm:$0xf]  ;;  %v4367_v12 = vor.u32 %v5183_v6, %v4366_v5  ;;  %v5265_v29 = vld [vmem:[#allocation11 + $0x2cc] sm:$0xf] }
 0x1c3   :  { %2916 = vmatpush.bf16.msrb.mxu2 %v4703_v19  ;;  %2930 = vmatpush.bf16.msrb.mxu0 %v4831_v22  ;;  %v5247_v13 = vld [vmem:[#allocation11 + $0x234] sm:$0xf0]  ;;  %v4350_v16 = vld [vmem:[#allocation11 + $0x8] sm:$0xf]  ;;  %v4495_v17 = vor.u32 %v5215_v63, %v4494_v10  ;;  %v4704_v46 = vld [vmem:[#allocation11 + $0x2d8] sm:$0xf0] }
 0x1c4   :  { %v5279_v15 = vld [vmem:[#allocation11 + $0x334] sm:$0xf0]  ;;  %v4478_v19 = vld [vmem:[#allocation11 + $0x108] sm:$0xf]  ;;  %v4623_v23 = vor.u32 %v5247_v13, %v4622_v11  ;;  %v5297_v48 = vld [vmem:[#allocation11 + $0x3cc] sm:$0xf] }
 0x1c5   :  { %v5179_v18 = vld [vmem:[#allocation11 + $0x14] sm:$0xf0]  ;;  %v4751_v25 = vor.u32 %v5279_v15, %v4750_v21  ;;  %v4606_v34 = vld [vmem:[#allocation11 + $0x208] sm:$0xf]  ;;  %v4832_v37 = vld [vmem:[#allocation11 + $0x3d8] sm:$0xf0] }
 0x1c6   :  { %2889 = vmatpush.bf16.msrb.mxu3 %v4431_v28  ;;  %2903 = vmatpush.bf16.msrb.mxu1 %v4559_v30  ;;  %v5211_v22 = vld [vmem:[#allocation11 + $0x114] sm:$0xf0]  ;;  %v4734_v26 = vld [vmem:[#allocation11 + $0x308] sm:$0xf]  ;;  %v5205_v28 = vld [vmem:[#allocation11 + $0xec] sm:$0xf] }
 0x1c7   :  { %2917 = vmatpush.bf16.msrb.mxu2 %v4687_v60  ;;  %2931 = vmatpush.bf16.msrb.mxu0 %v4815_v39  ;;  %v5243_v55 = vld [vmem:[#allocation11 + $0x214] sm:$0xf0]  ;;  %v4464_v30 = vld [vmem:[#allocation11 + $0xf8] sm:$0xf0]  ;;  %v5269_v60 = vld [vmem:[#allocation11 + $0x2ec] sm:$0xf]  ;;  %v4351_v39 = vor.u32 %v5179_v18, %v4350_v16  ;;  %v4479_v33 = vor.u32 %v5211_v22, %v4478_v19 }
 0x1c8   :  { %v5275_v27 = vld [vmem:[#allocation11 + $0x314] sm:$0xf0]  ;;  %v4607_v8 = vor.u32 %v5243_v55, %v4606_v34  ;;  %v5197_v52 = vld [vmem:[#allocation11 + $0xac] sm:$0xf]  ;;  %v4432_v3 = vld [vmem:[#allocation11 + $0xb8] sm:$0xf0] }
 0x1c9   :  { %v4735_v14 = vor.u32 %v5275_v27, %v4734_v26  ;;  %v5229_v56 = vld [vmem:[#allocation11 + $0x1ac] sm:$0xf]  ;;  %v4560_v57 = vld [vmem:[#allocation11 + $0x1b8] sm:$0xf0] }
 0x1ca   :  { %2890 = vmatpush.bf16.msrb.mxu3 %v4415_v47  ;;  %2904 = vmatpush.bf16.msrb.mxu1 %v4543_v35  ;;  %v4467_v47 = vor.u32 %v5205_v28, %v4464_v30  ;;  %v4595_v35 = vor.u32 %v5237_v31, %v4592_v32  ;;  %v5261_v59 = vld [vmem:[#allocation11 + $0x2ac] sm:$0xf]  ;;  %v4688_v58 = vld [vmem:[#allocation11 + $0x2b8] sm:$0xf0] }
 0x1cb   :  { %2918 = vmatpush.bf16.msrb.mxu2 %v4671_v43  ;;  %2932 = vmatpush.bf16.msrb.mxu0 %v4799_v44  ;;  %v4723_v43 = vor.u32 %v5269_v60, %v4720_v24  ;;  %v4851_v44 = vor.u32 %v5301_v49, %v4848_v61  ;;  %v5293_v62 = vld [vmem:[#allocation11 + $0x3ac] sm:$0xf]  ;;  %v4816_v40 = vld [vmem:[#allocation11 + $0x3b8] sm:$0xf0] }
 0x1cc   :  { %2839 = vmatmul.bf16.vlgmr.msra.gmra.mxu3 %v5878_v1  ;;  %2881 = vmatmul.bf16.vlgmr.msra.gmra.mxu0 %v5876_v0  ;;  %v5193_v5 = vld [vmem:[#allocation11 + $0x8c] sm:$0xf]  ;;  %v4416_v6 = vld [vmem:[#allocation11 + $0x98] sm:$0xf0] }
 0x1cd   :  { %2853 = vmatmul.bf16.vlgmr.msra.gmra.mxu1 %v5880_v7  ;;  %2867 = vmatmul.bf16.vlgmr.msra.gmra.mxu2 %v5882_v20  ;;  %v5225_v10 = vld [vmem:[#allocation11 + $0x18c] sm:$0xf]  ;;  %v4544_v63 = vld [vmem:[#allocation11 + $0x198] sm:$0xf0]  ;;  %v4419_v16 = vor.u32 %v5193_v5, %v4416_v6 }
 0x1ce   :  { %2891 = vmatpush.bf16.msrb.mxu3 %v4399_v42  ;;  %2905 = vmatpush.bf16.msrb.mxu1 %v4527_v51  ;;  %v4451_v42 = vor.u32 %v5201_v53, %v4448_v41  ;;  %v4579_v51 = vor.u32 %v5233_v45, %v4576_v54  ;;  %v5257_v11 = vld [vmem:[#allocation11 + $0x28c] sm:$0xf]  ;;  %v4672_v13 = vld [vmem:[#allocation11 + $0x298] sm:$0xf0] }
 0x1cf   :  { %2919 = vmatpush.bf16.msrb.mxu2 %v4655_v2  ;;  %2933 = vmatpush.bf16.msrb.mxu0 %v4783_v38  ;;  %v4707_v2 = vor.u32 %v5265_v29, %v4704_v46  ;;  %v4835_v38 = vor.u32 %v5297_v48, %v4832_v37  ;;  %v5289_v21 = vld [vmem:[#allocation11 + $0x38c] sm:$0xf]  ;;  %v4800_v15 = vld [vmem:[#allocation11 + $0x398] sm:$0xf0]  ;;  %v4675_v19 = vor.u32 %v5257_v11, %v4672_v13  ;;  %v5903_v11 = vld [vmem:[%s6024_s6] sm:$0xf] }
 0x1d0   :  { %v4400_v18 = vld [vmem:[#allocation11 + $0x78] sm:$0xf0]  ;;  %v4803_v22 = vor.u32 %v5289_v21, %v4800_v15  ;;  %v5253_v34 = vld [vmem:[#allocation11 + $0x26c] sm:$0xf]  ;;  %v2127_v21 = vperm.slane %v5903_v11, 0 }
 0x1d1   :  { %v4656_v55 = vld [vmem:[#allocation11 + $0x278] sm:$0xf0]  ;;  %v5285_v26 = vld [vmem:[#allocation11 + $0x36c] sm:$0xf] }
 0x1d2   :  { %2892 = vmatpush.bf16.msrb.mxu3 %v4383_v4  ;;  %2906 = vmatpush.bf16.msrb.mxu1 %v4511_v36  ;;  %v4435_v4 = vor.u32 %v5197_v52, %v4432_v3  ;;  %v4563_v36 = vor.u32 %v5229_v56, %v4560_v57  ;;  %v4784_v27 = vld [vmem:[#allocation11 + $0x378] sm:$0xf0]  ;;  %v5185_v31 = vld [vmem:[#allocation11 + $0x4c] sm:$0xf]  ;;  %v4659_v60 = vor.u32 %v5253_v34, %v4656_v55 }
 0x1d3   :  { %2920 = vmatpush.bf16.msrb.mxu2 %v4639_v50  ;;  %2934 = vmatpush.bf16.msrb.mxu0 %v4767_v9  ;;  %v4691_v50 = vor.u32 %v5261_v59, %v4688_v58  ;;  %v4819_v9 = vor.u32 %v5293_v62, %v4816_v40  ;;  %v4384_v32 = vld [vmem:[#allocation11 + $0x58] sm:$0xf0]  ;;  %v5249_v49 = vld [vmem:[#allocation11 + $0x24c] sm:$0xf] }
 0x1d4   :  { %v4512_v24 = vld [vmem:[#allocation11 + $0x158] sm:$0xf0]  ;;  %v5181_v53 = vld [vmem:[#allocation11 + $0x2c] sm:$0xf] }
 0x1d5   :  { %v4640_v61 = vld [vmem:[#allocation11 + $0x258] sm:$0xf0]  ;;  %v5213_v45 = vld [vmem:[#allocation11 + $0x12c] sm:$0xf] }
 0x1d6   :  { %2893 = vmatpush.bf16.msrb.mxu3 %v4367_v12  ;;  %2907 = vmatpush.bf16.msrb.mxu1 %v4495_v17  ;;  %v4547_v12 = vor.u32 %v5225_v10, %v4544_v63  ;;  %v5189_v17 = vld [vmem:[#allocation11 + $0x6c] sm:$0xf]  ;;  %v4368_v41 = vld [vmem:[#allocation11 + $0x38] sm:$0xf0] }
 0x1d7   :  { %2921 = vmatpush.bf16.msrb.mxu2 %v4623_v23  ;;  %2935 = vmatpush.bf16.msrb.mxu0 %v4751_v25  ;;  %v5221_v23 = vld [vmem:[#allocation11 + $0x16c] sm:$0xf]  ;;  %v4528_v25 = vld [vmem:[#allocation11 + $0x178] sm:$0xf0]  ;;  %v4403_v28 = vor.u32 %v5189_v17, %v4400_v18 }
 0x1d8   :  { %v4531_v30 = vor.u32 %v5221_v23, %v4528_v25  ;;  %v4496_v54 = vld [vmem:[#allocation11 + $0x138] sm:$0xf0]  ;;  %v5245_v29 = vld [vmem:[#allocation11 + $0x22c] sm:$0xf] }
 0x1d9   :  { %v4624_v46 = vld [vmem:[#allocation11 + $0x238] sm:$0xf0]  ;;  %v5277_v48 = vld [vmem:[#allocation11 + $0x32c] sm:$0xf] }
 0x1da   :  { %2894 = vmatpush.bf16.msrb.mxu3 %v4351_v39  ;;  %2908 = vmatpush.bf16.msrb.mxu1 %v4479_v33  ;;  %v4787_v39 = vor.u32 %v5285_v26, %v4784_v27  ;;  %v5217_v33 = vld [vmem:[#allocation11 + $0x14c] sm:$0xf]  ;;  %v4752_v37 = vld [vmem:[#allocation11 + $0x338] sm:$0xf0] }
 0x1db   :  { %2922 = vmatpush.bf16.msrb.mxu2 %v4607_v8  ;;  %2936 = vmatpush.bf16.msrb.mxu0 %v4735_v14  ;;  %v5281_v8 = vld [vmem:[#allocation11 + $0x34c] sm:$0xf]  ;;  %v4768_v14 = vld [vmem:[#allocation11 + $0x358] sm:$0xf0] }
 0x1dc   :  { %v5177_v52 = vld [vmem:[#allocation11 + $0xc] sm:$0xf]  ;;  %v4352_v3 = vld [vmem:[#allocation11 + $0x18] sm:$0xf0] }
 0x1dd   :  { %2895 = vmatmul.bf16.vlgmr.msrb.gmra.mxu3 %v5878_v1  ;;  %2909 = vmatmul.bf16.vlgmr.msrb.gmra.mxu1 %v5880_v7  ;;  %v5209_v56 = vld [vmem:[#allocation11 + $0x10c] sm:$0xf]  ;;  %v4480_v57 = vld [vmem:[#allocation11 + $0x118] sm:$0xf0] }
 0x1de   :  { %2943 = vmatpush.bf16.msra.mxu3 %v4467_v47  ;;  %2957 = vmatpush.bf16.msra.mxu1 %v4595_v35  ;;  %v4387_v47 = vor.u32 %v5185_v31, %v4384_v32  ;;  %v4515_v35 = vor.u32 %v5217_v33, %v4512_v24  ;;  %v5241_v59 = vld [vmem:[#allocation11 + $0x20c] sm:$0xf]  ;;  %v4608_v58 = vld [vmem:[#allocation11 + $0x218] sm:$0xf0] }
 0x1df   :  { %2971 = vmatpush.bf16.msra.mxu2 %v4723_v43  ;;  %2985 = vmatpush.bf16.msra.mxu0 %v4851_v44  ;;  %v4643_v43 = vor.u32 %v5249_v49, %v4640_v61  ;;  %v4771_v44 = vor.u32 %v5281_v8, %v4768_v14  ;;  %v5273_v62 = vld [vmem:[#allocation11 + $0x30c] sm:$0xf]  ;;  %v4736_v40 = vld [vmem:[#allocation11 + $0x318] sm:$0xf0]  ;;  %v4611_v5 = vor.u32 %v5241_v59, %v4608_v58  ;;  %v2129_v8 = vperm.slane %v5903_v11, 2 }
 0x1e0   :  { %2923 = vmatmul.bf16.vlgmr.msrb.gmra.mxu2 %v5882_v20  ;;  %2937 = vmatmul.bf16.vlgmr.msrb.gmra.mxu0 %v5876_v0  ;;  %v4739_v6 = vor.u32 %v5273_v62, %v4736_v40 }
 0x1e2   :  { %2944 = vmatpush.bf16.msra.mxu3 %v4451_v42  ;;  %2958 = vmatpush.bf16.msra.mxu1 %v4579_v51  ;;  %v4371_v42 = vor.u32 %v5181_v53, %v4368_v41  ;;  %v4499_v51 = vor.u32 %v5213_v45, %v4496_v54 }
 0x1e3   :  { %2972 = vmatpush.bf16.msra.mxu2 %v4707_v2  ;;  %2986 = vmatpush.bf16.msra.mxu0 %v4835_v38  ;;  %v4627_v2 = vor.u32 %v5245_v29, %v4624_v46  ;;  %v4755_v38 = vor.u32 %v5277_v48, %v4752_v37 }
 0x1e6   :  { %2945 = vmatpush.bf16.msra.mxu3 %v4435_v4  ;;  %2959 = vmatpush.bf16.msra.mxu1 %v4563_v36  ;;  %v4355_v4 = vor.u32 %v5177_v52, %v4352_v3  ;;  %v4483_v36 = vor.u32 %v5209_v56, %v4480_v57 }
 0x1e7   :  { %2973 = vmatpush.bf16.msra.mxu2 %v4691_v50  ;;  %2987 = vmatpush.bf16.msra.mxu0 %v4819_v9 }
 0x1ea   :  { %2946 = vmatpush.bf16.msra.mxu3 %v4419_v16  ;;  %2960 = vmatpush.bf16.msra.mxu1 %v4547_v12 }
 0x1eb   :  { %2974 = vmatpush.bf16.msra.mxu2 %v4675_v19  ;;  %2988 = vmatpush.bf16.msra.mxu0 %v4803_v22 }
 0x1ee   :  { %2947 = vmatpush.bf16.msra.mxu3 %v4403_v28  ;;  %2961 = vmatpush.bf16.msra.mxu1 %v4531_v30 }
 0x1ef   :  { %2975 = vmatpush.bf16.msra.mxu2 %v4659_v60  ;;  %2989 = vmatpush.bf16.msra.mxu0 %v4787_v39 }
 0x1f2   :  { %2948 = vmatpush.bf16.msra.mxu3 %v4387_v47  ;;  %2962 = vmatpush.bf16.msra.mxu1 %v4515_v35 }
 0x1f3   :  { %2976 = vmatpush.bf16.msra.mxu2 %v4643_v43  ;;  %2990 = vmatpush.bf16.msra.mxu0 %v4771_v44 }
 0x1f6   :  { %2949 = vmatpush.bf16.msra.mxu3 %v4371_v42  ;;  %2963 = vmatpush.bf16.msra.mxu1 %v4499_v51 }
 0x1f7   :  { %2977 = vmatpush.bf16.msra.mxu2 %v4627_v2  ;;  %2991 = vmatpush.bf16.msra.mxu0 %v4755_v38 }
 0x1fa   :  { %2950 = vmatpush.bf16.msra.mxu3 %v4355_v4  ;;  %2964 = vmatpush.bf16.msra.mxu1 %v4483_v36 }
 0x1fb   :  { %2978 = vmatpush.bf16.msra.mxu2 %v4611_v5  ;;  %2992 = vmatpush.bf16.msra.mxu0 %v4739_v6 }
 0x1fd   :  { %2951 = vmatmul.bf16.vlgmr.msra.gmra.mxu3 %v5878_v1  ;;  %2965 = vmatmul.bf16.vlgmr.msra.gmra.mxu1 %v5880_v7 }
 0x1fe   :  { %2979 = vmatmul.bf16.vlgmr.msra.gmra.mxu2 %v5882_v20  ;;  %2993 = vmatmul.bf16.vlgmr.msra.gmra.mxu0 %v5876_v0  ;;  %v2128_v0 = vperm.slane %v5903_v11, 1 }
 0x239   :  { %v2826_v9 = vpop.f32.mrf.mxu0 }
 0x23a   :  { %v2798_v50 = vpop.f32.mrf.mxu1 }
 0x23f   :  { %v2784_v10 = vpop.f32.mrf.mxu3 }
 0x240   :  { %v2812_v63 = vpop.f32.mrf.mxu2  ;;  %v2785_v34 = vadd.f32 %v2784_v10, %v2127_v21 }
 0x241   :  { %v2828_v1 = vpop.f32.mrf.mxu0 }
 0x242   :  { %v2800_v13 = vpop.f32.mrf.mxu1  ;;  %v2799_v26 = vadd.f32 %v2798_v50, %v2785_v34 }
 0x244   :  { %v2813_v39 = vadd.f32 %v2812_v63, %v2799_v26 }
 0x246   :  { %v2827_v14 = vadd.f32 %v2826_v9, %v2813_v39  ;;  %v2130_v39 = vperm.slane %v5903_v11, 3 }
 0x247   :  { %v2786_v15 = vpop.f32.mrf.mxu3 }
 0x248   :  { %v2787_v16 = vadd.f32 %v2786_v15, %v2127_v21  ;;  %v2814_v7 = vpop.f32.mrf.mxu2  ;;  %v5914_v43 = vmax.f32 %v2827_v14, 0.0 }
 0x249   :  { %v2882_v25 = vpop.f32.mrf.mxu0 }
 0x24a   :  { %v2801_v12 = vadd.f32 %v2800_v13, %v2787_v16  ;;  %v2854_v17 = vpop.f32.mrf.mxu1  ;;  %v3016_v37 = vrot.slane %v5914_v43, 4  ;;  %v3043_v52 = vmul.f32 %v5914_v43, %v5914_v43 }
 0x24c   :  { %v2815_v20 = vadd.f32 %v2814_v7, %v2801_v12  ;;  %v3017_v57 = vadd.f32 %v3016_v37, %v5914_v43  ;;  %v3052_v40 = vrot.slane %v3043_v52, 4 }
 0x24e   :  { %v5907_v18 = vadd.f32 %v2828_v1, %v2815_v20  ;;  %v3018_v21 = vrot.slane %v3017_v57, 2  ;;  %v3053_v15 = vadd.f32 %v3052_v40, %v3043_v52  ;;  %v5319_v40 = vld [vmem:[#allocation16 + $0x78] sm:$0xff] }
 0x24f   :  { %v2840_v19 = vpop.f32.mrf.mxu3  ;;  %3485 = vmatpush.bf16.msrb.mxu1 %v5319_v40  ;;  %v5330_v40 = vld [vmem:[#allocation16 + $0xd0] sm:$0xff] }
 0x250   :  { %v2841_v22 = vadd.f32 %v2840_v19, %v2128_v0  ;;  %v2868_v23 = vpop.f32.mrf.mxu2 }
 0x251   :  { %v2884_v24 = vpop.f32.mrf.mxu0 }
 0x252   :  { %v2855_v55 = vadd.f32 %v2854_v17, %v2841_v22  ;;  %v2856_v28 = vpop.f32.mrf.mxu1  ;;  %v3019_v22 = vadd.f32 %v3018_v21, %v3017_v57  ;;  %v5310_v21 = vld [vmem:[#allocation16 + $0x30] sm:$0xff] }
 0x254   :  { %v2869_v27 = vadd.f32 %v2868_v23, %v2855_v55  ;;  %v3054_v23 = vrot.slane %v3053_v15, 2 }
 0x256   :  { %v2883_v33 = vadd.f32 %v2882_v25, %v2869_v27  ;;  %v3020_v27 = vrot.slane %v3019_v22, 1 }
 0x257   :  { %v2842_v30 = vpop.f32.mrf.mxu3 }
 0x258   :  { %v2843_v31 = vadd.f32 %v2842_v30, %v2128_v0  ;;  %v2870_v32 = vpop.f32.mrf.mxu2  ;;  %v5912_v47 = vmax.f32 %v2883_v33, 0.0  ;;  %v3021_v33 = vadd.f32 %v3020_v27, %v3019_v22 }
 0x25a   :  { %v2857_v60 = vadd.f32 %v2856_v28, %v2843_v31  ;;  %v2910_v35 = vpop.f32.mrf.mxu1  ;;  %v3023_v44 = vrot.slane %v5912_v47, 4  ;;  %v3044_v45 = vmul.f32 %v5912_v47, %v5912_v47  ;;  %v3055_v28 = vadd.f32 %v3054_v23, %v3053_v15  ;;  %v5318_v15 = vld [vmem:[#allocation16 + $0x70] sm:$0xff]  ;;  %v5309_v23 = vld [vmem:[#allocation16 + $0x28] sm:$0xff] }
 0x25b   :  { %3486 = vmatpush.bf16.msrb.mxu1 %v5318_v15 }
 0x25c   :  { %v2871_v49 = vadd.f32 %v2870_v32, %v2857_v60  ;;  %v3024_v42 = vadd.f32 %v3023_v44, %v5912_v47  ;;  %v3059_v51 = vrot.slane %v3044_v45, 4 }
 0x25d   :  { %v2938_v46 = vpop.f32.mrf.mxu0 }
 0x25e   :  { %v5909_v61 = vadd.f32 %v2884_v24, %v2871_v49  ;;  %v3025_v59 = vrot.slane %v3024_v42, 2  ;;  %v3060_v58 = vadd.f32 %v3059_v51, %v3044_v45  ;;  %v3056_v24 = vrot.slane %v3055_v28, 1 }
 0x25f   :  { %v5941_v45 = vmul.f32 0.125, %v3021_v33  ;;  %v5316_v33 = vld [vmem:[#allocation16 + $0x60] sm:$0xff] }
 0x260   :  { %v2896_v53 = vpop.f32.mrf.mxu3  ;;  %v3026_v63 = vadd.f32 %v3025_v59, %v3024_v42  ;;  %v3061_v13 = vrot.slane %v3060_v58, 2  ;;  %v3057_v44 = vadd.f32 %v3056_v24, %v3055_v28  ;;  %v5324_v24 = vld [vmem:[#allocation16 + $0xa0] sm:$0xff] }
 0x261   :  { %v2897_v41 = vadd.f32 %v2896_v53, %v2129_v8 }
 0x262   :  { %v2912_v62 = vpop.f32.mrf.mxu1  ;;  %v3027_v17 = vrot.slane %v3026_v63, 1  ;;  %v3062_v19 = vadd.f32 %v3061_v13, %v3060_v58  ;;  %v3083_v52 = vmul.f32 0.125, %v3057_v44 }
 0x263   :  { %v2924_v54 = vpop.f32.mrf.mxu2  ;;  %v2911_v29 = vadd.f32 %v2910_v35, %v2897_v41 }
 0x264   :  { %v3028_v55 = vadd.f32 %v3027_v17, %v3026_v63  ;;  %v3063_v26 = vrot.slane %v3062_v19, 1 }
 0x265   :  { %v2925_v48 = vadd.f32 %v2924_v54, %v2911_v29  ;;  %v2940_v7 = vpop.f32.mrf.mxu0 }
 0x266   :  { %v3064_v32 = vadd.f32 %v3063_v26, %v3062_v19  ;;  %v5932_v60 = vmul.f32 0.125, %v3028_v55  ;;  %v5333_v26 = vld [vmem:[#allocation16 + $0xe8] sm:$0xff] }
 0x267   :  { %v2939_v3 = vadd.f32 %v2938_v46, %v2925_v48 }
 0x268   :  { %v2898_v2 = vpop.f32.mrf.mxu3  ;;  %v3084_v35 = vmul.f32 0.125, %v3064_v32  ;;  %v3088_v53 = vmul.f32 %v5932_v60, %v5932_v60  ;;  %v5308_v32 = vld [vmem:[#allocation16 + $0x20] sm:$0xff] }
 0x269   :  { %v5923_v38 = vmax.f32 %v2939_v3, 0.0  ;;  %v2899_v56 = vadd.f32 %v2898_v2, %v2129_v8  ;;  %v3087_v3 = vmul.f32 %v5941_v45, %v5941_v45 }
 0x26a   :  { %v3092_v42 = vsub.f32 %v3084_v35, %v3088_v53 }
 0x26b   :  { %v3030_v4 = vrot.slane %v5923_v38, 4  ;;  %v3045_v36 = vmul.f32 %v5923_v38, %v5923_v38  ;;  %v2913_v5 = vadd.f32 %v2912_v62, %v2899_v56  ;;  %v2926_v6 = vpop.f32.mrf.mxu2  ;;  %v5311_v62 = vld [vmem:[#allocation16 + $0x38] sm:$0xff] }
 0x26c   :  { %v3096_v59 = vmax.f32 %v3092_v42, 0.0  ;;  %3471 = vmatpush.bf16.msrb.mxu3 %v5311_v62  ;;  %v5331_v42 = vld [vmem:[#allocation16 + $0xd8] sm:$0xff] }
 0x26d   :  { %v3031_v50 = vadd.f32 %v3030_v4, %v5923_v38  ;;  %v3066_v9 = vrot.slane %v3045_v36, 4  ;;  %v2927_v10 = vadd.f32 %v2926_v6, %v2913_v5  ;;  %v5327_v4 = vld [vmem:[#allocation16 + $0xb8] sm:$0xff] }
 0x26e   :  { %v5335_v5 = vld [vmem:[#allocation16 + $0xf8] sm:$0xff]  ;;  %3499 = vmatpush.bf16.msrb.mxu2 %v5327_v4 }
 0x26f   :  { %v3032_v1 = vrot.slane %v3031_v50, 2  ;;  %v3067_v16 = vadd.f32 %v3066_v9, %v3045_v36  ;;  %v5930_v12 = vadd.f32 %v2940_v7, %v2927_v10  ;;  %v3091_v36 = vsub.f32 %v3083_v52, %v3087_v3  ;;  %3513 = vmatpush.bf16.msrb.mxu0 %v5335_v5  ;;  %v5334_v7 = vld [vmem:[#allocation16 + $0xf0] sm:$0xff] }
 0x270   :  { %v5952_v10 = vadd.f32 1e-05, %v3096_v59  ;;  %3472 = vmatpush.bf16.msrb.mxu3 %v5310_v21  ;;  %v5322_v59 = vld [vmem:[#allocation16 + $0x90] sm:$0xff] }
 0x271   :  { %v3033_v20 = vadd.f32 %v3032_v1, %v3031_v50  ;;  %v3068_v0 = vrot.slane %v3067_v16, 2  ;;  %v5326_v1 = vld [vmem:[#allocation16 + $0xb0] sm:$0xff] }
 0x272   :  { %3500 = vmatpush.bf16.msrb.mxu2 %v5326_v1  ;;  %5363 = vrsqrt.f32 %v5952_v10  ;;  %v5304_v1 = vld [vmem:[#allocation16] sm:$0xff]  ;;  %vm3120_vm1 = vweird.f32 %v5952_v10 }
 0x273   :  { %v3034_v25 = vrot.slane %v3033_v20, 1  ;;  %v3069_v34 = vadd.f32 %v3068_v0, %v3067_v16  ;;  %v3095_v16 = vmax.f32 %v3091_v36, 0.0  ;;  %3514 = vmatpush.bf16.msrb.mxu0 %v5334_v7  ;;  %v5320_v7 = vld [vmem:[#allocation16 + $0x80] sm:$0xff] }
 0x274   :  { %3473 = vmatpush.bf16.msrb.mxu3 %v5309_v23 }
 0x275   :  { %v3035_v30 = vadd.f32 %v3034_v25, %v3033_v20  ;;  %v3070_v31 = vrot.slane %v3069_v34, 1  ;;  %v5317_v25 = vld [vmem:[#allocation16 + $0x68] sm:$0xff]  ;;  %v5958_v55 = vadd.f32 1e-05, %v3095_v16  ;;  %v5312_v16 = vld [vmem:[#allocation16 + $0x40] sm:$0xff] }
 0x276   :  { %3487 = vmatpush.bf16.msrb.mxu1 %v5317_v25 }
 0x277   :  { %v3071_v49 = vadd.f32 %v3070_v31, %v3069_v34  ;;  %v5935_v8 = vmul.f32 0.125, %v3035_v30  ;;  %v5325_v34 = vld [vmem:[#allocation16 + $0xa8] sm:$0xff]  ;;  %3515 = vmatpush.bf16.msrb.mxu0 %v5333_v26  ;;  %vm3110_vm11 = vweird.f32 %v5958_v55 }
 0x278   :  { %3501 = vmatpush.bf16.msrb.mxu2 %v5325_v34  ;;  %3474 = vmatpush.bf16.msrb.mxu3 %v5308_v32 }
 0x279   :  { %v3085_v29 = vmul.f32 0.125, %v3071_v49  ;;  %v3089_v46 = vmul.f32 %v5935_v8, %v5935_v8  ;;  %v5332_v49 = vld [vmem:[#allocation16 + $0xe0] sm:$0xff] }
 0x27a   :  { %v2966_v54 = vpop.f32.mrf.mxu1  ;;  %3488 = vmatpush.bf16.msrb.mxu1 %v5316_v33 }
 0x27b   :  { %v2994_v2 = vpop.f32.mrf.mxu0  ;;  %v3093_v56 = vsub.f32 %v3085_v29, %v3089_v46  ;;  %3516 = vmatpush.bf16.msrb.mxu0 %v5332_v49  ;;  %v5307_v29 = vld [vmem:[#allocation16 + $0x18] sm:$0xff] }
 0x27c   :  { %3502 = vmatpush.bf16.msrb.mxu2 %v5324_v24  ;;  %v5315_v46 = vld [vmem:[#allocation16 + $0x58] sm:$0xff]  ;;  %3475 = vmatpush.bf16.msrb.mxu3 %v5307_v29 }
 0x27d   :  { %v3097_v6 = vmax.f32 %v3093_v56, 0.0  ;;  %v5306_v56 = vld [vmem:[#allocation16 + $0x10] sm:$0xff] }
 0x27e   :  { %3489 = vmatpush.bf16.msrb.mxu1 %v5315_v46 }
 0x27f   :  { %v5955_v20 = vadd.f32 1e-05, %v3097_v6  ;;  %3517 = vmatpush.bf16.msrb.mxu0 %v5331_v42  ;;  %v5305_v6 = vld [vmem:[#allocation16 + $0x8] sm:$0xff] }
 0x280   :  { %v2952_v14 = vpop.f32.mrf.mxu3  ;;  %3476 = vmatpush.bf16.msrb.mxu3 %v5306_v56 }
 0x281   :  { %v2953_v41 = vadd.f32 %v2952_v14, %v2130_v39  ;;  %v2980_v37 = vpop.f32.mrf.mxu2  ;;  %5365 = vrsqrt.f32 %v5955_v20  ;;  %v5962_v14 = vpop.eup %5363  ;;  %vm3130_vm4 = vweird.f32 %v5955_v20 }
 0x282   :  { %5367 = vrsqrt.f32 %v5958_v55  ;;  %vm3121_vm0 = vweird.f32 %v5962_v14 }
 0x283   :  { %v2967_v48 = vadd.f32 %v2966_v54, %v2953_v41  ;;  %3518 = vmatpush.bf16.msrb.mxu0 %v5330_v40  ;;  %vm3122_vm3 = vmor %vm3120_vm1, %vm3121_vm0 }
 0x284   :  { %3477 = vmatpush.bf16.msrb.mxu3 %v5305_v6 }
 0x285   :  { %v2981_v51 = vadd.f32 %v2980_v37, %v2967_v48  ;;  %v5323_v48 = vld [vmem:[#allocation16 + $0x98] sm:$0xff]  ;;  %v3115_v37 = vmul.f32 %v5962_v14, %v5952_v10 }
 0x286   :  { %3503 = vmatpush.bf16.msrb.mxu2 %v5323_v48  ;;  %v3099_v48 = vld [vmem:[#allocation13] sm:$0xf] }
 0x287   :  { %v2995_v57 = vadd.f32 %v2994_v2, %v2981_v51  ;;  %v5966_v41 = vpop.eup %5365  ;;  %v3116_v62 = vmul.f32 %v5962_v14, %v3115_v37 }
 0x288   :  { %v5972_v52 = vpop.eup %5367  ;;  %v3125_v3 = vmul.f32 %v5966_v41, %v5955_v20  ;;  %3478 = vmatpush.bf16.msrb.mxu3 %v5304_v1  ;;  %vm3131_vm2 = vweird.f32 %v5966_v41 }
 0x289   :  { %v5947_v58 = vmax.f32 %v2995_v57, 0.0  ;;  %v5314_v57 = vld [vmem:[#allocation16 + $0x50] sm:$0xff]  ;;  %v3105_v4 = vmul.f32 %v5972_v52, %v5958_v55  ;;  %vm3132_vm7 = vmor %vm3130_vm4, %vm3131_vm2  ;;  %vm3111_vm8 = vweird.f32 %v5972_v52 }
 0x28a   :  { %3490 = vmatpush.bf16.msrb.mxu1 %v5314_v57  ;;  %v3126_v5 = vmul.f32 %v5966_v41, %v3125_v3  ;;  %3504 = vmatpush.bf16.msrb.mxu2 %v5322_v59  ;;  %vm3112_vm12 = vmor %vm3110_vm11, %vm3111_vm8  ;;  %v2996_v59 = vpop.f32.mrf.mxu0 }
 0x28b   :  { %v3037_v50 = vrot.slane %v5947_v58, 4  ;;  %v3046_v9 = vmul.f32 %v5947_v58, %v5947_v58  ;;  %v3106_v21 = vmul.f32 %v5972_v52, %v3105_v4 }
 0x28c   :  { %v3127_v15 = vmul.f32 0.5, %v3126_v5 }
 0x28d   :  { %v3038_v63 = vadd.f32 %v3037_v50, %v5947_v58  ;;  %v3073_v13 = vrot.slane %v3046_v9, 4  ;;  %v5313_v50 = vld [vmem:[#allocation16 + $0x48] sm:$0xff] }
 0x28e   :  { %3491 = vmatpush.bf16.msrb.mxu1 %v5313_v50  ;;  %v3128_v23 = vsub.f32 1.5, %v3127_v15 }
 0x28f   :  { %v3039_v0 = vrot.slane %v3038_v63, 2  ;;  %v3074_v17 = vadd.f32 %v3073_v13, %v3046_v9  ;;  %v5321_v9 = vld [vmem:[#allocation16 + $0x88] sm:$0xff] }
 0x290   :  { %v5329_v13 = vld [vmem:[#allocation16 + $0xc8] sm:$0xff]  ;;  %3505 = vmatpush.bf16.msrb.mxu2 %v5321_v9  ;;  %v3156_v9 = vld [vmem:[#allocation14] sm:$0xf] }
 0x291   :  { %v3040_v19 = vadd.f32 %v3039_v0, %v3038_v63  ;;  %v3075_v22 = vrot.slane %v3074_v17, 2  ;;  %v3117_v63 = vmul.f32 0.5, %v3116_v62  ;;  %3519 = vmatpush.bf16.msrb.mxu0 %v5329_v13 }
 0x292   :  { %3492 = vmatpush.bf16.msrb.mxu1 %v5312_v16 }
 0x293   :  { %v3041_v27 = vrot.slane %v3040_v19, 1  ;;  %v3076_v28 = vadd.f32 %v3075_v22, %v3074_v17  ;;  %v3118_v0 = vsub.f32 1.5, %v3117_v63  ;;  %v5328_v17 = vld [vmem:[#allocation16 + $0xc0] sm:$0xff]  ;;  %v3107_v22 = vmul.f32 0.5, %v3106_v21 }
 0x294   :  { %3506 = vmatpush.bf16.msrb.mxu2 %v5320_v7  ;;  %v3003_v21 = vmax.f32 %v5907_v18, 0.0 }
 0x295   :  { %v3042_v30 = vadd.f32 %v3041_v27, %v3040_v19  ;;  %v3077_v31 = vrot.slane %v3076_v28, 1  ;;  %3520 = vmatpush.bf16.msrb.mxu0 %v5328_v17  ;;  %v3119_v26 = vmul.f32 %v5962_v14, %v3118_v0  ;;  %v3108_v27 = vsub.f32 1.5, %v3107_v22 }
 0x297   :  { %v3078_v35 = vadd.f32 %v3077_v31, %v3076_v28  ;;  %v5964_v53 = vmul.f32 0.125, %v3042_v30  ;;  %v3129_v30 = vmul.f32 %v5966_v41, %v3128_v23  ;;  %v2954_v31 = vpop.f32.mrf.mxu3  ;;  %v3123_v33 = vsel %vm3122_vm3, %v5962_v14, %v3119_v26 }
 0x298   :  { %v3109_v24 = vmul.f32 %v5972_v52, %v3108_v27  ;;  %v2955_v10 = vadd.f32 %v2954_v31, %v2130_v39 }
 0x299   :  { %v3086_v44 = vmul.f32 0.125, %v3078_v35  ;;  %v3090_v54 = vmul.f32 %v5964_v53, %v5964_v53  ;;  %v3133_v49 = vsel %vm3132_vm7, %v5966_v41, %v3129_v30  ;;  %v2982_v41 = vpop.f32.mrf.mxu2 }
 0x29a   :  { %v3149_v14 = vrot.slane %v3133_v49, 6  ;;  %v3113_v37 = vsel %vm3112_vm12, %v5972_v52, %v3109_v24 }
 0x29b   :  { %v3094_v51 = vsub.f32 %v3086_v44, %v3090_v54  ;;  %v3148_v44 = vrot.slane %v3123_v33, 7  ;;  %v2968_v54 = vpop.f32.mrf.mxu1 }
 0x29c   :  { %v2969_v46 = vadd.f32 %v2968_v54, %v2955_v10 }
 0x29d   :  { %v3098_v2 = vmax.f32 %v3094_v51, 0.0  ;;  %v3151_v42 = vsel %vm1934_vm6, %v3113_v37, %v3148_v44 }
 0x29e   :  { %v2983_v3 = vadd.f32 %v2982_v41, %v2969_v46 }
 0x29f   :  { %v3103_v36 = vadd.f32 1e-05, %v3098_v2 }
 0x2a0   :  { %v2997_v4 = vadd.f32 %v2996_v59, %v2983_v3 }
 0x2a1   :  { %5369 = vrsqrt.f32 %v3103_v36  ;;  %vm3140_vm9 = vweird.f32 %v3103_v36 }
 0x2a2   :  { %v3006_v15 = vmax.f32 %v2997_v4, 0.0 }
 0x2a7   :  { %v5370_v19 = vpop.eup %5369 }
 0x2a8   :  { %v3135_v25 = vmul.f32 %v5370_v19, %v3103_v36  ;;  %vm3141_vm5 = vweird.f32 %v5370_v19 }
 0x2a9   :  { %vm3142_vm10 = vmor %vm3140_vm9, %vm3141_vm5 }
 0x2aa   :  { %v3136_v34 = vmul.f32 %v5370_v19, %v3135_v25 }
 0x2ac   :  { %v3137_v28 = vmul.f32 0.5, %v3136_v34 }
 0x2ae   :  { %v3138_v32 = vsub.f32 1.5, %v3137_v28 }
 0x2b0   :  { %v3139_v35 = vmul.f32 %v5370_v19, %v3138_v32 }
 0x2b2   :  { %v3143_v20 = vsel %vm3142_vm10, %v5370_v19, %v3139_v35 }
 0x2b3   :  { %v3150_v29 = vrot.slane %v3143_v20, 5 }
 0x2b5   :  { %v3152_v11 = vsel %vm1936_vm14, %v3149_v14, %v3150_v29 }
 0x2b6   :  { %v3153_v39 = vsel %vm1938_vm15, %v3151_v42, %v3152_v11 }
 0x2b7   :  { %v3155_v51 = vmul.f32 %v3153_v39, %v3099_v48 }
 0x2b9   :  { %v3158_v2 = vperm.slane %v3155_v51, 0  ;;  %v3159_v55 = vperm.slane %v3155_v51, 1  ;;  %v3160_v56 = vperm.slane %v3155_v51, 2  ;;  %v3161_v57 = vperm.slane %v3155_v51, 3 }
 0x2bb   :  { %v3167_v62 = vmul.f32 %v3159_v55, %v5932_v60  ;;  %v3168_v40 = vmul.f32 %v3160_v56, %v5935_v8  ;;  %v3169_v52 = vmul.f32 %v3161_v57, %v5964_v53  ;;  %v3166_v36 = vmul.f32 %v3158_v2, %v5941_v45 }
 0x2bc   :  { %v3004_v8 = vmax.f32 %v5909_v61, 0.0  ;;  %v3005_v53 = vmax.f32 %v5930_v12, 0.0  ;;  %v3189_v16 = vmul.f32 %v3161_v57, %v3006_v15  ;;  %v3182_v45 = vmul.f32 %v3158_v2, %v5914_v43 }
 0x2bd   :  { %v3174_v5 = vrot.slane %v3167_v62, 7  ;;  %v3175_v6 = vrot.slane %v3168_v40, 6  ;;  %v3176_v50 = vrot.slane %v3169_v52, 5  ;;  %v3186_v7 = vmul.f32 %v3158_v2, %v3003_v21 }
 0x2be   :  { %v3183_v0 = vmul.f32 %v3159_v55, %v5912_v47  ;;  %v3187_v25 = vmul.f32 %v3159_v55, %v3004_v8  ;;  %v3184_v18 = vmul.f32 %v3160_v56, %v5923_v38  ;;  %v3188_v34 = vmul.f32 %v3160_v56, %v3005_v53  ;;  %v5354_v38 = vld [vmem:[%s6028_s10] ss:$0 sm:$0xff]  ;;  %s5639_s10 = smov 128  }
 0x2bf   :  { %v3177_v63 = vsel %vm1934_vm6, %v3166_v36, %v3174_v5  ;;  %v3178_v13 = vsel %vm1936_vm14, %v3175_v6, %v3176_v50  ;;  %v3185_v26 = vmul.f32 %v3161_v57, %v5947_v58 }
 0x2c0   :  { %v3179_v60 = vsel %vm1938_vm15, %v3177_v63, %v3178_v13 }
 0x2c1   :  { %v3181_v1 = vsub.f32 %v3156_v9, %v3179_v60 }
 0x2c3   :  { %v3194_v17 = vperm.slane %v3181_v1, 3  ;;  %v3191_v19 = vperm.slane %v3181_v1, 0  ;;  %v3192_v22 = vperm.slane %v3181_v1, 1  ;;  %v3193_v23 = vperm.slane %v3181_v1, 2 }
 0x2c5   :  { %v3206_v61 = vadd.f32 %v3194_v17, %v3189_v16  ;;  %v3199_v27 = vadd.f32 %v3191_v19, %v3182_v45  ;;  %v3203_v12 = vadd.f32 %v3191_v19, %v3186_v7  ;;  %v3200_v28 = vadd.f32 %v3192_v22, %v3183_v0 }
 0x2c6   :  { %v3204_v30 = vadd.f32 %v3192_v22, %v3187_v25  ;;  %v3201_v31 = vadd.f32 %v3193_v23, %v3184_v18  ;;  %v3205_v43 = vadd.f32 %v3193_v23, %v3188_v34  ;;  %v3202_v32 = vadd.f32 %v3194_v17, %v3185_v26 }
 0x2c7   :  { %v3207_v33 = vpack.c.bf16 %v3203_v12, %v3199_v27 }
 0x2c8   :  { %v3208_v47 = vpack.c.bf16 %v3204_v30, %v3200_v28  ;;  %v3209_v24 = vpack.c.bf16 %v3205_v43, %v3201_v31  ;;  %v3210_v10 = vpack.c.bf16 %v3206_v61, %v3202_v32 }
 0x2c9   :  { %3479 = vmatmul.bf16.vlgmr.msrb.gmra.mxu3 %v3207_v33 }
 0x2ca   :  { %3493 = vmatmul.bf16.vlgmr.msrb.gmra.mxu1 %v3208_v47  ;;  %3507 = vmatmul.bf16.vlgmr.msrb.gmra.mxu2 %v3209_v24 }
 0x2cb   :  { %3521 = vmatmul.bf16.vlgmr.msrb.gmra.mxu0 %v3210_v10 }
 0x347   :  { %v3494_v58 = vpop.f32.mrf.mxu1 }
 0x348   :  { %v3522_v54 = vpop.f32.mrf.mxu0 }
 0x34c   :  { %v3480_v49 = vpop.f32.mrf.mxu3 }
 0x34d   :  { %v3481_v35 = vadd.f32 %v5354_v38, %v3480_v49  ;;  %v3508_v44 = vpop.f32.mrf.mxu2 }
 0x34f   :  { %v3495_v20 = vadd.f32 %v3494_v58, %v3481_v35  ;;  %v3496_v37 = vpop.f32.mrf.mxu1 }
 0x350   :  { %v3524_v41 = vpop.f32.mrf.mxu0 }
 0x351   :  { %v3509_v14 = vadd.f32 %v3508_v44, %v3495_v20 }
 0x353   :  { %v3523_v29 = vadd.f32 %v3522_v54, %v3509_v14 }
 0x354   :  { %v3482_v46 = vpop.f32.mrf.mxu3 }
 0x355   :  { %3527 = vst [vmem:[#allocation17] sm:$0xff] %v3523_v29  ;;  %v3483_v48 = vadd.f32 %v5354_v38, %v3482_v46  ;;  %v3510_v11 = vpop.f32.mrf.mxu2 }
 0x357   :  { %v3497_v42 = vadd.f32 %v3496_v37, %v3483_v48 }
 0x359   :  { %v3511_v39 = vadd.f32 %v3510_v11, %v3497_v42 }
 0x35b   :  { %v3525_v51 = vadd.f32 %v3524_v41, %v3511_v39 }
 0x35d   :  { %3528 = vst [vmem:[#allocation17 + $0x8] sm:$0xff] %v3525_v51 }
 0x35e   :  { %3541 = dma.vmem_to_hbm [thread:$0]  %s3534_s22, 256, %s3536_s24, [#allocation4], %s5639_s10, %s5639_s10, %s5640_s27  }
 0x35f   :  { %5621 = dma.done.wait [#allocation4], 256  }
 0x360   :  { %5622 = vsyncadd [#allocation4], 4294967040 }
 0x361   :  { %3546 = vsyncpa [#allocation3], 1 }
 0x362   :  { %3547 = vsyncpa [#allocation6], 1 }
 0x363   :  { %3548 = vsyncpa [#allocation9], 1 }
 0x364   :  { %3549 = vsyncpa [#allocation12], 1 }
 0x365   :  { %3550 = vsyncpa [#allocation15], 1 }
 0x366   :  { %3551 = vsyncpa [#allocation4], 1 }

</bundles_post_ra>
